<compile_context>
chip_gen: v7x
topology: tpu7x:2x2x1
jax: 0.10.0
libtpu: 0.0.40
codegen_flags: <defaults>
</compile_context>

<pallas_src>
import functools

import jax
import jax.numpy as jnp
import numpy as np
from jax.experimental import pallas as pl
from jax.experimental.pallas import tpu as pltpu


_LANE = 128
_SUBLANE = 8
_MAX_CHUNK_T = 64          # time steps whose input projection is hoisted per chunk
_GATE_PERM = (0, 1, 3, 2)  # PyTorch gate order [i, f, g, o] -> kernel order [i, f, o, g]


def _round_up(x, m):
    return (x + m - 1) // m * m


def _pick_chunk(T):
    """Largest divisor of T that is <= _MAX_CHUNK_T (keeps chunked projection exact)."""
    for d in range(min(T, _MAX_CHUNK_T), 0, -1):
        if T % d == 0:
            return d
    return T


def _vmem_limit_bytes(T, Bp, F, Hp, C):
    f32 = 4
    resident = (
        T * Bp * F * f32             # x_flat (resident, constant block index)
        + T * Bp * Hp * f32          # out slab (resident, constant block index)
        + T * Bp * F * f32           # seq scratch
        + C * Bp * 4 * Hp * f32      # zx chunk scratch
        + 2 * (F * 4 * Hp * 2)       # W_ih blocks (bf16, double-buffered over layers)
        + 2 * (Hp * 4 * Hp * f32)    # W_hh blocks (double-buffered)
        + 2 * (8 * 4 * Hp * f32)     # bias blocks (sublane-padded)
        + 2 * 4 * (Bp * Hp * f32)    # h0, c0, h_n, c_n blocks
    )
    return int(min(128 << 20, max(32 << 20, resident + (8 << 20))))


# ----------------------------------------------------------------------------
# Fused kernel: one grid step per LSTM layer; all time steps inside the body.
# ----------------------------------------------------------------------------
def _make_kernel(T, Bp, F, Hp, C):
    n_chunks = T // C
    inner_unroll = min(C, 8)

    def kernel(x_ref, h0_ref, c0_ref, wih_ref, whh_ref, b_ref,
               out_ref, hn_ref, cn_ref, zx_scr, seq_scr):
        layer = pl.program_id(0)
        last_layer = pl.num_programs(0) - 1
        is_first = layer == 0
        not_first = layer > 0
        is_last = layer == last_layer
        not_last = layer < last_layer

        # seq_scr is F lanes wide so it can feed the next layer's (F, 4Hp) W_ih.
        # If F > Hp, zero the extra lanes once (never read uninitialized VMEM).
        if F > Hp:
            @pl.when(is_first)
            def _():
                seq_scr[:, Hp:] = jnp.zeros((T * Bp, F - Hp), jnp.float32)

        wih = wih_ref[...]      # (F, 4Hp)  bf16 (MXU operands)
        whh = whh_ref[...]      # (Hp, 4Hp) f32  (recurrence kept in f32)
        bias = b_ref[...]       # (1, 4Hp)  f32  (pre-summed b_ih + b_hh; zero here)

        def project_chunk(src_ref, base):
            # One (C*Bp, F) @ (F, 4Hp) bf16 MXU matmul per chunk.  For layers > 0
            # this reads seq_scr rows strictly before the recurrence below
            # overwrites them (read-before-write within the chunk is safe).
            zin = src_ref[pl.ds(base, C * Bp), :].astype(jnp.bfloat16)
            zx_scr[...] = (
                jnp.dot(zin, wih, preferred_element_type=jnp.float32) + bias)

        def chunk_body(ci, carry):
            base = pl.multiple_of(ci * (C * Bp), C * Bp)

            @pl.when(is_first)
            def _():
                project_chunk(x_ref, base)        # layer 0: time-reversed input

            @pl.when(not_first)
            def _():
                project_chunk(seq_scr, base)      # layer l>0: previous layer's h

            def step(r, hc):
                h, c = hc
                row = pl.multiple_of(r * Bp, Bp)
                # Per-step work is only h @ W_hh; x-projection was hoisted above.
                z = zx_scr[pl.ds(row, Bp), :] + jnp.dot(
                    h, whh, preferred_element_type=jnp.float32)      # (Bp, 4Hp)
                # Gate order [i, f, o, g]: one streaming sigmoid over 3*Hp lanes,
                # one tanh over Hp lanes; every slice is 128-lane aligned.
                sig = jax.nn.sigmoid(z[:, :3 * Hp])
                g_g = jnp.tanh(z[:, 3 * Hp:])
                i_g = sig[:, :Hp]
                f_g = sig[:, Hp:2 * Hp]
                o_g = sig[:, 2 * Hp:3 * Hp]
                c_new = f_g * c + i_g * g_g
                h_new = o_g * jnp.tanh(c_new)

                orow = pl.multiple_of(base + row, Bp)

                @pl.when(is_last)
                def _():
                    # Last layer streams straight into the output slab
                    # (no final seq -> out copy pass).
                    out_ref[pl.ds(orow, Bp), :] = h_new

                @pl.when(not_last)
                def _():
                    seq_scr[pl.ds(orow, Bp), 0:Hp] = h_new

                return (h_new, c_new)

            return jax.lax.fori_loop(0, C, step, carry, unroll=inner_unroll)

        h_last, c_last = jax.lax.fori_loop(
            0, n_chunks, chunk_body, (h0_ref[...], c0_ref[...]))
        hn_ref[...] = h_last
        cn_ref[...] = c_last

    return kernel


def _fused_backward_lstm(x_flat, h0, c0, wih_s, whh_s, bias_s,
                         *, num_layers, T, Bp, F, Hp, C):
    kernel = _make_kernel(T, Bp, F, Hp, C)
    grid_spec = pltpu.PrefetchScalarGridSpec(
        num_scalar_prefetch=0,
        grid=(num_layers,),
        in_specs=[
            pl.BlockSpec((T * Bp, F), lambda l: (0, 0)),                 # x (resident)
            pl.BlockSpec((None, Bp, Hp), lambda l: (l, 0, 0)),           # h0[l]
            pl.BlockSpec((None, Bp, Hp), lambda l: (l, 0, 0)),           # c0[l]
            pl.BlockSpec((None, F, 4 * Hp), lambda l: (l, 0, 0)),        # W_ih[l] (bf16)
            pl.BlockSpec((None, Hp, 4 * Hp), lambda l: (l, 0, 0)),       # W_hh[l]
            pl.BlockSpec((None, 1, 4 * Hp), lambda l: (l, 0, 0)),        # bias[l]
        ],
        out_specs=[
            pl.BlockSpec((T * Bp, Hp), lambda l: (0, 0)),                # out (resident)
            pl.BlockSpec((None, Bp, Hp), lambda l: (l, 0, 0)),           # h_n[l]
            pl.BlockSpec((None, Bp, Hp), lambda l: (l, 0, 0)),           # c_n[l]
        ],
        scratch_shapes=[
            pltpu.VMEM((C * Bp, 4 * Hp), jnp.float32),   # chunked input projection
            pltpu.VMEM((T * Bp, F), jnp.float32),        # per-layer output sequence
        ],
    )
    out_flat, h_n, c_n = pl.pallas_call(
        kernel,
        out_shape=(
            jax.ShapeDtypeStruct((T * Bp, Hp), jnp.float32),
            jax.ShapeDtypeStruct((num_layers, Bp, Hp), jnp.float32),
            jax.ShapeDtypeStruct((num_layers, Bp, Hp), jnp.float32),
        ),
        grid_spec=grid_spec,
        compiler_params=pltpu.CompilerParams(
            dimension_semantics=("arbitrary",),
            vmem_limit_bytes=_vmem_limit_bytes(T, Bp, F, Hp, C)),
    )(x_flat, h0, c0, wih_s, whh_s, bias_s)
    return out_flat, h_n, c_n


# ----------------------------------------------------------------------------
# Parameters + packing (gate reorder, lane/sublane padding, layer stacking).
# ----------------------------------------------------------------------------
def init_backward_controller_params(key, num_inputs, num_outputs, num_layers):
    """Deterministic synthetic params mirroring the PyTorch __init__."""
    stdev = 5.0 / np.sqrt(num_inputs + num_outputs)
    params = {"w_ih": [], "w_hh": [], "bias": []}
    keys = jax.random.split(key, 2 * num_layers + 2)
    for l in range(num_layers):
        d_in = num_inputs if l == 0 else num_outputs
        w_ih = jax.random.uniform(keys[2 * l], (4 * num_outputs, d_in),
                                  minval=-stdev, maxval=stdev, dtype=jnp.float32)
        w_hh = jax.random.uniform(keys[2 * l + 1], (4 * num_outputs, num_outputs),
                                  minval=-stdev, maxval=stdev, dtype=jnp.float32)
        params["w_ih"].append(jnp.transpose(w_ih))   # (d_in, 4H), gate order [i,f,g,o]
        params["w_hh"].append(jnp.transpose(w_hh))   # (H, 4H)
        # nn.LSTM biases (dim()==1) are constant_(0); this is the pre-summed
        # b_ih + b_hh.  NOTE: if importing real PyTorch weights, sum both biases.
        params["bias"].append(jnp.zeros((1, 4 * num_outputs), jnp.float32))
    params["h_init"] = 0.05 * jax.random.normal(
        keys[-2], (num_layers, 1, num_outputs), dtype=jnp.float32)
    params["c_init"] = 0.05 * jax.random.normal(
        keys[-1], (num_layers, 1, num_outputs), dtype=jnp.float32)
    return params


def pack_backward_controller_params(params, num_layers):
    """One-time packing: reorder gates to [i,f,o,g], pad H->Hp / D->F to 128 lanes,
    stack layers, cast W_ih to bf16 (MXU operands)."""
    H = params["w_hh"][0].shape[0]
    D = params["w_ih"][0].shape[0]
    Hp = _round_up(H, _LANE)
    F = max(_round_up(D, _LANE), Hp)
    wih_s = np.zeros((num_layers, F, 4 * Hp), np.float32)
    whh_s = np.zeros((num_layers, Hp, 4 * Hp), np.float32)
    bias_s = np.zeros((num_layers, 1, 4 * Hp), np.float32)
    for l in range(num_layers):
        w_ih = np.asarray(params["w_ih"][l])   # (d_in, 4H)
        w_hh = np.asarray(params["w_hh"][l])   # (H, 4H)
        b = np.asarray(params["bias"][l])      # (1, 4H)
        d_in = w_ih.shape[0]
        for dst, src in enumerate(_GATE_PERM):
            wih_s[l, :d_in, dst * Hp:dst * Hp + H] = w_ih[:, src * H:(src + 1) * H]
            whh_s[l, :H, dst * Hp:dst * Hp + H] = w_hh[:, src * H:(src + 1) * H]
            bias_s[l, :, dst * Hp:dst * Hp + H] = b[:, src * H:(src + 1) * H]
    return {
        "w_ih_stack": jnp.asarray(wih_s, jnp.bfloat16),   # bf16 MXU operands
        "w_hh_stack": jnp.asarray(whh_s, jnp.float32),    # recurrence stays f32
        "bias_stack": jnp.asarray(bias_s, jnp.float32),
    }


def create_hidden_state(params, batch_size):
    h = jnp.tile(params["h_init"], (1, batch_size, 1))
    c = jnp.tile(params["c_init"], (1, batch_size, 1))
    return (h, c)


@functools.partial(jax.jit, static_argnames=("num_layers",))
def backward_controller_forward(inp, packed, prev_states, *, num_layers):
    """inp: (T, B, num_inputs); prev_states: ((L,B,H), (L,B,H))."""
    h_prev, c_prev = prev_states
    T, B, D = inp.shape
    H = h_prev.shape[-1]
    Hp = _round_up(H, _LANE)
    F = max(_round_up(D, _LANE), Hp)
    Bp = _round_up(B, _SUBLANE)
    C = _pick_chunk(T)

    # Time reversal folded into the same copy that lane/sublane-pads the input
    # (no HBM pass beyond the padding copy we need anyway).
    x = jnp.pad(inp[::-1], ((0, 0), (0, Bp - B), (0, F - D)))
    x_flat = x.reshape(T * Bp, F)
    h0 = jnp.pad(h_prev, ((0, 0), (0, Bp - B), (0, Hp - H)))
    c0 = jnp.pad(c_prev, ((0, 0), (0, Bp - B), (0, Hp - H)))

    out_flat, h_n, c_n = _fused_backward_lstm(
        x_flat, h0, c0,
        packed["w_ih_stack"], packed["w_hh_stack"], packed["bias_stack"],
        num_layers=num_layers, T=T, Bp=Bp, F=F, Hp=Hp, C=C)

    out = out_flat.reshape(T, Bp, Hp)[:, :B, :H]
    return out, (h_n[:, :B, :H], c_n[:, :B, :H])


# ----------------------------------------------------------------------------
# Pure-JAX reference (PyTorch nn.LSTM semantics) for a sanity check.
# ----------------------------------------------------------------------------
def _lstm_layer_ref(x, w_ih_t, w_hh_t, bias, h0, c0):
    H = h0.shape[-1]

    def step(carry, x_t):
        h, c = carry
        z = x_t @ w_ih_t + h @ w_hh_t + bias
        i = jax.nn.sigmoid(z[:, 0 * H:1 * H])
        f = jax.nn.sigmoid(z[:, 1 * H:2 * H])
        g = jnp.tanh(z[:, 2 * H:3 * H])
        o = jax.nn.sigmoid(z[:, 3 * H:4 * H])
        c = f * c + i * g
        h = o * jnp.tanh(c)
        return (h, c), h

    (h_n, c_n), out = jax.lax.scan(step, (h0, c0), x)
    return out, h_n, c_n


def backward_controller_ref(inp, params, prev_states, num_layers):
    h_prev, c_prev = prev_states
    x = inp[::-1]
    hs, cs = [], []
    for l in range(num_layers):
        x, h_n, c_n = _lstm_layer_ref(
            x, params["w_ih"][l], params["w_hh"][l], params["bias"][l],
            h_prev[l], c_prev[l])
        hs.append(h_n)
        cs.append(c_n)
    return x, (jnp.stack(hs), jnp.stack(cs))


# ----------------------------------------------------------------------------
if __name__ == "__main__":
    num_inputs = 32
    num_outputs = 32
    num_layers = 2
    seq_len = 8
    batch = 8

    key = jax.random.PRNGKey(0)
    k_param, k_inp = jax.random.split(key)

    params = init_backward_controller_params(
        k_param, num_inputs, num_outputs, num_layers)
    packed = pack_backward_controller_params(params, num_layers)
    inp = jax.random.normal(k_inp, (seq_len, batch, num_inputs), jnp.float32)
    prev_states = create_hidden_state(params, batch)

    out, (h_n, c_n) = backward_controller_forward(
        inp, packed, prev_states, num_layers=num_layers)
    out = jax.block_until_ready(out)
    h_n = jax.block_until_ready(h_n)
    c_n = jax.block_until_ready(c_n)

    # Sanity check against a pure-f32 JAX reference of the PyTorch semantics.
    # Tolerance is loosened because the hoisted input projection uses bf16 MXU
    # operands (f32 accumulation); the recurrence/gate math stays in f32.
    out_r, (h_r, c_r) = backward_controller_ref(inp, params, prev_states, num_layers)
    assert out.shape == (seq_len, batch, num_outputs)
    assert h_n.shape == (num_layers, batch, num_outputs)
    assert c_n.shape == (num_layers, batch, num_outputs)
    np.testing.assert_allclose(np.asarray(out), np.asarray(out_r), rtol=5e-2, atol=5e-2)
    np.testing.assert_allclose(np.asarray(h_n), np.asarray(h_r), rtol=5e-2, atol=5e-2)
    np.testing.assert_allclose(np.asarray(c_n), np.asarray(c_r), rtol=5e-2, atol=5e-2)

    print("KERNEL_OK")
</pallas_src>

<mosaic_0001>
module attributes {stable_mosaic.version = 11 : i64} {
  func.func @kernel(%arg0: i32, %arg1: memref<64x128xf32, #tpu.memory_space<vmem>>, %arg2: memref<1x8x128xf32, #tpu.memory_space<vmem>>, %arg3: memref<1x8x128xf32, #tpu.memory_space<vmem>>, %arg4: memref<1x128x512xbf16, #tpu.memory_space<vmem>>, %arg5: memref<1x128x512xf32, #tpu.memory_space<vmem>>, %arg6: memref<1x1x512xf32, #tpu.memory_space<vmem>>, %arg7: memref<64x128xf32, #tpu.memory_space<vmem>>, %arg8: memref<1x8x128xf32, #tpu.memory_space<vmem>>, %arg9: memref<1x8x128xf32, #tpu.memory_space<vmem>>, %arg10: memref<64x512xf32, #tpu.memory_space<vmem>>, %arg11: memref<64x128xf32, #tpu.memory_space<vmem>>) attributes {dimension_semantics = [#tpu.dimension_semantics<arbitrary>], iteration_bounds = array<i64: 2>, scalar_prefetch = 0 : i64, scratch_operands = 2 : i64, tpu.core_type = #tpu.core_type<tc>, window_params = [{pipeline_mode = #tpu.pipeline_mode<synchronous>, transform_indices = @transform_0, window_bounds = array<i64: 64, 128>}, {transform_indices = @transform_1, window_bounds = array<i64: 1, 8, 128>}, {transform_indices = @transform_2, window_bounds = array<i64: 1, 8, 128>}, {transform_indices = @transform_3, window_bounds = array<i64: 1, 128, 512>}, {transform_indices = @transform_4, window_bounds = array<i64: 1, 128, 512>}, {transform_indices = @transform_5, window_bounds = array<i64: 1, 1, 512>}, {pipeline_mode = #tpu.pipeline_mode<synchronous>, transform_indices = @transform_6, window_bounds = array<i64: 64, 128>}, {transform_indices = @transform_7, window_bounds = array<i64: 1, 8, 128>}, {transform_indices = @transform_8, window_bounds = array<i64: 1, 8, 128>}]} {
    %c0_i32 = arith.constant 0 : i32
    %0 = arith.cmpi eq, %arg0, %c0_i32 : i32
    %c0_i32_0 = arith.constant 0 : i32
    %1 = arith.cmpi sgt, %arg0, %c0_i32_0 : i32
    %c1_i32 = arith.constant 1 : i32
    %2 = arith.cmpi eq, %arg0, %c1_i32 : i32
    %c1_i32_1 = arith.constant 1 : i32
    %3 = arith.cmpi slt, %arg0, %c1_i32_1 : i32
    %c0 = arith.constant 0 : index
    %c0_2 = arith.constant 0 : index
    %c0_3 = arith.constant 0 : index
    %4 = vector.load %arg4[%c0, %c0_2, %c0_3] : memref<1x128x512xbf16, #tpu.memory_space<vmem>>, vector<1x128x512xbf16>
    %5 = vector.shape_cast %4 : vector<1x128x512xbf16> to vector<128x512xbf16>
    %c0_4 = arith.constant 0 : index
    %c0_5 = arith.constant 0 : index
    %c0_6 = arith.constant 0 : index
    %6 = vector.load %arg5[%c0_4, %c0_5, %c0_6] : memref<1x128x512xf32, #tpu.memory_space<vmem>>, vector<1x128x512xf32>
    %7 = vector.shape_cast %6 : vector<1x128x512xf32> to vector<128x512xf32>
    %c0_7 = arith.constant 0 : index
    %c0_8 = arith.constant 0 : index
    %c0_9 = arith.constant 0 : index
    %8 = vector.load %arg6[%c0_7, %c0_8, %c0_9] : memref<1x1x512xf32, #tpu.memory_space<vmem>>, vector<1x1x512xf32>
    %9 = vector.shape_cast %8 : vector<1x1x512xf32> to vector<1x512xf32>
    %c0_10 = arith.constant 0 : index
    %c0_11 = arith.constant 0 : index
    %c0_12 = arith.constant 0 : index
    %10 = vector.load %arg2[%c0_10, %c0_11, %c0_12] : memref<1x8x128xf32, #tpu.memory_space<vmem>>, vector<1x8x128xf32>
    %11 = vector.shape_cast %10 : vector<1x8x128xf32> to vector<8x128xf32>
    %c0_13 = arith.constant 0 : index
    %c0_14 = arith.constant 0 : index
    %c0_15 = arith.constant 0 : index
    %12 = vector.load %arg3[%c0_13, %c0_14, %c0_15] : memref<1x8x128xf32, #tpu.memory_space<vmem>>, vector<1x8x128xf32>
    %13 = vector.shape_cast %12 : vector<1x8x128xf32> to vector<8x128xf32>
    %c0_i32_16 = arith.constant 0 : i32
    %c64_i32 = arith.constant 64 : i32
    %14 = arith.muli %c0_i32_16, %c64_i32 : i32
    %15 = tpu.assume_multiple %14, 64 : i32
    %16 = arith.extui %0 : i1 to i32
    %c0_i32_17 = arith.constant 0 : i32
    %17 = arith.cmpi ne, %16, %c0_i32_17 : i32
    scf.if %17 {
      %250 = arith.index_cast %15 : i32 to index
      %c0_75 = arith.constant 0 : index
      %251 = vector.load %arg1[%250, %c0_75] : memref<64x128xf32, #tpu.memory_space<vmem>>, vector<64x128xf32>
      %252 = arith.truncf %251 : vector<64x128xf32> to vector<64x128xbf16>
      %cst_76 = arith.constant dense<0.000000e+00> : vector<64x512xf32>
      %253 = tpu.matmul %252, %5, %cst_76 {dimension_numbers = #tpu.dot_dimension_numbers<[1], [0], [0], [1], [0, 0, 1, 1], [], []>} : vector<64x128xbf16>, vector<128x512xbf16>, vector<64x512xf32> -> vector<64x512xf32>
      %254 = vector.broadcast %9 : vector<1x512xf32> to vector<64x512xf32>
      %255 = arith.addf %253, %254 : vector<64x512xf32>
      %c0_77 = arith.constant 0 : index
      %c0_78 = arith.constant 0 : index
      %256 = vector.load %arg10[%c0_77, %c0_78] : memref<64x512xf32, #tpu.memory_space<vmem>>, vector<64x512xf32>
      tpu.vector_store %arg10[%c0_77, %c0_78], %255 {strides = array<i32>} : memref<64x512xf32, #tpu.memory_space<vmem>>, vector<64x512xf32>,
    } else {
    }
    %18 = arith.extui %1 : i1 to i32
    %c0_i32_18 = arith.constant 0 : i32
    %19 = arith.cmpi ne, %18, %c0_i32_18 : i32
    scf.if %19 {
      %250 = arith.index_cast %15 : i32 to index
      %c0_75 = arith.constant 0 : index
      %251 = vector.load %arg11[%250, %c0_75] : memref<64x128xf32, #tpu.memory_space<vmem>>, vector<64x128xf32>
      %252 = arith.truncf %251 : vector<64x128xf32> to vector<64x128xbf16>
      %cst_76 = arith.constant dense<0.000000e+00> : vector<64x512xf32>
      %253 = tpu.matmul %252, %5, %cst_76 {dimension_numbers = #tpu.dot_dimension_numbers<[1], [0], [0], [1], [0, 0, 1, 1], [], []>} : vector<64x128xbf16>, vector<128x512xbf16>, vector<64x512xf32> -> vector<64x512xf32>
      %254 = vector.broadcast %9 : vector<1x512xf32> to vector<64x512xf32>
      %255 = arith.addf %253, %254 : vector<64x512xf32>
      %c0_77 = arith.constant 0 : index
      %c0_78 = arith.constant 0 : index
      %256 = vector.load %arg10[%c0_77, %c0_78] : memref<64x512xf32, #tpu.memory_space<vmem>>, vector<64x512xf32>
      tpu.vector_store %arg10[%c0_77, %c0_78], %255 {strides = array<i32>} : memref<64x512xf32, #tpu.memory_space<vmem>>, vector<64x512xf32>,
    } else {
    }
    %c0_i32_19 = arith.constant 0 : i32
    %c8_i32 = arith.constant 8 : i32
    %20 = arith.muli %c0_i32_19, %c8_i32 : i32
    %21 = tpu.assume_multiple %20, 8 : i32
    %22 = arith.index_cast %21 : i32 to index
    %c0_20 = arith.constant 0 : index
    %23 = vector.load %arg10[%22, %c0_20] : memref<64x512xf32, #tpu.memory_space<vmem>>, vector<8x512xf32>
    %cst = arith.constant dense<0.000000e+00> : vector<8x512xf32>
    %24 = tpu.matmul %11, %7, %cst {dimension_numbers = #tpu.dot_dimension_numbers<[1], [0], [0], [1], [0, 0, 1, 1], [], []>} : vector<8x128xf32>, vector<128x512xf32>, vector<8x512xf32> -> vector<8x512xf32>
    %25 = arith.addf %23, %24 : vector<8x512xf32>
    %26 = vector.extract_strided_slice %25 {offsets = [0, 0], sizes = [8, 384], strides = [1, 1]} : vector<8x512xf32> to vector<8x384xf32>
    %27 = arith.negf %26 : vector<8x384xf32>
    %28 = math.exp %27 : vector<8x384xf32>
    %cst_21 = arith.constant 1.000000e+00 : f32
    %29 = vector.broadcast %cst_21 : f32 to vector<8x384xf32>
    %30 = arith.addf %29, %28 : vector<8x384xf32>
    %31 = arith.divf %29, %30 : vector<8x384xf32>
    %32 = vector.extract_strided_slice %25 {offsets = [0, 384], sizes = [8, 128], strides = [1, 1]} : vector<8x512xf32> to vector<8x128xf32>
    %33 = math.tanh %32 : vector<8x128xf32>
    %34 = vector.extract_strided_slice %31 {offsets = [0, 0], sizes = [8, 128], strides = [1, 1]} : vector<8x384xf32> to vector<8x128xf32>
    %35 = vector.extract_strided_slice %31 {offsets = [0, 128], sizes = [8, 128], strides = [1, 1]} : vector<8x384xf32> to vector<8x128xf32>
    %36 = vector.extract_strided_slice %31 {offsets = [0, 256], sizes = [8, 128], strides = [1, 1]} : vector<8x384xf32> to vector<8x128xf32>
    %37 = arith.mulf %35, %13 : vector<8x128xf32>
    %38 = arith.mulf %34, %33 : vector<8x128xf32>
    %39 = arith.addf %37, %38 : vector<8x128xf32>
    %40 = math.tanh %39 : vector<8x128xf32>
    %41 = arith.mulf %36, %40 : vector<8x128xf32>
    %42 = arith.addi %15, %21 : i32
    %43 = tpu.assume_multiple %42, 8 : i32
    %44 = arith.extui %2 : i1 to i32
    %c0_i32_22 = arith.constant 0 : i32
    %45 = arith.cmpi ne, %44, %c0_i32_22 : i32
    scf.if %45 {
      %250 = arith.index_cast %43 : i32 to index
      %c0_75 = arith.constant 0 : index
      %251 = vector.load %arg7[%250, %c0_75] : memref<64x128xf32, #tpu.memory_space<vmem>>, vector<8x128xf32>
      tpu.vector_store %arg7[%250, %c0_75], %41 {strides = array<i32>} : memref<64x128xf32, #tpu.memory_space<vmem>>, vector<8x128xf32>,
    } else {
    }
    %46 = arith.extui %3 : i1 to i32
    %c0_i32_23 = arith.constant 0 : i32
    %47 = arith.cmpi ne, %46, %c0_i32_23 : i32
    scf.if %47 {
      %250 = arith.index_cast %43 : i32 to index
      %c0_75 = arith.constant 0 : index
      %251 = vector.load %arg11[%250, %c0_75] : memref<64x128xf32, #tpu.memory_space<vmem>>, vector<8x128xf32>
      tpu.vector_store %arg11[%250, %c0_75], %41 {strides = array<i32>} : memref<64x128xf32, #tpu.memory_space<vmem>>, vector<8x128xf32>,
    } else {
    }
    %c1_i32_24 = arith.constant 1 : i32
    %c8_i32_25 = arith.constant 8 : i32
    %48 = arith.muli %c1_i32_24, %c8_i32_25 : i32
    %49 = tpu.assume_multiple %48, 8 : i32
    %50 = arith.index_cast %49 : i32 to index
    %c0_26 = arith.constant 0 : index
    %51 = vector.load %arg10[%50, %c0_26] : memref<64x512xf32, #tpu.memory_space<vmem>>, vector<8x512xf32>
    %cst_27 = arith.constant dense<0.000000e+00> : vector<8x512xf32>
    %52 = tpu.matmul %41, %7, %cst_27 {dimension_numbers = #tpu.dot_dimension_numbers<[1], [0], [0], [1], [0, 0, 1, 1], [], []>} : vector<8x128xf32>, vector<128x512xf32>, vector<8x512xf32> -> vector<8x512xf32>
    %53 = arith.addf %51, %52 : vector<8x512xf32>
    %54 = vector.extract_strided_slice %53 {offsets = [0, 0], sizes = [8, 384], strides = [1, 1]} : vector<8x512xf32> to vector<8x384xf32>
    %55 = arith.negf %54 : vector<8x384xf32>
    %56 = math.exp %55 : vector<8x384xf32>
    %cst_28 = arith.constant 1.000000e+00 : f32
    %57 = vector.broadcast %cst_28 : f32 to vector<8x384xf32>
    %58 = arith.addf %57, %56 : vector<8x384xf32>
    %59 = arith.divf %57, %58 : vector<8x384xf32>
    %60 = vector.extract_strided_slice %53 {offsets = [0, 384], sizes = [8, 128], strides = [1, 1]} : vector<8x512xf32> to vector<8x128xf32>
    %61 = math.tanh %60 : vector<8x128xf32>
    %62 = vector.extract_strided_slice %59 {offsets = [0, 0], sizes = [8, 128], strides = [1, 1]} : vector<8x384xf32> to vector<8x128xf32>
    %63 = vector.extract_strided_slice %59 {offsets = [0, 128], sizes = [8, 128], strides = [1, 1]} : vector<8x384xf32> to vector<8x128xf32>
    %64 = vector.extract_strided_slice %59 {offsets = [0, 256], sizes = [8, 128], strides = [1, 1]} : vector<8x384xf32> to vector<8x128xf32>
    %65 = arith.mulf %63, %39 : vector<8x128xf32>
    %66 = arith.mulf %62, %61 : vector<8x128xf32>
    %67 = arith.addf %65, %66 : vector<8x128xf32>
    %68 = math.tanh %67 : vector<8x128xf32>
    %69 = arith.mulf %64, %68 : vector<8x128xf32>
    %70 = arith.addi %15, %49 : i32
    %71 = tpu.assume_multiple %70, 8 : i32
    %72 = arith.extui %2 : i1 to i32
    %c0_i32_29 = arith.constant 0 : i32
    %73 = arith.cmpi ne, %72, %c0_i32_29 : i32
    scf.if %73 {
      %250 = arith.index_cast %71 : i32 to index
      %c0_75 = arith.constant 0 : index
      %251 = vector.load %arg7[%250, %c0_75] : memref<64x128xf32, #tpu.memory_space<vmem>>, vector<8x128xf32>
      tpu.vector_store %arg7[%250, %c0_75], %69 {strides = array<i32>} : memref<64x128xf32, #tpu.memory_space<vmem>>, vector<8x128xf32>,
    } else {
    }
    %74 = arith.extui %3 : i1 to i32
    %c0_i32_30 = arith.constant 0 : i32
    %75 = arith.cmpi ne, %74, %c0_i32_30 : i32
    scf.if %75 {
      %250 = arith.index_cast %71 : i32 to index
      %c0_75 = arith.constant 0 : index
      %251 = vector.load %arg11[%250, %c0_75] : memref<64x128xf32, #tpu.memory_space<vmem>>, vector<8x128xf32>
      tpu.vector_store %arg11[%250, %c0_75], %69 {strides = array<i32>} : memref<64x128xf32, #tpu.memory_space<vmem>>, vector<8x128xf32>,
    } else {
    }
    %c2_i32 = arith.constant 2 : i32
    %c8_i32_31 = arith.constant 8 : i32
    %76 = arith.muli %c2_i32, %c8_i32_31 : i32
    %77 = tpu.assume_multiple %76, 8 : i32
    %78 = arith.index_cast %77 : i32 to index
    %c0_32 = arith.constant 0 : index
    %79 = vector.load %arg10[%78, %c0_32] : memref<64x512xf32, #tpu.memory_space<vmem>>, vector<8x512xf32>
    %cst_33 = arith.constant dense<0.000000e+00> : vector<8x512xf32>
    %80 = tpu.matmul %69, %7, %cst_33 {dimension_numbers = #tpu.dot_dimension_numbers<[1], [0], [0], [1], [0, 0, 1, 1], [], []>} : vector<8x128xf32>, vector<128x512xf32>, vector<8x512xf32> -> vector<8x512xf32>
    %81 = arith.addf %79, %80 : vector<8x512xf32>
    %82 = vector.extract_strided_slice %81 {offsets = [0, 0], sizes = [8, 384], strides = [1, 1]} : vector<8x512xf32> to vector<8x384xf32>
    %83 = arith.negf %82 : vector<8x384xf32>
    %84 = math.exp %83 : vector<8x384xf32>
    %cst_34 = arith.constant 1.000000e+00 : f32
    %85 = vector.broadcast %cst_34 : f32 to vector<8x384xf32>
    %86 = arith.addf %85, %84 : vector<8x384xf32>
    %87 = arith.divf %85, %86 : vector<8x384xf32>
    %88 = vector.extract_strided_slice %81 {offsets = [0, 384], sizes = [8, 128], strides = [1, 1]} : vector<8x512xf32> to vector<8x128xf32>
    %89 = math.tanh %88 : vector<8x128xf32>
    %90 = vector.extract_strided_slice %87 {offsets = [0, 0], sizes = [8, 128], strides = [1, 1]} : vector<8x384xf32> to vector<8x128xf32>
    %91 = vector.extract_strided_slice %87 {offsets = [0, 128], sizes = [8, 128], strides = [1, 1]} : vector<8x384xf32> to vector<8x128xf32>
    %92 = vector.extract_strided_slice %87 {offsets = [0, 256], sizes = [8, 128], strides = [1, 1]} : vector<8x384xf32> to vector<8x128xf32>
    %93 = arith.mulf %91, %67 : vector<8x128xf32>
    %94 = arith.mulf %90, %89 : vector<8x128xf32>
    %95 = arith.addf %93, %94 : vector<8x128xf32>
    %96 = math.tanh %95 : vector<8x128xf32>
    %97 = arith.mulf %92, %96 : vector<8x128xf32>
    %98 = arith.addi %15, %77 : i32
    %99 = tpu.assume_multiple %98, 8 : i32
    %100 = arith.extui %2 : i1 to i32
    %c0_i32_35 = arith.constant 0 : i32
    %101 = arith.cmpi ne, %100, %c0_i32_35 : i32
    scf.if %101 {
      %250 = arith.index_cast %99 : i32 to index
      %c0_75 = arith.constant 0 : index
      %251 = vector.load %arg7[%250, %c0_75] : memref<64x128xf32, #tpu.memory_space<vmem>>, vector<8x128xf32>
      tpu.vector_store %arg7[%250, %c0_75], %97 {strides = array<i32>} : memref<64x128xf32, #tpu.memory_space<vmem>>, vector<8x128xf32>,
    } else {
    }
    %102 = arith.extui %3 : i1 to i32
    %c0_i32_36 = arith.constant 0 : i32
    %103 = arith.cmpi ne, %102, %c0_i32_36 : i32
    scf.if %103 {
      %250 = arith.index_cast %99 : i32 to index
      %c0_75 = arith.constant 0 : index
      %251 = vector.load %arg11[%250, %c0_75] : memref<64x128xf32, #tpu.memory_space<vmem>>, vector<8x128xf32>
      tpu.vector_store %arg11[%250, %c0_75], %97 {strides = array<i32>} : memref<64x128xf32, #tpu.memory_space<vmem>>, vector<8x128xf32>,
    } else {
    }
    %c3_i32 = arith.constant 3 : i32
    %c8_i32_37 = arith.constant 8 : i32
    %104 = arith.muli %c3_i32, %c8_i32_37 : i32
    %105 = tpu.assume_multiple %104, 8 : i32
    %106 = arith.index_cast %105 : i32 to index
    %c0_38 = arith.constant 0 : index
    %107 = vector.load %arg10[%106, %c0_38] : memref<64x512xf32, #tpu.memory_space<vmem>>, vector<8x512xf32>
    %cst_39 = arith.constant dense<0.000000e+00> : vector<8x512xf32>
    %108 = tpu.matmul %97, %7, %cst_39 {dimension_numbers = #tpu.dot_dimension_numbers<[1], [0], [0], [1], [0, 0, 1, 1], [], []>} : vector<8x128xf32>, vector<128x512xf32>, vector<8x512xf32> -> vector<8x512xf32>
    %109 = arith.addf %107, %108 : vector<8x512xf32>
    %110 = vector.extract_strided_slice %109 {offsets = [0, 0], sizes = [8, 384], strides = [1, 1]} : vector<8x512xf32> to vector<8x384xf32>
    %111 = arith.negf %110 : vector<8x384xf32>
    %112 = math.exp %111 : vector<8x384xf32>
    %cst_40 = arith.constant 1.000000e+00 : f32
    %113 = vector.broadcast %cst_40 : f32 to vector<8x384xf32>
    %114 = arith.addf %113, %112 : vector<8x384xf32>
    %115 = arith.divf %113, %114 : vector<8x384xf32>
    %116 = vector.extract_strided_slice %109 {offsets = [0, 384], sizes = [8, 128], strides = [1, 1]} : vector<8x512xf32> to vector<8x128xf32>
    %117 = math.tanh %116 : vector<8x128xf32>
    %118 = vector.extract_strided_slice %115 {offsets = [0, 0], sizes = [8, 128], strides = [1, 1]} : vector<8x384xf32> to vector<8x128xf32>
    %119 = vector.extract_strided_slice %115 {offsets = [0, 128], sizes = [8, 128], strides = [1, 1]} : vector<8x384xf32> to vector<8x128xf32>
    %120 = vector.extract_strided_slice %115 {offsets = [0, 256], sizes = [8, 128], strides = [1, 1]} : vector<8x384xf32> to vector<8x128xf32>
    %121 = arith.mulf %119, %95 : vector<8x128xf32>
    %122 = arith.mulf %118, %117 : vector<8x128xf32>
    %123 = arith.addf %121, %122 : vector<8x128xf32>
    %124 = math.tanh %123 : vector<8x128xf32>
    %125 = arith.mulf %120, %124 : vector<8x128xf32>
    %126 = arith.addi %15, %105 : i32
    %127 = tpu.assume_multiple %126, 8 : i32
    %128 = arith.extui %2 : i1 to i32
    %c0_i32_41 = arith.constant 0 : i32
    %129 = arith.cmpi ne, %128, %c0_i32_41 : i32
    scf.if %129 {
      %250 = arith.index_cast %127 : i32 to index
      %c0_75 = arith.constant 0 : index
      %251 = vector.load %arg7[%250, %c0_75] : memref<64x128xf32, #tpu.memory_space<vmem>>, vector<8x128xf32>
      tpu.vector_store %arg7[%250, %c0_75], %125 {strides = array<i32>} : memref<64x128xf32, #tpu.memory_space<vmem>>, vector<8x128xf32>,
    } else {
    }
    %130 = arith.extui %3 : i1 to i32
    %c0_i32_42 = arith.constant 0 : i32
    %131 = arith.cmpi ne, %130, %c0_i32_42 : i32
    scf.if %131 {
      %250 = arith.index_cast %127 : i32 to index
      %c0_75 = arith.constant 0 : index
      %251 = vector.load %arg11[%250, %c0_75] : memref<64x128xf32, #tpu.memory_space<vmem>>, vector<8x128xf32>
      tpu.vector_store %arg11[%250, %c0_75], %125 {strides = array<i32>} : memref<64x128xf32, #tpu.memory_space<vmem>>, vector<8x128xf32>,
    } else {
    }
    %c4_i32 = arith.constant 4 : i32
    %c8_i32_43 = arith.constant 8 : i32
    %132 = arith.muli %c4_i32, %c8_i32_43 : i32
    %133 = tpu.assume_multiple %132, 8 : i32
    %134 = arith.index_cast %133 : i32 to index
    %c0_44 = arith.constant 0 : index
    %135 = vector.load %arg10[%134, %c0_44] : memref<64x512xf32, #tpu.memory_space<vmem>>, vector<8x512xf32>
    %cst_45 = arith.constant dense<0.000000e+00> : vector<8x512xf32>
    %136 = tpu.matmul %125, %7, %cst_45 {dimension_numbers = #tpu.dot_dimension_numbers<[1], [0], [0], [1], [0, 0, 1, 1], [], []>} : vector<8x128xf32>, vector<128x512xf32>, vector<8x512xf32> -> vector<8x512xf32>
    %137 = arith.addf %135, %136 : vector<8x512xf32>
    %138 = vector.extract_strided_slice %137 {offsets = [0, 0], sizes = [8, 384], strides = [1, 1]} : vector<8x512xf32> to vector<8x384xf32>
    %139 = arith.negf %138 : vector<8x384xf32>
    %140 = math.exp %139 : vector<8x384xf32>
    %cst_46 = arith.constant 1.000000e+00 : f32
    %141 = vector.broadcast %cst_46 : f32 to vector<8x384xf32>
    %142 = arith.addf %141, %140 : vector<8x384xf32>
    %143 = arith.divf %141, %142 : vector<8x384xf32>
    %144 = vector.extract_strided_slice %137 {offsets = [0, 384], sizes = [8, 128], strides = [1, 1]} : vector<8x512xf32> to vector<8x128xf32>
    %145 = math.tanh %144 : vector<8x128xf32>
    %146 = vector.extract_strided_slice %143 {offsets = [0, 0], sizes = [8, 128], strides = [1, 1]} : vector<8x384xf32> to vector<8x128xf32>
    %147 = vector.extract_strided_slice %143 {offsets = [0, 128], sizes = [8, 128], strides = [1, 1]} : vector<8x384xf32> to vector<8x128xf32>
    %148 = vector.extract_strided_slice %143 {offsets = [0, 256], sizes = [8, 128], strides = [1, 1]} : vector<8x384xf32> to vector<8x128xf32>
    %149 = arith.mulf %147, %123 : vector<8x128xf32>
    %150 = arith.mulf %146, %145 : vector<8x128xf32>
    %151 = arith.addf %149, %150 : vector<8x128xf32>
    %152 = math.tanh %151 : vector<8x128xf32>
    %153 = arith.mulf %148, %152 : vector<8x128xf32>
    %154 = arith.addi %15, %133 : i32
    %155 = tpu.assume_multiple %154, 8 : i32
    %156 = arith.extui %2 : i1 to i32
    %c0_i32_47 = arith.constant 0 : i32
    %157 = arith.cmpi ne, %156, %c0_i32_47 : i32
    scf.if %157 {
      %250 = arith.index_cast %155 : i32 to index
      %c0_75 = arith.constant 0 : index
      %251 = vector.load %arg7[%250, %c0_75] : memref<64x128xf32, #tpu.memory_space<vmem>>, vector<8x128xf32>
      tpu.vector_store %arg7[%250, %c0_75], %153 {strides = array<i32>} : memref<64x128xf32, #tpu.memory_space<vmem>>, vector<8x128xf32>,
    } else {
    }
    %158 = arith.extui %3 : i1 to i32
    %c0_i32_48 = arith.constant 0 : i32
    %159 = arith.cmpi ne, %158, %c0_i32_48 : i32
    scf.if %159 {
      %250 = arith.index_cast %155 : i32 to index
      %c0_75 = arith.constant 0 : index
      %251 = vector.load %arg11[%250, %c0_75] : memref<64x128xf32, #tpu.memory_space<vmem>>, vector<8x128xf32>
      tpu.vector_store %arg11[%250, %c0_75], %153 {strides = array<i32>} : memref<64x128xf32, #tpu.memory_space<vmem>>, vector<8x128xf32>,
    } else {
    }
    %c5_i32 = arith.constant 5 : i32
    %c8_i32_49 = arith.constant 8 : i32
    %160 = arith.muli %c5_i32, %c8_i32_49 : i32
    %161 = tpu.assume_multiple %160, 8 : i32
    %162 = arith.index_cast %161 : i32 to index
    %c0_50 = arith.constant 0 : index
    %163 = vector.load %arg10[%162, %c0_50] : memref<64x512xf32, #tpu.memory_space<vmem>>, vector<8x512xf32>
    %cst_51 = arith.constant dense<0.000000e+00> : vector<8x512xf32>
    %164 = tpu.matmul %153, %7, %cst_51 {dimension_numbers = #tpu.dot_dimension_numbers<[1], [0], [0], [1], [0, 0, 1, 1], [], []>} : vector<8x128xf32>, vector<128x512xf32>, vector<8x512xf32> -> vector<8x512xf32>
    %165 = arith.addf %163, %164 : vector<8x512xf32>
    %166 = vector.extract_strided_slice %165 {offsets = [0, 0], sizes = [8, 384], strides = [1, 1]} : vector<8x512xf32> to vector<8x384xf32>
    %167 = arith.negf %166 : vector<8x384xf32>
    %168 = math.exp %167 : vector<8x384xf32>
    %cst_52 = arith.constant 1.000000e+00 : f32
    %169 = vector.broadcast %cst_52 : f32 to vector<8x384xf32>
    %170 = arith.addf %169, %168 : vector<8x384xf32>
    %171 = arith.divf %169, %170 : vector<8x384xf32>
    %172 = vector.extract_strided_slice %165 {offsets = [0, 384], sizes = [8, 128], strides = [1, 1]} : vector<8x512xf32> to vector<8x128xf32>
    %173 = math.tanh %172 : vector<8x128xf32>
    %174 = vector.extract_strided_slice %171 {offsets = [0, 0], sizes = [8, 128], strides = [1, 1]} : vector<8x384xf32> to vector<8x128xf32>
    %175 = vector.extract_strided_slice %171 {offsets = [0, 128], sizes = [8, 128], strides = [1, 1]} : vector<8x384xf32> to vector<8x128xf32>
    %176 = vector.extract_strided_slice %171 {offsets = [0, 256], sizes = [8, 128], strides = [1, 1]} : vector<8x384xf32> to vector<8x128xf32>
    %177 = arith.mulf %175, %151 : vector<8x128xf32>
    %178 = arith.mulf %174, %173 : vector<8x128xf32>
    %179 = arith.addf %177, %178 : vector<8x128xf32>
    %180 = math.tanh %179 : vector<8x128xf32>
    %181 = arith.mulf %176, %180 : vector<8x128xf32>
    %182 = arith.addi %15, %161 : i32
    %183 = tpu.assume_multiple %182, 8 : i32
    %184 = arith.extui %2 : i1 to i32
    %c0_i32_53 = arith.constant 0 : i32
    %185 = arith.cmpi ne, %184, %c0_i32_53 : i32
    scf.if %185 {
      %250 = arith.index_cast %183 : i32 to index
      %c0_75 = arith.constant 0 : index
      %251 = vector.load %arg7[%250, %c0_75] : memref<64x128xf32, #tpu.memory_space<vmem>>, vector<8x128xf32>
      tpu.vector_store %arg7[%250, %c0_75], %181 {strides = array<i32>} : memref<64x128xf32, #tpu.memory_space<vmem>>, vector<8x128xf32>,
    } else {
    }
    %186 = arith.extui %3 : i1 to i32
    %c0_i32_54 = arith.constant 0 : i32
    %187 = arith.cmpi ne, %186, %c0_i32_54 : i32
    scf.if %187 {
      %250 = arith.index_cast %183 : i32 to index
      %c0_75 = arith.constant 0 : index
      %251 = vector.load %arg11[%250, %c0_75] : memref<64x128xf32, #tpu.memory_space<vmem>>, vector<8x128xf32>
      tpu.vector_store %arg11[%250, %c0_75], %181 {strides = array<i32>} : memref<64x128xf32, #tpu.memory_space<vmem>>, vector<8x128xf32>,
    } else {
    }
    %c6_i32 = arith.constant 6 : i32
    %c8_i32_55 = arith.constant 8 : i32
    %188 = arith.muli %c6_i32, %c8_i32_55 : i32
    %189 = tpu.assume_multiple %188, 8 : i32
    %190 = arith.index_cast %189 : i32 to index
    %c0_56 = arith.constant 0 : index
    %191 = vector.load %arg10[%190, %c0_56] : memref<64x512xf32, #tpu.memory_space<vmem>>, vector<8x512xf32>
    %cst_57 = arith.constant dense<0.000000e+00> : vector<8x512xf32>
    %192 = tpu.matmul %181, %7, %cst_57 {dimension_numbers = #tpu.dot_dimension_numbers<[1], [0], [0], [1], [0, 0, 1, 1], [], []>} : vector<8x128xf32>, vector<128x512xf32>, vector<8x512xf32> -> vector<8x512xf32>
    %193 = arith.addf %191, %192 : vector<8x512xf32>
    %194 = vector.extract_strided_slice %193 {offsets = [0, 0], sizes = [8, 384], strides = [1, 1]} : vector<8x512xf32> to vector<8x384xf32>
    %195 = arith.negf %194 : vector<8x384xf32>
    %196 = math.exp %195 : vector<8x384xf32>
    %cst_58 = arith.constant 1.000000e+00 : f32
    %197 = vector.broadcast %cst_58 : f32 to vector<8x384xf32>
    %198 = arith.addf %197, %196 : vector<8x384xf32>
    %199 = arith.divf %197, %198 : vector<8x384xf32>
    %200 = vector.extract_strided_slice %193 {offsets = [0, 384], sizes = [8, 128], strides = [1, 1]} : vector<8x512xf32> to vector<8x128xf32>
    %201 = math.tanh %200 : vector<8x128xf32>
    %202 = vector.extract_strided_slice %199 {offsets = [0, 0], sizes = [8, 128], strides = [1, 1]} : vector<8x384xf32> to vector<8x128xf32>
    %203 = vector.extract_strided_slice %199 {offsets = [0, 128], sizes = [8, 128], strides = [1, 1]} : vector<8x384xf32> to vector<8x128xf32>
    %204 = vector.extract_strided_slice %199 {offsets = [0, 256], sizes = [8, 128], strides = [1, 1]} : vector<8x384xf32> to vector<8x128xf32>
    %205 = arith.mulf %203, %179 : vector<8x128xf32>
    %206 = arith.mulf %202, %201 : vector<8x128xf32>
    %207 = arith.addf %205, %206 : vector<8x128xf32>
    %208 = math.tanh %207 : vector<8x128xf32>
    %209 = arith.mulf %204, %208 : vector<8x128xf32>
    %210 = arith.addi %15, %189 : i32
    %211 = tpu.assume_multiple %210, 8 : i32
    %212 = arith.extui %2 : i1 to i32
    %c0_i32_59 = arith.constant 0 : i32
    %213 = arith.cmpi ne, %212, %c0_i32_59 : i32
    scf.if %213 {
      %250 = arith.index_cast %211 : i32 to index
      %c0_75 = arith.constant 0 : index
      %251 = vector.load %arg7[%250, %c0_75] : memref<64x128xf32, #tpu.memory_space<vmem>>, vector<8x128xf32>
      tpu.vector_store %arg7[%250, %c0_75], %209 {strides = array<i32>} : memref<64x128xf32, #tpu.memory_space<vmem>>, vector<8x128xf32>,
    } else {
    }
    %214 = arith.extui %3 : i1 to i32
    %c0_i32_60 = arith.constant 0 : i32
    %215 = arith.cmpi ne, %214, %c0_i32_60 : i32
    scf.if %215 {
      %250 = arith.index_cast %211 : i32 to index
      %c0_75 = arith.constant 0 : index
      %251 = vector.load %arg11[%250, %c0_75] : memref<64x128xf32, #tpu.memory_space<vmem>>, vector<8x128xf32>
      tpu.vector_store %arg11[%250, %c0_75], %209 {strides = array<i32>} : memref<64x128xf32, #tpu.memory_space<vmem>>, vector<8x128xf32>,
    } else {
    }
    %c7_i32 = arith.constant 7 : i32
    %c8_i32_61 = arith.constant 8 : i32
    %216 = arith.muli %c7_i32, %c8_i32_61 : i32
    %217 = tpu.assume_multiple %216, 8 : i32
    %218 = arith.index_cast %217 : i32 to index
    %c0_62 = arith.constant 0 : index
    %219 = vector.load %arg10[%218, %c0_62] : memref<64x512xf32, #tpu.memory_space<vmem>>, vector<8x512xf32>
    %cst_63 = arith.constant dense<0.000000e+00> : vector<8x512xf32>
    %220 = tpu.matmul %209, %7, %cst_63 {dimension_numbers = #tpu.dot_dimension_numbers<[1], [0], [0], [1], [0, 0, 1, 1], [], []>} : vector<8x128xf32>, vector<128x512xf32>, vector<8x512xf32> -> vector<8x512xf32>
    %221 = arith.addf %219, %220 : vector<8x512xf32>
    %222 = vector.extract_strided_slice %221 {offsets = [0, 0], sizes = [8, 384], strides = [1, 1]} : vector<8x512xf32> to vector<8x384xf32>
    %223 = arith.negf %222 : vector<8x384xf32>
    %224 = math.exp %223 : vector<8x384xf32>
    %cst_64 = arith.constant 1.000000e+00 : f32
    %225 = vector.broadcast %cst_64 : f32 to vector<8x384xf32>
    %226 = arith.addf %225, %224 : vector<8x384xf32>
    %227 = arith.divf %225, %226 : vector<8x384xf32>
    %228 = vector.extract_strided_slice %221 {offsets = [0, 384], sizes = [8, 128], strides = [1, 1]} : vector<8x512xf32> to vector<8x128xf32>
    %229 = math.tanh %228 : vector<8x128xf32>
    %230 = vector.extract_strided_slice %227 {offsets = [0, 0], sizes = [8, 128], strides = [1, 1]} : vector<8x384xf32> to vector<8x128xf32>
    %231 = vector.extract_strided_slice %227 {offsets = [0, 128], sizes = [8, 128], strides = [1, 1]} : vector<8x384xf32> to vector<8x128xf32>
    %232 = vector.extract_strided_slice %227 {offsets = [0, 256], sizes = [8, 128], strides = [1, 1]} : vector<8x384xf32> to vector<8x128xf32>
    %233 = arith.mulf %231, %207 : vector<8x128xf32>
    %234 = arith.mulf %230, %229 : vector<8x128xf32>
    %235 = arith.addf %233, %234 : vector<8x128xf32>
    %236 = math.tanh %235 : vector<8x128xf32>
    %237 = arith.mulf %232, %236 : vector<8x128xf32>
    %238 = arith.addi %15, %217 : i32
    %239 = tpu.assume_multiple %238, 8 : i32
    %240 = arith.extui %2 : i1 to i32
    %c0_i32_65 = arith.constant 0 : i32
    %241 = arith.cmpi ne, %240, %c0_i32_65 : i32
    scf.if %241 {
      %250 = arith.index_cast %239 : i32 to index
      %c0_75 = arith.constant 0 : index
      %251 = vector.load %arg7[%250, %c0_75] : memref<64x128xf32, #tpu.memory_space<vmem>>, vector<8x128xf32>
      tpu.vector_store %arg7[%250, %c0_75], %237 {strides = array<i32>} : memref<64x128xf32, #tpu.memory_space<vmem>>, vector<8x128xf32>,
    } else {
    }
    %242 = arith.extui %3 : i1 to i32
    %c0_i32_66 = arith.constant 0 : i32
    %243 = arith.cmpi ne, %242, %c0_i32_66 : i32
    scf.if %243 {
      %250 = arith.index_cast %239 : i32 to index
      %c0_75 = arith.constant 0 : index
      %251 = vector.load %arg11[%250, %c0_75] : memref<64x128xf32, #tpu.memory_space<vmem>>, vector<8x128xf32>
      tpu.vector_store %arg11[%250, %c0_75], %237 {strides = array<i32>} : memref<64x128xf32, #tpu.memory_space<vmem>>, vector<8x128xf32>,
    } else {
    }
    %c8_i32_67 = arith.constant 8 : i32
    %c1_i32_68 = arith.constant 1 : i32
    %c0_69 = arith.constant 0 : index
    %c0_70 = arith.constant 0 : index
    %c0_71 = arith.constant 0 : index
    %244 = vector.load %arg8[%c0_69, %c0_70, %c0_71] : memref<1x8x128xf32, #tpu.memory_space<vmem>>, vector<1x8x128xf32>
    %245 = vector.shape_cast %244 : vector<1x8x128xf32> to vector<8x128xf32>
    %246 = vector.shape_cast %237 : vector<8x128xf32> to vector<1x8x128xf32>
    tpu.vector_store %arg8[%c0_69, %c0_70, %c0_71], %246 {strides = array<i32>} : memref<1x8x128xf32, #tpu.memory_space<vmem>>, vector<1x8x128xf32>,
    %c0_72 = arith.constant 0 : index
    %c0_73 = arith.constant 0 : index
    %c0_74 = arith.constant 0 : index
    %247 = vector.load %arg9[%c0_72, %c0_73, %c0_74] : memref<1x8x128xf32, #tpu.memory_space<vmem>>, vector<1x8x128xf32>
    %248 = vector.shape_cast %247 : vector<1x8x128xf32> to vector<8x128xf32>
    %249 = vector.shape_cast %235 : vector<8x128xf32> to vector<1x8x128xf32>
    tpu.vector_store %arg9[%c0_72, %c0_73, %c0_74], %249 {strides = array<i32>} : memref<1x8x128xf32, #tpu.memory_space<vmem>>, vector<1x8x128xf32>,
    return
  }
  func.func @transform_0(%arg0: i32) -> (i32, i32) {
    %c0_i32 = arith.constant 0 : i32
    %c0_i32_0 = arith.constant 0 : i32
    %c0_i32_1 = arith.constant 0 : i32
    return %c0_i32, %c0_i32_0 : i32, i32
  }
  func.func @transform_1(%arg0: i32) -> (i32, i32, i32) {
    %c0_i32 = arith.constant 0 : i32
    %c0_i32_0 = arith.constant 0 : i32
    %c0_i32_1 = arith.constant 0 : i32
    return %arg0, %c0_i32, %c0_i32_0 : i32, i32, i32
  }
  func.func @transform_2(%arg0: i32) -> (i32, i32, i32) {
    %c0_i32 = arith.constant 0 : i32
    %c0_i32_0 = arith.constant 0 : i32
    %c0_i32_1 = arith.constant 0 : i32
    return %arg0, %c0_i32, %c0_i32_0 : i32, i32, i32
  }
  func.func @transform_3(%arg0: i32) -> (i32, i32, i32) {
    %c0_i32 = arith.constant 0 : i32
    %c0_i32_0 = arith.constant 0 : i32
    %c0_i32_1 = arith.constant 0 : i32
    return %arg0, %c0_i32, %c0_i32_0 : i32, i32, i32
  }
  func.func @transform_4(%arg0: i32) -> (i32, i32, i32) {
    %c0_i32 = arith.constant 0 : i32
    %c0_i32_0 = arith.constant 0 : i32
    %c0_i32_1 = arith.constant 0 : i32
    return %arg0, %c0_i32, %c0_i32_0 : i32, i32, i32
  }
  func.func @transform_5(%arg0: i32) -> (i32, i32, i32) {
    %c0_i32 = arith.constant 0 : i32
    %c0_i32_0 = arith.constant 0 : i32
    %c0_i32_1 = arith.constant 0 : i32
    return %arg0, %c0_i32, %c0_i32_0 : i32, i32, i32
  }
  func.func @transform_6(%arg0: i32) -> (i32, i32) {
    %c0_i32 = arith.constant 0 : i32
    %c0_i32_0 = arith.constant 0 : i32
    %c0_i32_1 = arith.constant 0 : i32
    return %c0_i32, %c0_i32_0 : i32, i32
  }
  func.func @transform_7(%arg0: i32) -> (i32, i32, i32) {
    %c0_i32 = arith.constant 0 : i32
    %c0_i32_0 = arith.constant 0 : i32
    %c0_i32_1 = arith.constant 0 : i32
    return %arg0, %c0_i32, %c0_i32_0 : i32, i32, i32
  }
  func.func @transform_8(%arg0: i32) -> (i32, i32, i32) {
    %c0_i32 = arith.constant 0 : i32
    %c0_i32_0 = arith.constant 0 : i32
    %c0_i32_1 = arith.constant 0 : i32
    return %arg0, %c0_i32, %c0_i32_0 : i32, i32, i32
  }
}

</mosaic_0001>

<bundles_post_ra>
// kernel: backward_controller_forward.1
= control target key start
LH: loop header
LB: loop body
LE: loop exit
PB: predicated region body
PF: predicated region fallthrough
CT: control target
= control target key end

     0   :  { %s5413_s0 = inlined_call_operand.vmem [shape: f32[64,128], index: 0, kind: input, shape index: {}]   ;;  %s5414_s1 = inlined_call_operand.vmem [shape: f32[2,8,128], index: 1, kind: input, shape index: {}]   ;;  %s5415_s2 = inlined_call_operand.vmem [shape: f32[2,8,128], index: 2, kind: input, shape index: {}]   ;;  %s5416_s3 = inlined_call_operand.hbm [shape: bf16[2,128,512], index: 3, kind: input, shape index: {}]   ;;  %s5417_s4 = inlined_call_operand.hbm [shape: f32[2,128,512], index: 4, kind: input, shape index: {}]   ;;  %s5418_s5 = inlined_call_operand.vmem [shape: f32[2,1,512], index: 5, kind: input, shape index: {}]   ;;  %s5419_s6 = inlined_call_operand.hbm [shape: f32[64,128], index: 6, kind: output, shape index: {0}]   ;;  %s5420_s7 = inlined_call_operand.hbm [shape: f32[2,8,128], index: 7, kind: output, shape index: {1}]   ;;  %s5421_s8 = inlined_call_operand.hbm [shape: f32[2,8,128], index: 8, kind: output, shape index: {2}]  }
   0x1   :  { %5427 = sst [smem:[#allocation72_spill]] %s5416_s3 }
   0x2   :  { %14 = vsyncpa [#allocation5], 0 }
   0x3   :  { %16 = vsyncpa [#allocation5 + $0x1], 0 }
   0x4   :  { %17 = vsyncpa [#allocation8], 0 }
   0x5   :  { %19 = vsyncpa [#allocation8 + $0x1], 0 }
   0x6   :  { %20 = vsyncpa [#allocation6], 0 }
   0x7   :  { %21 = vsyncpa [#allocation11], 0 }
   0x8   :  { %23 = vsyncpa [#allocation11 + $0x1], 0  ;;  %s4110_s27 = smov 0   ;;  %s4112_s28 = smov 0  }
   0x9   :  { %s4114_s29 = smov 0   ;;  %s4116_s30 = smov 0  }
   0xa LB: > { %s4129_s9 = sadd.s32 4294967295, %s4049_s30   ;;  %s5424_s10 = sadd.s32 4294967294, %s4049_s30   ;;  %s4049_s30 = sphi %s4116_s30, %s5557_s30   ;;  %s4045_s29 = sphi %s4114_s29, %s5556_s29   ;;  %s4041_s28 = sphi %s4112_s28, %s5555_s28   ;;  %s4037_s27 = sphi %s4110_s27, %s5554_s27  }
   0xb   : > { %s4133_s11 = sadd.s32 1, %s4049_s30   ;;  %s109_s12 = sadd.s32 1, %s4045_s29 }
   0xc   : > { %s106_s13 = ssub.s32 %s4049_s30, %s4133_s11  ;;  %p116_p0 = scmp.ne.s32.totalorder %s4045_s29, %s4041_s28 }
   0xd   : > { %p107_p1 = scmp.eq.s32.totalorder %s106_s13, 0  ;;  %p117_p2 = scmp.eq.s32.totalorder %s4049_s30, 0 }
   0xe   : > { %p122_p3 = scmp.ne.s32.totalorder %s4041_s28, %s4037_s27  ;;  %p123_p4 = scmp.eq.s32.totalorder %s4129_s9, 0 }
   0xf   : > { %s4144_s14 = scalar_select %p107_p1, %s4045_s29, %s109_s12  }
  0x10   : > { %p4146_p5 = por %p117_p2, %p116_p0  ;;  %p4150_p6 = por %p123_p4, %p122_p3 }
  0x11   : > { %5428 = sst [smem:[#allocation17_spill]] %s4144_s14  ;;  %p5422_p7 = scmp.eq.s32.totalorder %s4129_s9, 1 }
  0x12   : > { %s5430_s16 = scalar_select %p4150_p6, 1, 0 }
  0x13   : > { %p225_p8 = scmp.eq.s32.totalorder %s5424_s10, 1  ;;  %p3687_p10 = scmp.lt.s32.totalorder %s4049_s30, 2 }
  0x14   : > { %p4161_p11 = por %p5422_p7, %p116_p0  ;;  %s4170_s19 = sand.u32 1, %s4045_s29  }
  0x15   : > { %p4165_p12 = por %p225_p8, %p122_p3  ;;  %s3147_s20 = sshll.u32 %s4049_s30, 12 }
  0x16   : > { %s5431_s17 = scalar_select %p4161_p11, 1, 0 }
  0x17   : > { %s5432_s18 = scalar_select %p4165_p12, 1, 0 }
  0x18   : > { %s3019_s21 = sshll.u32 %s4170_s19, 8  ;;  %s5433_s3 = sld [smem:[#allocation72_spill]] }
  0x19   : > { %s292_s25 = scalar_lea.vmem [#allocation4], %s3019_s21  ;;  %p4181_p13 = pnand %p3687_p10, %p4146_p5 }
  0x1a   : > { %s299_s26 = sshll.u32 %s292_s25, 4  ;;  %s289_s12 = scalar_lea.sflag [#allocation5], %s4170_s19  ;;  %s4185_s26 = int_to_ptr.vmem [resolvable:$true] %s299_s26 }
  0x1b   : > { %p3863_p1 = pneg %p4181_p13 }
  0x1e   : > { %s4177_s24 = scalar_lea.hbm %s5433_s3, %s3147_s20  ;;  %s3866_s15 = scalar_lea.hbm %s5433_s3, 8192 }
  0x1f   : > { %s3861_s13 = scalar_lea.hbm %s4177_s24, 4096  ;;  %p3867_p4 = scmp.lt.u32.totalorder %s4177_s24, %s5433_s3 }
  0x20   : > { %p3862_p0 = scmp.ne.s32.totalorder %s4177_s24, %s3861_s13  ;;  %p3868_p5 = scmp.lt.u32.totalorder %s3866_s15, %s3861_s13 }
  0x21   : > { %p3870_p10 = scmp.lt.u32.totalorder %s3861_s13, %s4177_s24 }
  0x22   : > { %p3864_p2 = pnand %p3863_p1, %p3862_p0  ;;  %p3869_p8 = por %p3868_p5, %p3867_p4 }
  0x24   : > { %p3865_p3 = pneg %p3864_p2  ;;  %p3871_p9 = por %p3870_p10, %p3869_p8 }
  0x26   : > { %p3872_p7 = pnand %p3871_p9, %p3865_p3 }
  0x28   : > { %3875 = shalt.err (!%p3872_p7)
}
  0x29   : > { %s3876_s25 = scalar_lea.vmem %s4185_s26, 4096  ;;  %s4051_s20 = smov [#allocation4]  }
  0x2a   : > { %p3877_p0 = scmp.ne.s32.totalorder %s4185_s26, %s3876_s25  ;;  %s3881_s21 = sshll.u32 %s4051_s20, 4  ;;  %s3882_s21 = int_to_ptr.vmem [resolvable:$false] %s3881_s21 }
  0x2b   : > { %s3883_s22 = scalar_lea.vmem %s3882_s21, 8192  ;;  %p3884_p11 = scmp.lt.s32.totalorder %s4185_s26, %s3882_s21 }
  0x2c   : > { %p3879_p2 = pnand %p3877_p0, %p3863_p1  ;;  %p3885_p4 = scmp.lt.s32.totalorder %s3883_s22, %s3876_s25 }
  0x2e   : > { %p3880_p12 = pneg %p3879_p2  ;;  %p3886_p5 = por %p3885_p4, %p3884_p11 }
  0x30   : > { %p3887_p8 = pnand %p3886_p5, %p3880_p12 }
  0x32   : > { %3890 = shalt.err (!%p3887_p8)
}
  0x33   : > { %s4052_s13 = smov 256   ;;  %s4053_s15 = smov 16  }
  0x34   : > { %3676 = dma.hbm_to_vmem [thread:$0]  (!%p4181_p13), %s4177_s24, 4096, %s4185_s26, %s289_s12, %s4052_s13, %s4052_s13, %s4053_s15  }
  0x35   : > { %p3025_p7 = scmp.ge.s32.totalorder %s4049_s30, 1  ;;  %p335_p9 = scmp.lt.s32.totalorder %s4049_s30, 3 }
  0x36   : > { %s3022_s23 = sshll.u32 %s4170_s19, 9  ;;  %s3148_s20 = sshll.u32 %s4049_s30, 13 }
  0x37   : > { %p4218_p11 = pnand %p3025_p7, %p335_p9  ;;  %s313_s21 = scalar_lea.vmem [#allocation7], %s3022_s23 }
  0x38   : > { %s320_s22 = sshll.u32 %s313_s21, 4  ;;  %s4226_s14 = scalar_lea.hbm %s5417_s4, %s3148_s20  ;;  %s4228_s22 = int_to_ptr.vmem [resolvable:$true] %s320_s22 }
  0x39   : > { %s310_s24 = scalar_lea.sflag [#allocation8], %s4170_s19  ;;  %s3891_s26 = scalar_lea.hbm %s4226_s14, 8192 }
  0x3a   : > { %p3892_p12 = scmp.ne.s32.totalorder %s4226_s14, %s3891_s26  ;;  %s3896_s15 = scalar_lea.hbm %s5417_s4, 16384 }
  0x3b   : > { %p3897_p0 = scmp.lt.u32.totalorder %s4226_s14, %s5417_s4  ;;  %p3898_p2 = scmp.lt.u32.totalorder %s3896_s15, %s3891_s26 }
  0x3c   : > { %p3894_p3 = pnand %p3892_p12, %p3863_p1  ;;  %p3900_p5 = scmp.lt.u32.totalorder %s3891_s26, %s4226_s14 }
  0x3d   : > { %p3899_p4 = por %p3898_p2, %p3897_p0 }
  0x3e   : > { %p3895_p10 = pneg %p3894_p3 }
  0x3f   : > { %p3901_p8 = por %p3900_p5, %p3899_p4 }
  0x41   : > { %p3902_p7 = pnand %p3901_p8, %p3895_p10 }
  0x43   : > { %3905 = shalt.err (!%p3902_p7)
}
  0x44   : > { %s3906_s23 = scalar_lea.vmem %s4228_s22, 8192  ;;  %s4054_s20 = smov [#allocation7]  }
  0x45   : > { %p3907_p9 = scmp.ne.s32.totalorder %s4228_s22, %s3906_s23  ;;  %s3911_s21 = sshll.u32 %s4054_s20, 4  ;;  %s3912_s21 = int_to_ptr.vmem [resolvable:$false] %s3911_s21 }
  0x46   : > { %s3913_s12 = scalar_lea.vmem %s3912_s21, 16384  ;;  %p3914_p6 = scmp.lt.s32.totalorder %s4228_s22, %s3912_s21 }
  0x47   : > { %p3909_p12 = pnand %p3907_p9, %p3863_p1  ;;  %p3915_p0 = scmp.lt.s32.totalorder %s3913_s12, %s3906_s23 }
  0x49   : > { %p3910_p3 = pneg %p3909_p12  ;;  %p3916_p2 = por %p3915_p0, %p3914_p6 }
  0x4b   : > { %p3917_p4 = pnand %p3916_p2, %p3910_p3 }
  0x4d   : > { %3920 = shalt.err (!%p3917_p4)
}
  0x4e   : > { %s4055_s26 = smov 512   ;;  %s4056_s13 = smov 32  }
  0x4f   : > { %3679 = dma.hbm_to_vmem [thread:$0]  (!%p4181_p13), %s4226_s14, 8192, %s4228_s22, %s310_s24, %s4055_s26, %s4055_s26, %s4056_s13  }
  0x50   : > { %339 = sbr.rel (%p4218_p11) target bundleno = 3155 (0xc53), region = 44 }
  0x57   : > { %s4259_s15 = sand.u32 1, %s4041_s28   ;;  %p5436_p6 = scmp.ne.s32.totalorder %s5430_s16, 0 }
  0x58   : > { %s3026_s3 = sshll.u32 %s4259_s15, 8  ;;  %s342_s10 = scalar_lea.sflag [#allocation5], %s4259_s15 }
  0x59   : > { %s4263_s23 = scalar_lea.vmem [#allocation4], %s3026_s3 }
  0x5a   : > { %4020 = dma.done.wait (%p5436_p6), %s342_s10, 4096  }
  0x5b   : > { %4022 = vsyncadd (%p5436_p6), %s342_s10, 4294963200  ;;  %s3027_s14 = sshll.u32 %s4259_s15, 9  ;;  %s351_s19 = scalar_lea.sflag [#allocation8], %s4259_s15 }
  0x5c   : > { %s4271_s27 = scalar_lea.vmem [#allocation7], %s3027_s14 }
  0x5d   : > { %4024 = dma.done.wait (%p5436_p6), %s351_s19, 8192  }
  0x5e   : > { %4026 = vsyncadd (%p5436_p6), %s351_s19, 4294959104  ;;  %s3028_s25 = sshll.u32 %s4259_s15, 3  ;;  %v4279_v0 = vld [vmem:[%s4263_s23] sm:$0xff]  ;;  %v4282_v1 = vld [vmem:[%s4263_s23 + $0x8] sm:$0xff]  ;;  %p409_p13 = scmp.lt.s32.totalorder %s4129_s9, 1 }
  0x5f   : > { %v4285_v2 = vld [vmem:[%s4263_s23 + $0x10] sm:$0xff]  ;;  %v4288_v3 = vld [vmem:[%s4263_s23 + $0x18] sm:$0xff]  ;;  %v4291_v4 = vld [vmem:[%s4263_s23 + $0x20] sm:$0xff]  ;;  %s4589_s19 = scalar_lea.vmem [#allocation10], %s3028_s25  ;;  %p3033_p1 = scmp.ne.s32.totalorder %s4129_s9, 0 }
  0x60   : > { %v4294_v5 = vld [vmem:[%s4263_s23 + $0x28] sm:$0xff]  ;;  %v4297_v6 = vld [vmem:[%s4263_s23 + $0x30] sm:$0xff]  ;;  %v4300_v7 = vld [vmem:[%s4263_s23 + $0x38] sm:$0xff]  ;;  %s4469_s16 = scalar_select %p409_p13, %s4129_s9, 1 }
  0x61   : > { %v4303_v8 = vld [vmem:[%s4263_s23 + $0x40] sm:$0xff]  ;;  %v4306_v9 = vld [vmem:[%s4263_s23 + $0x48] sm:$0xff]  ;;  %v4309_v10 = vld [vmem:[%s4263_s23 + $0x50] sm:$0xff] }
  0x62   : > { %v4312_v11 = vld [vmem:[%s4263_s23 + $0x58] sm:$0xff]  ;;  %v4315_v12 = vld [vmem:[%s4263_s23 + $0x60] sm:$0xff]  ;;  %v4318_v13 = vld [vmem:[%s4263_s23 + $0x68] sm:$0xff]  ;;  %s3030_s22 = sshll.u32 %s4469_s16, 3  ;;  %s3032_s24 = sshll.u32 %s4469_s16, 2 }
  0x63   : > { %v4321_v14 = vld [vmem:[%s4263_s23 + $0x70] sm:$0xff]  ;;  %v4324_v15 = vld [vmem:[%s4263_s23 + $0x78] sm:$0xff]  ;;  %v4327_v16 = vld [vmem:[%s4263_s23 + $0x80] sm:$0xff]  ;;  %s412_s12 = scalar_lea.vmem %s5414_s1, %s3030_s22  ;;  %s416_s3 = scalar_lea.vmem %s5415_s2, %s3030_s22 }
  0x64   : > { %v4330_v17 = vld [vmem:[%s4263_s23 + $0x88] sm:$0xff]  ;;  %v4333_v18 = vld [vmem:[%s4263_s23 + $0x90] sm:$0xff]  ;;  %v4336_v19 = vld [vmem:[%s4263_s23 + $0x98] sm:$0xff]  ;;  %s420_s14 = scalar_lea.vmem %s5418_s5, %s3032_s24  ;;  %s4593_s16 = scalar_lea.vmem [#allocation12], %s3028_s25 }
  0x65   : > { %v4339_v20 = vld [vmem:[%s4263_s23 + $0xa0] sm:$0xff]  ;;  %v4342_v21 = vld [vmem:[%s4263_s23 + $0xa8] sm:$0xff]  ;;  %v4345_v22 = vld [vmem:[%s4263_s23 + $0xb0] sm:$0xff] }
  0x66   : > { %v4348_v23 = vld [vmem:[%s4263_s23 + $0xb8] sm:$0xff]  ;;  %v4351_v24 = vld [vmem:[%s4263_s23 + $0xc0] sm:$0xff]  ;;  %v4354_v25 = vld [vmem:[%s4263_s23 + $0xc8] sm:$0xff] }
  0x67   : > { %v4357_v26 = vld [vmem:[%s4263_s23 + $0xd0] sm:$0xff]  ;;  %v4360_v27 = vld [vmem:[%s4263_s23 + $0xd8] sm:$0xff]  ;;  %v4363_v28 = vld [vmem:[%s4263_s23 + $0xe0] sm:$0xff] }
  0x68   : > { %v4366_v29 = vld [vmem:[%s4263_s23 + $0xe8] sm:$0xff]  ;;  %v4369_v30 = vld [vmem:[%s4263_s23 + $0xf0] sm:$0xff]  ;;  %v4372_v31 = vld [vmem:[%s4263_s23 + $0xf8] sm:$0xff] }
  0x69   : > { %v4375_v32 = vld [vmem:[%s4271_s27] sm:$0xff]  ;;  %v4378_v33 = vld [vmem:[%s4271_s27 + $0x8] sm:$0xff]  ;;  %v4381_v34 = vld [vmem:[%s4271_s27 + $0x10] sm:$0xff] }
  0x6a   : > { %v4384_v35 = vld [vmem:[%s4271_s27 + $0x18] sm:$0xff]  ;;  %v4387_v36 = vld [vmem:[%s4271_s27 + $0x20] sm:$0xff]  ;;  %v4390_v37 = vld [vmem:[%s4271_s27 + $0x28] sm:$0xff] }
  0x6b   : > { %v4393_v38 = vld [vmem:[%s4271_s27 + $0x30] sm:$0xff]  ;;  %v4396_v39 = vld [vmem:[%s4271_s27 + $0x38] sm:$0xff]  ;;  %v4399_v40 = vld [vmem:[%s4271_s27 + $0x40] sm:$0xff] }
  0x6c   : > { %v4402_v41 = vld [vmem:[%s4271_s27 + $0x48] sm:$0xff]  ;;  %v4405_v42 = vld [vmem:[%s4271_s27 + $0x50] sm:$0xff]  ;;  %v4408_v43 = vld [vmem:[%s4271_s27 + $0x58] sm:$0xff] }
  0x6d   : > { %5437 = vst [vmem:[#allocation18_spill] sm:$0xff] %v4405_v42  ;;  %5438 = vst [vmem:[#allocation19_spill] sm:$0xff] %v4408_v43  ;;  %v4411_v44 = vld [vmem:[%s4271_s27 + $0x60] sm:$0xff]  ;;  %v4414_v45 = vld [vmem:[%s4271_s27 + $0x68] sm:$0xff] }
  0x6e   : > { %v4417_v46 = vld [vmem:[%s4271_s27 + $0x70] sm:$0xff]  ;;  %v4420_v47 = vld [vmem:[%s4271_s27 + $0x78] sm:$0xff]  ;;  %v4423_v48 = vld [vmem:[%s4271_s27 + $0x80] sm:$0xff] }
  0x6f   : > { %5439 = vst [vmem:[#allocation20_spill] sm:$0xff] %v4417_v46  ;;  %5440 = vst [vmem:[#allocation21_spill] sm:$0xff] %v4420_v47  ;;  %v4426_v49 = vld [vmem:[%s4271_s27 + $0x88] sm:$0xff]  ;;  %v4429_v50 = vld [vmem:[%s4271_s27 + $0x90] sm:$0xff] }
  0x70   : > { %5441 = vst [vmem:[#allocation22_spill] sm:$0xff] %v4423_v48  ;;  %5442 = vst [vmem:[#allocation23_spill] sm:$0xff] %v4426_v49  ;;  %v4433_v51 = vld [vmem:[%s4271_s27 + $0x98] sm:$0xff]  ;;  %v4436_v52 = vld [vmem:[%s4271_s27 + $0xa0] sm:$0xff]  ;;  %v4057_v48 = vmov (!%p3033_p1), 0  }
  0x71   : > { %5443 = vst [vmem:[#allocation24_spill] sm:$0xff] %v4429_v50  ;;  %5444 = vst [vmem:[#allocation25_spill] sm:$0xff] %v4433_v51  ;;  %v4439_v53 = vld [vmem:[%s4271_s27 + $0xa8] sm:$0xff]  ;;  %v4442_v54 = vld [vmem:[%s4271_s27 + $0xb0] sm:$0xff]  ;;  %753 = vmatprep.mubr.bf16.mxu0 (!%p3033_p1), %v4057_v48  ;;  %826 = vmatprep.mubr.bf16.mxu1 (!%p3033_p1), %v4057_v48 }
  0x72   : > { %5445 = vst [vmem:[#allocation26_spill] sm:$0xff] %v4436_v52  ;;  %5446 = vst [vmem:[#allocation27_spill] sm:$0xff] %v4439_v53  ;;  %v4445_v55 = vld [vmem:[%s4271_s27 + $0xb8] sm:$0xff]  ;;  %v4448_v56 = vld [vmem:[%s4271_s27 + $0xc0] sm:$0xff] }
  0x73   : > { %5447 = vst [vmem:[#allocation28_spill] sm:$0xff] %v4442_v54  ;;  %5448 = vst [vmem:[#allocation29_spill] sm:$0xff] %v4445_v55  ;;  %v4451_v57 = vld [vmem:[%s4271_s27 + $0xc8] sm:$0xff]  ;;  %v4454_v58 = vld [vmem:[%s4271_s27 + $0xd0] sm:$0xff] }
  0x74   : > { %5449 = vst [vmem:[#allocation30_spill] sm:$0xff] %v4448_v56  ;;  %5450 = vst [vmem:[#allocation31_spill] sm:$0xff] %v4451_v57  ;;  %v4457_v59 = vld [vmem:[%s4271_s27 + $0xd8] sm:$0xff]  ;;  %v4460_v60 = vld [vmem:[%s4271_s27 + $0xe0] sm:$0xff] }
  0x75   : > { %5451 = vst [vmem:[#allocation32_spill] sm:$0xff] %v4454_v58  ;;  %5452 = vst [vmem:[#allocation33_spill] sm:$0xff] %v4457_v59  ;;  %v4463_v61 = vld [vmem:[%s4271_s27 + $0xe8] sm:$0xff]  ;;  %v4466_v62 = vld [vmem:[%s4271_s27 + $0xf0] sm:$0xff] }
  0x76   : > { %5453 = vst [vmem:[#allocation34_spill] sm:$0xff] %v4460_v60  ;;  %5454 = vst [vmem:[#allocation35_spill] sm:$0xff] %v4463_v61  ;;  %v4472_v63 = vld [vmem:[%s4271_s27 + $0xf8] sm:$0xff]  ;;  %v4475_v58 = vld [vmem:[%s4271_s27 + $0x100] sm:$0xff] }
  0x77   : > { %5455 = vst [vmem:[#allocation36_spill] sm:$0xff] %v4466_v62  ;;  %5456 = vst [vmem:[#allocation37_spill] sm:$0xff] %v4472_v63  ;;  %v4478_v56 = vld [vmem:[%s4271_s27 + $0x108] sm:$0xff]  ;;  %v4481_v60 = vld [vmem:[%s4271_s27 + $0x110] sm:$0xff] }
  0x78   : > { %5457 = vst [vmem:[#allocation38_spill] sm:$0xff] %v4475_v58  ;;  %5458 = vst [vmem:[#allocation39_spill] sm:$0xff] %v4478_v56  ;;  %v4484_v59 = vld [vmem:[%s4271_s27 + $0x118] sm:$0xff]  ;;  %v4487_v62 = vld [vmem:[%s4271_s27 + $0x120] sm:$0xff] }
  0x79   : > { %5459 = vst [vmem:[#allocation40_spill] sm:$0xff] %v4481_v60  ;;  %5460 = vst [vmem:[#allocation41_spill] sm:$0xff] %v4484_v59  ;;  %v4490_v54 = vld [vmem:[%s4271_s27 + $0x128] sm:$0xff]  ;;  %v4493_v63 = vld [vmem:[%s4271_s27 + $0x130] sm:$0xff] }
  0x7a   : > { %5461 = vst [vmem:[#allocation42_spill] sm:$0xff] %v4487_v62  ;;  %5462 = vst [vmem:[#allocation43_spill] sm:$0xff] %v4490_v54  ;;  %v4496_v50 = vld [vmem:[%s4271_s27 + $0x138] sm:$0xff]  ;;  %v4499_v58 = vld [vmem:[%s4271_s27 + $0x140] sm:$0xff] }
  0x7b   : > { %5463 = vst [vmem:[#allocation44_spill] sm:$0xff] %v4493_v63  ;;  %5464 = vst [vmem:[#allocation45_spill] sm:$0xff] %v4496_v50  ;;  %v4502_v56 = vld [vmem:[%s4271_s27 + $0x148] sm:$0xff]  ;;  %v4505_v60 = vld [vmem:[%s4271_s27 + $0x150] sm:$0xff] }
  0x7c   : > { %5465 = vst [vmem:[#allocation46_spill] sm:$0xff] %v4499_v58  ;;  %5466 = vst [vmem:[#allocation47_spill] sm:$0xff] %v4502_v56  ;;  %v4509_v59 = vld [vmem:[%s4271_s27 + $0x158] sm:$0xff]  ;;  %v4512_v62 = vld [vmem:[%s4271_s27 + $0x160] sm:$0xff] }
  0x7d   : > { %5467 = vst [vmem:[#allocation48_spill] sm:$0xff] %v4505_v60  ;;  %5468 = vst [vmem:[#allocation49_spill] sm:$0xff] %v4509_v59  ;;  %v4515_v54 = vld [vmem:[%s4271_s27 + $0x168] sm:$0xff]  ;;  %v4519_v63 = vld [vmem:[%s4271_s27 + $0x170] sm:$0xff] }
  0x7e   : > { %5469 = vst [vmem:[#allocation50_spill] sm:$0xff] %v4512_v62  ;;  %5470 = vst [vmem:[#allocation51_spill] sm:$0xff] %v4515_v54  ;;  %v4522_v58 = vld [vmem:[%s4271_s27 + $0x178] sm:$0xff]  ;;  %v4525_v56 = vld [vmem:[%s4271_s27 + $0x180] sm:$0xff] }
  0x7f   : > { %5471 = vst [vmem:[#allocation52_spill] sm:$0xff] %v4519_v63  ;;  %5472 = vst [vmem:[#allocation53_spill] sm:$0xff] %v4522_v58  ;;  %v4528_v60 = vld [vmem:[%s4271_s27 + $0x188] sm:$0xff]  ;;  %v4531_v59 = vld [vmem:[%s4271_s27 + $0x190] sm:$0xff] }
  0x80   : > { %5473 = vst [vmem:[#allocation54_spill] sm:$0xff] %v4525_v56  ;;  %5474 = vst [vmem:[#allocation55_spill] sm:$0xff] %v4528_v60  ;;  %v4534_v62 = vld [vmem:[%s4271_s27 + $0x198] sm:$0xff]  ;;  %v4540_v63 = vld [vmem:[%s4271_s27 + $0x1a0] sm:$0xff] }
  0x81   : > { %5475 = vst [vmem:[#allocation56_spill] sm:$0xff] %v4531_v59  ;;  %5476 = vst [vmem:[#allocation57_spill] sm:$0xff] %v4534_v62  ;;  %v4543_v54 = vld [vmem:[%s4271_s27 + $0x1a8] sm:$0xff]  ;;  %v4546_v58 = vld [vmem:[%s4271_s27 + $0x1b0] sm:$0xff] }
  0x82   : > { %5477 = vst [vmem:[#allocation58_spill] sm:$0xff] %v4540_v63  ;;  %5478 = vst [vmem:[#allocation59_spill] sm:$0xff] %v4543_v54  ;;  %v4555_v59 = vld [vmem:[%s4271_s27 + $0x1b8] sm:$0xff]  ;;  %v4558_v56 = vld [vmem:[%s4271_s27 + $0x1c0] sm:$0xff] }
  0x83   : > { %5479 = vst [vmem:[#allocation60_spill] sm:$0xff] %v4546_v58  ;;  %5480 = vst [vmem:[#allocation61_spill] sm:$0xff] %v4555_v59  ;;  %v4561_v62 = vld [vmem:[%s4271_s27 + $0x1c8] sm:$0xff]  ;;  %v4564_v63 = vld [vmem:[%s4271_s27 + $0x1d0] sm:$0xff]  ;;  %527 = sbr.rel (%p3033_p1) target bundleno = 412 (0x19c), region = 56 }
  0x84   : > { %5481 = vst [vmem:[#allocation62_spill] sm:$0xff] %v4558_v56  ;;  %5482 = vst [vmem:[#allocation63_spill] sm:$0xff] %v4561_v62  ;;  %v4567_v54 = vld [vmem:[%s4271_s27 + $0x1d8] sm:$0xff]  ;;  %v4570_v58 = vld [vmem:[%s4271_s27 + $0x1e0] sm:$0xff]  ;;  %v3041_v56 = vcombine.high (!%p3033_p1), %v4294_v5, %v4300_v7  ;;  %v3045_v62 = vcombine.high (!%p3033_p1), %v4306_v9, %v4312_v11 }
  0x85   : > { %5483 = vst [vmem:[#allocation64_spill] sm:$0xff] %v4564_v63  ;;  %5484 = vst [vmem:[#allocation65_spill] sm:$0xff] %v4567_v54  ;;  %v4573_v60 = vld [vmem:[%s4271_s27 + $0x1e8] sm:$0xff]  ;;  %v4576_v50 = vld [vmem:[%s4271_s27 + $0x1f0] sm:$0xff]  ;;  %v3037_v63 = vcombine.high (!%p3033_p1), %v4282_v1, %v4288_v3  ;;  %v3040_v54 = vcombine.low (!%p3033_p1), %v4294_v5, %v4300_v7 }
  0x86   : > { %5485 = vst [vmem:[#allocation66_spill] sm:$0xff] %v4570_v58  ;;  %5486 = vst [vmem:[#allocation67_spill] sm:$0xff] %v4573_v60  ;;  %v4579_v61 = vld [vmem:[%s4271_s27 + $0x1f8] sm:$0xff]  ;;  %v4581_v57 = vld [vmem:[%s420_s14] sm:$0xf]  ;;  %v3039_v58 = vcombine.high (!%p3033_p1), %v4291_v4, %v4297_v6  ;;  %v3043_v60 = vcombine.high (!%p3033_p1), %v4303_v8, %v4309_v10 }
  0x87   : > { %5487 = vst [vmem:[#allocation68_spill] sm:$0xff] %v4576_v50  ;;  %5488 = vst [vmem:[#allocation69_spill] sm:$0xff] %v4579_v61  ;;  %v4583_v52 = vld [vmem:[%s412_s12] sm:$0xff]  ;;  %v3035_v50 = vcombine.high (!%p3033_p1), %v4279_v0, %v4285_v2  ;;  %794 = vmatprep.subr.bf16.mxu1 (!%p3033_p1), %v3037_v63  ;;  %v3038_v61 = vcombine.low (!%p3033_p1), %v4291_v4, %v4297_v6  ;;  %v3052_v63 = vcombine.low (!%p3033_p1), %v4330_v17, %v4336_v19 }
  0x88   : > { %5489 = vst [vmem:[#allocation70_spill] sm:$0xff] %v4583_v52  ;;  %v4585_v59 = vld [vmem:[%s416_s3] sm:$0xff]  ;;  %v3034_v52 = vcombine.low (!%p3033_p1), %v4279_v0, %v4285_v2 }
  0x89   : > { %5490 = vst [vmem:[#allocation71_spill] sm:$0xff] %v4585_v59  ;;  %v3036_v59 = vcombine.low (!%p3033_p1), %v4282_v1, %v4288_v3  ;;  %721 = vmatprep.subr.bf16.mxu0 (!%p3033_p1), %v3035_v50  ;;  %v3042_v50 = vcombine.low (!%p3033_p1), %v4303_v8, %v4309_v10 }
  0x8a   : > { %722 = vmatpush1.bf16.msra.mxu0 %v3034_v52  ;;  %v3044_v52 = vcombine.low %v4306_v9, %v4312_v11 }
  0x8b   : > { %795 = vmatpush1.bf16.msra.mxu1 %v3036_v59  ;;  %723 = vmatprep.subr.bf16.mxu0 %v3039_v58  ;;  %v3049_v58 = vcombine.high %v4318_v13, %v4324_v15  ;;  %v3046_v59 = vcombine.low %v4315_v12, %v4321_v14 }
  0x8c   : > { %796 = vmatprep.subr.bf16.mxu1 %v3041_v56  ;;  %v3047_v56 = vcombine.high %v4315_v12, %v4321_v14 }
  0x8e   : > { %724 = vmatpush1.bf16.msra.mxu0 %v3038_v61  ;;  %v3053_v61 = vcombine.high %v4330_v17, %v4336_v19 }
  0x8f   : > { %797 = vmatpush1.bf16.msra.mxu1 %v3040_v54  ;;  %725 = vmatprep.subr.bf16.mxu0 %v3043_v60  ;;  %v3048_v54 = vcombine.low %v4318_v13, %v4324_v15  ;;  %v3051_v60 = vcombine.high %v4327_v16, %v4333_v18 }
  0x90   : > { %798 = vmatprep.subr.bf16.mxu1 %v3045_v62  ;;  %v3050_v62 = vcombine.low %v4327_v16, %v4333_v18 }
  0x92   : > { %726 = vmatpush1.bf16.msra.mxu0 %v3042_v50  ;;  %v3055_v50 = vcombine.high %v4339_v20, %v4345_v22 }
  0x93   : > { %799 = vmatpush1.bf16.msra.mxu1 %v3044_v52  ;;  %727 = vmatprep.subr.bf16.mxu0 %v3047_v56  ;;  %v3057_v52 = vcombine.high %v4342_v21, %v4348_v23  ;;  %v3054_v56 = vcombine.low %v4339_v20, %v4345_v22 }
  0x94   : > { %800 = vmatprep.subr.bf16.mxu1 %v3049_v58  ;;  %v3056_v58 = vcombine.low %v4342_v21, %v4348_v23 }
  0x96   : > { %728 = vmatpush1.bf16.msra.mxu0 %v3046_v59  ;;  %v3059_v59 = vcombine.high %v4351_v24, %v4357_v26 }
  0x97   : > { %801 = vmatpush1.bf16.msra.mxu1 %v3048_v54  ;;  %729 = vmatprep.subr.bf16.mxu0 %v3051_v60  ;;  %v3061_v54 = vcombine.high %v4354_v25, %v4360_v27  ;;  %v3058_v60 = vcombine.low %v4351_v24, %v4357_v26 }
  0x98   : > { %802 = vmatprep.subr.bf16.mxu1 %v3053_v61  ;;  %v3060_v61 = vcombine.low %v4354_v25, %v4360_v27 }
  0x9a   : > { %730 = vmatpush1.bf16.msra.mxu0 %v3050_v62  ;;  %v3063_v62 = vcombine.high %v4363_v28, %v4369_v30 }
  0x9b   : > { %803 = vmatpush1.bf16.msra.mxu1 %v3052_v63  ;;  %731 = vmatprep.subr.bf16.mxu0 %v3055_v50  ;;  %v3065_v63 = vcombine.high %v4366_v29, %v4372_v31  ;;  %v3062_v50 = vcombine.low %v4363_v28, %v4369_v30 }
  0x9c   : > { %804 = vmatprep.subr.bf16.mxu1 %v3057_v52  ;;  %v3064_v52 = vcombine.low %v4366_v29, %v4372_v31 }
  0x9e   : > { %732 = vmatpush1.bf16.msra.mxu0 %v3054_v56  ;;  %v528_v56 = vld [vmem:[%s5413_s0] sm:$0xff] }
  0x9f   : > { %805 = vmatpush1.bf16.msra.mxu1 %v3056_v58  ;;  %733 = vmatprep.subr.bf16.mxu0 %v3059_v59  ;;  %v529_v58 = vld [vmem:[%s5413_s0 + $0x8] sm:$0xff] }
  0xa0   : > { %806 = vmatprep.subr.bf16.mxu1 %v3061_v54  ;;  %v536_v59 = vpack.c.bf16 %v529_v58, %v528_v56  ;;  %v530_v54 = vld [vmem:[%s5413_s0 + $0x10] sm:$0xff]  ;;  %v535_v56 = vld [vmem:[%s5413_s0 + $0x38] sm:$0xff] }
  0xa2   : > { %734 = vmatpush1.bf16.msra.mxu0 %v3058_v60  ;;  %v531_v60 = vld [vmem:[%s5413_s0 + $0x18] sm:$0xff] }
  0xa3   : > { %807 = vmatpush1.bf16.msra.mxu1 %v3060_v61  ;;  %735 = vmatprep.subr.bf16.mxu0 %v3063_v62  ;;  %v537_v61 = vpack.c.bf16 %v531_v60, %v530_v54  ;;  %v532_v62 = vld [vmem:[%s5413_s0 + $0x20] sm:$0xff] }
  0xa4   : > { %808 = vmatprep.subr.bf16.mxu1 %v3065_v63  ;;  %v533_v63 = vld [vmem:[%s5413_s0 + $0x28] sm:$0xff] }
  0xa6   : > { %736 = vmatpush1.bf16.msra.mxu0 %v3062_v50  ;;  %v538_v50 = vpack.c.bf16 %v533_v63, %v532_v62 }
  0xa7   : > { %809 = vmatpush1.bf16.msra.mxu1 %v3064_v52  ;;  %v534_v52 = vld [vmem:[%s5413_s0 + $0x30] sm:$0xff] }
  0xa8   : > { %v539_v58 = vpack.c.bf16 %v535_v56, %v534_v52 }
  0xa9   : > { %754 = vmatmul.mubr.bf16.vlgmr.msra.gmra.mrb[0].mxu0 %v536_v59 }
  0xaa   : > { %827 = vmatmul.mubr.bf16.vlgmr.msra.gmra.mrb[0].mxu1 %v536_v59  ;;  %763 = vmatprep.mubr.bf16.mxu0 %v4057_v48  ;;  %v541_v59 = vlaneseq }
  0xab   : > { %836 = vmatprep.mubr.bf16.mxu1 %v4057_v48 }
  0xac   : > { %v542_v54 = vshrl.u32 %v541_v59, 7 }
  0xae   : > { %v543_v60 = vsub.s32 0, %v542_v54  ;;  %v547_v62 = vsub.s32 1, %v542_v54  ;;  %v555_v63 = vsub.s32 3, %v542_v54 }
  0xb0   : > { %v4699_v55 = vrot.slane %v4581_v57, %v547_v62  ;;  %v4702_v51 = vrot.slane %v4581_v57, %v555_v63 }
  0xb1   : > { %764 = vmatmul.mubr.bf16.gmra.mrb[4].mxu0 %v537_v61 }
  0xb2   : > { %837 = vmatmul.mubr.bf16.gmra.mrb[4].mxu1 %v537_v61  ;;  %773 = vmatprep.mubr.bf16.mxu0 %v4057_v48  ;;  %v551_v61 = vsub.s32 2, %v542_v54 }
  0xb3   : > { %846 = vmatprep.mubr.bf16.mxu1 %v4057_v48 }
  0xb9   : > { %774 = vmatmul.mubr.bf16.gmra.mrb[8].mxu0 %v538_v50 }
  0xba   : > { %847 = vmatmul.mubr.bf16.gmra.mrb[8].mxu1 %v538_v50  ;;  %783 = vmatprep.mubr.bf16.mxu0 %v4057_v48  ;;  %v4693_v50 = vrot.slane %v4581_v57, %v543_v60 }
  0xbb   : > { %856 = vmatprep.mubr.bf16.mxu1 %v4057_v48  ;;  %v4696_v48 = vrot.slane %v4581_v57, %v551_v61 }
  0xc1   : > { %784 = vmatmul.mubr.bf16.gmra.mrb[12].mxu0 %v539_v58 }
  0xc2   : > { %857 = vmatmul.mubr.bf16.gmra.mrb[12].mxu1 %v539_v58 }
 0x17c   : > { %v755_v52 = vpop.f32.mrb[0].mxu0 }
 0x17d   : > { %v828_v56 = vpop.f32.mrb[0].mxu1  ;;  %v756_v58 = vadd.f32 %v755_v52, %v4693_v50  ;;  %v757_v46 = vpop.f32.mrb[1].mxu0 }
 0x17e   : > { %v829_v59 = vadd.f32 %v828_v56, %v4696_v48  ;;  %v830_v54 = vpop.f32.mrb[1].mxu1  ;;  %v758_v60 = vadd.f32 %v757_v46, %v4699_v55  ;;  %v759_v61 = vpop.f32.mrb[2].mxu0 }
 0x17f   : > { %v831_v42 = vadd.f32 %v830_v54, %v4702_v51  ;;  %v832_v53 = vpop.f32.mrb[2].mxu1  ;;  %867 = vst [vmem:[#allocation2] sm:$0xff] %v756_v58  ;;  %v760_v62 = vadd.f32 %v759_v61, %v4693_v50  ;;  %v761_v49 = vpop.f32.mrb[3].mxu0 }
 0x180   : > { %869 = vst [vmem:[#allocation2 + $0x10] sm:$0xff] %v829_v59  ;;  %v833_v63 = vadd.f32 %v832_v53, %v4696_v48  ;;  %v834_v47 = vpop.f32.mrb[3].mxu1  ;;  %868 = vst [vmem:[#allocation2 + $0x8] sm:$0xff] %v758_v60  ;;  %v762_v52 = vadd.f32 %v761_v49, %v4699_v55 }
 0x181   : > { %870 = vst [vmem:[#allocation2 + $0x18] sm:$0xff] %v831_v42  ;;  %v835_v56 = vadd.f32 %v834_v47, %v4702_v51  ;;  %871 = vst [vmem:[#allocation2 + $0x20] sm:$0xff] %v760_v62 }
 0x182   : > { %873 = vst [vmem:[#allocation2 + $0x30] sm:$0xff] %v833_v63  ;;  %872 = vst [vmem:[#allocation2 + $0x28] sm:$0xff] %v762_v52 }
 0x183   : > { %874 = vst [vmem:[#allocation2 + $0x38] sm:$0xff] %v835_v56 }
 0x184   : > { %v765_v46 = vpop.f32.mrb[4].mxu0 }
 0x185   : > { %v838_v54 = vpop.f32.mrb[4].mxu1  ;;  %v766_v58 = vadd.f32 %v765_v46, %v4693_v50  ;;  %v767_v61 = vpop.f32.mrb[5].mxu0 }
 0x186   : > { %v839_v59 = vadd.f32 %v838_v54, %v4696_v48  ;;  %v840_v53 = vpop.f32.mrb[5].mxu1  ;;  %v768_v43 = vadd.f32 %v767_v61, %v4699_v55  ;;  %v769_v60 = vpop.f32.mrb[6].mxu0 }
 0x187   : > { %v841_v42 = vadd.f32 %v840_v53, %v4702_v51  ;;  %v842_v49 = vpop.f32.mrb[6].mxu1  ;;  %875 = vst [vmem:[#allocation2 + $0x40] sm:$0xff] %v766_v58  ;;  %v770_v47 = vadd.f32 %v769_v60, %v4693_v50  ;;  %v771_v63 = vpop.f32.mrb[7].mxu0 }
 0x188   : > { %877 = vst [vmem:[#allocation2 + $0x50] sm:$0xff] %v839_v59  ;;  %v843_v62 = vadd.f32 %v842_v49, %v4696_v48  ;;  %v844_v52 = vpop.f32.mrb[7].mxu1  ;;  %876 = vst [vmem:[#allocation2 + $0x48] sm:$0xff] %v768_v43  ;;  %v772_v56 = vadd.f32 %v771_v63, %v4699_v55 }
 0x189   : > { %878 = vst [vmem:[#allocation2 + $0x58] sm:$0xff] %v841_v42  ;;  %v845_v46 = vadd.f32 %v844_v52, %v4702_v51  ;;  %879 = vst [vmem:[#allocation2 + $0x60] sm:$0xff] %v770_v47 }
 0x18a   : > { %881 = vst [vmem:[#allocation2 + $0x70] sm:$0xff] %v843_v62  ;;  %880 = vst [vmem:[#allocation2 + $0x68] sm:$0xff] %v772_v56 }
 0x18b   : > { %882 = vst [vmem:[#allocation2 + $0x78] sm:$0xff] %v845_v46 }
 0x18c   : > { %v775_v54 = vpop.f32.mrb[8].mxu0 }
 0x18d   : > { %v848_v61 = vpop.f32.mrb[8].mxu1  ;;  %v776_v58 = vadd.f32 %v775_v54, %v4693_v50  ;;  %v777_v53 = vpop.f32.mrb[9].mxu0 }
 0x18e   : > { %v849_v59 = vadd.f32 %v848_v61, %v4696_v48  ;;  %v850_v60 = vpop.f32.mrb[9].mxu1  ;;  %v778_v49 = vadd.f32 %v777_v53, %v4699_v55  ;;  %v779_v42 = vpop.f32.mrb[10].mxu0 }
 0x18f   : > { %v851_v43 = vadd.f32 %v850_v60, %v4702_v51  ;;  %v852_v63 = vpop.f32.mrb[10].mxu1  ;;  %883 = vst [vmem:[#allocation2 + $0x80] sm:$0xff] %v776_v58  ;;  %v780_v47 = vadd.f32 %v779_v42, %v4693_v50  ;;  %v781_v52 = vpop.f32.mrb[11].mxu0 }
 0x190   : > { %885 = vst [vmem:[#allocation2 + $0x90] sm:$0xff] %v849_v59  ;;  %v853_v62 = vadd.f32 %v852_v63, %v4696_v48  ;;  %v854_v56 = vpop.f32.mrb[11].mxu1  ;;  %884 = vst [vmem:[#allocation2 + $0x88] sm:$0xff] %v778_v49  ;;  %v782_v46 = vadd.f32 %v781_v52, %v4699_v55 }
 0x191   : > { %886 = vst [vmem:[#allocation2 + $0x98] sm:$0xff] %v851_v43  ;;  %v855_v54 = vadd.f32 %v854_v56, %v4702_v51  ;;  %887 = vst [vmem:[#allocation2 + $0xa0] sm:$0xff] %v780_v47 }
 0x192   : > { %889 = vst [vmem:[#allocation2 + $0xb0] sm:$0xff] %v853_v62  ;;  %888 = vst [vmem:[#allocation2 + $0xa8] sm:$0xff] %v782_v46 }
 0x193   : > { %890 = vst [vmem:[#allocation2 + $0xb8] sm:$0xff] %v855_v54 }
 0x194   : > { %v785_v61 = vpop.f32.mrb[12].mxu0 }
 0x195   : > { %v858_v53 = vpop.f32.mrb[12].mxu1  ;;  %v786_v58 = vadd.f32 %v785_v61, %v4693_v50  ;;  %v787_v60 = vpop.f32.mrb[13].mxu0 }
 0x196   : > { %v859_v59 = vadd.f32 %v858_v53, %v4696_v48  ;;  %v860_v42 = vpop.f32.mrb[13].mxu1  ;;  %v788_v63 = vadd.f32 %v787_v60, %v4699_v55  ;;  %v789_v43 = vpop.f32.mrb[14].mxu0 }
 0x197   : > { %v861_v49 = vadd.f32 %v860_v42, %v4702_v51  ;;  %v862_v52 = vpop.f32.mrb[14].mxu1  ;;  %891 = vst [vmem:[#allocation2 + $0xc0] sm:$0xff] %v786_v58  ;;  %v790_v47 = vadd.f32 %v789_v43, %v4693_v50  ;;  %v791_v56 = vpop.f32.mrb[15].mxu0 }
 0x198   : > { %893 = vst [vmem:[#allocation2 + $0xd0] sm:$0xff] %v859_v59  ;;  %v863_v62 = vadd.f32 %v862_v52, %v4696_v48  ;;  %v864_v46 = vpop.f32.mrb[15].mxu1  ;;  %892 = vst [vmem:[#allocation2 + $0xc8] sm:$0xff] %v788_v63  ;;  %v792_v54 = vadd.f32 %v791_v56, %v4699_v55 }
 0x199   : > { %894 = vst [vmem:[#allocation2 + $0xd8] sm:$0xff] %v861_v49  ;;  %v865_v61 = vadd.f32 %v864_v46, %v4702_v51  ;;  %895 = vst [vmem:[#allocation2 + $0xe0] sm:$0xff] %v790_v47 }
 0x19a   : > { %897 = vst [vmem:[#allocation2 + $0xf0] sm:$0xff] %v863_v62  ;;  %896 = vst [vmem:[#allocation2 + $0xe8] sm:$0xff] %v792_v54 }
 0x19b   : > { %898 = vst [vmem:[#allocation2 + $0xf8] sm:$0xff] %v865_v61 }
 0x19c PF: > { %p3066_p11 = scmp.le.s32.totalorder %s4129_s9, 0 }
 0x19d   : > { %v3068_v50 = vcombine.high (!%p3066_p11), %v4279_v0, %v4285_v2  ;;  %v3070_v48 = vcombine.high (!%p3066_p11), %v4282_v1, %v4288_v3  ;;  %v3067_v53 = vcombine.low (!%p3066_p11), %v4279_v0, %v4285_v2  ;;  %v3069_v51 = vcombine.low (!%p3066_p11), %v4282_v1, %v4288_v3  ;;  %v905_v63 = vld [vmem:[#allocation3 + $0x18] sm:$0xff] (!%p3066_p11) }
 0x19e   : > { %901 = sbr.rel (%p3066_p11) target bundleno = 689 (0x2b1), region = 60  ;;  %v3072_v55 = vcombine.high (!%p3066_p11), %v4291_v4, %v4297_v6  ;;  %v3074_v58 = vcombine.high (!%p3066_p11), %v4294_v5, %v4300_v7  ;;  %v3071_v59 = vcombine.low (!%p3066_p11), %v4291_v4, %v4297_v6  ;;  %v3073_v60 = vcombine.low (!%p3066_p11), %v4294_v5, %v4300_v7  ;;  %v909_v43 = vld [vmem:[#allocation3 + $0x38] sm:$0xff] (!%p3066_p11) }
 0x19f   : > { %1095 = vmatprep.subr.bf16.mxu0 (!%p3066_p11), %v3068_v50  ;;  %1168 = vmatprep.subr.bf16.mxu1 (!%p3066_p11), %v3070_v48  ;;  %v3076_v0 = vcombine.high (!%p3066_p11), %v4303_v8, %v4309_v10  ;;  %v3078_v1 = vcombine.high (!%p3066_p11), %v4306_v9, %v4312_v11  ;;  %v4058_v2 = vmov (!%p3066_p11), 0   ;;  %v3075_v3 = vcombine.low (!%p3066_p11), %v4303_v8, %v4309_v10 }
 0x1a0   : > { %1096 = vmatpush1.bf16.msra.mxu0 (!%p3066_p11), %v3067_v53  ;;  %1169 = vmatpush1.bf16.msra.mxu1 (!%p3066_p11), %v3069_v51  ;;  %v3077_v4 = vcombine.low (!%p3066_p11), %v4306_v9, %v4312_v11  ;;  %v3080_v5 = vcombine.high (!%p3066_p11), %v4315_v12, %v4321_v14  ;;  %v3082_v6 = vcombine.high (!%p3066_p11), %v4318_v13, %v4324_v15  ;;  %v915_v47 = vlaneseq (!%p3066_p11) }
 0x1a1   : > { %1097 = vmatprep.subr.bf16.mxu0 (!%p3066_p11), %v3072_v55  ;;  %1170 = vmatprep.subr.bf16.mxu1 (!%p3066_p11), %v3074_v58  ;;  %v3079_v7 = vcombine.low (!%p3066_p11), %v4315_v12, %v4321_v14  ;;  %v3081_v42 = vcombine.low (!%p3066_p11), %v4318_v13, %v4324_v15  ;;  %v3084_v8 = vcombine.high (!%p3066_p11), %v4327_v16, %v4333_v18 }
 0x1a2   : > { %1127 = vmatprep.mubr.bf16.mxu0 (!%p3066_p11), %v4058_v2  ;;  %1200 = vmatprep.mubr.bf16.mxu1 (!%p3066_p11), %v4058_v2  ;;  %v3086_v9 = vcombine.high (!%p3066_p11), %v4330_v17, %v4336_v19  ;;  %v3083_v10 = vcombine.low (!%p3066_p11), %v4327_v16, %v4333_v18  ;;  %v3085_v11 = vcombine.low (!%p3066_p11), %v4330_v17, %v4336_v19  ;;  %v916_v62 = vshrl.u32 (!%p3066_p11), %v915_v47, 7 }
 0x1a3   : > { %v3088_v12 = vcombine.high (!%p3066_p11), %v4339_v20, %v4345_v22  ;;  %v3090_v13 = vcombine.high (!%p3066_p11), %v4342_v21, %v4348_v23  ;;  %v3087_v14 = vcombine.low (!%p3066_p11), %v4339_v20, %v4345_v22  ;;  %v3089_v15 = vcombine.low (!%p3066_p11), %v4342_v21, %v4348_v23 }
 0x1a4   : > { %1098 = vmatpush1.bf16.msra.mxu0 (!%p3066_p11), %v3071_v59  ;;  %1171 = vmatpush1.bf16.msra.mxu1 (!%p3066_p11), %v3073_v60  ;;  %v3092_v16 = vcombine.high (!%p3066_p11), %v4351_v24, %v4357_v26  ;;  %v3094_v17 = vcombine.high (!%p3066_p11), %v4354_v25, %v4360_v27  ;;  %v3091_v18 = vcombine.low (!%p3066_p11), %v4351_v24, %v4357_v26  ;;  %v902_v24 = vld [vmem:[#allocation3] sm:$0xff] (!%p3066_p11)  ;;  %v903_v26 = vld [vmem:[#allocation3 + $0x8] sm:$0xff] (!%p3066_p11)  ;;  %v917_v56 = vsub.s32 (!%p3066_p11), 0, %v916_v62 }
 0x1a5   : > { %1099 = vmatprep.subr.bf16.mxu0 %v3076_v0  ;;  %1172 = vmatprep.subr.bf16.mxu1 %v3078_v1  ;;  %v3093_v19 = vcombine.low %v4354_v25, %v4360_v27  ;;  %v3096_v20 = vcombine.high %v4363_v28, %v4369_v30  ;;  %v3098_v21 = vcombine.high %v4366_v29, %v4372_v31  ;;  %v904_v27 = vld [vmem:[#allocation3 + $0x10] sm:$0xff]  ;;  %v925_v46 = vsub.s32 2, %v916_v62 }
 0x1a6   : > { %v3095_v22 = vcombine.low %v4363_v28, %v4369_v30  ;;  %v3097_v23 = vcombine.low %v4366_v29, %v4372_v31  ;;  %v910_v25 = vpack.c.bf16 %v903_v26, %v902_v24  ;;  %v911_v49 = vpack.c.bf16 %v905_v63, %v904_v27  ;;  %v906_v28 = vld [vmem:[#allocation3 + $0x20] sm:$0xff]  ;;  %v907_v29 = vld [vmem:[#allocation3 + $0x28] sm:$0xff]  ;;  %v908_v31 = vld [vmem:[#allocation3 + $0x30] sm:$0xff] }
 0x1a7   : > { %v912_v30 = vpack.c.bf16 %v907_v29, %v906_v28  ;;  %v913_v52 = vpack.c.bf16 %v909_v43, %v908_v31  ;;  %v921_v54 = vsub.s32 1, %v916_v62  ;;  %v929_v61 = vsub.s32 3, %v916_v62 }
 0x1a8   : > { %1100 = vmatpush1.bf16.msra.mxu0 %v3075_v3  ;;  %1173 = vmatpush1.bf16.msra.mxu1 %v3077_v4  ;;  %v4810_v50 = vrot.slane %v4581_v57, %v917_v56  ;;  %v4813_v48 = vrot.slane %v4581_v57, %v925_v46 }
 0x1a9   : > { %1101 = vmatprep.subr.bf16.mxu0 %v3080_v5  ;;  %1174 = vmatprep.subr.bf16.mxu1 %v3082_v6  ;;  %v4816_v53 = vrot.slane %v4581_v57, %v921_v54  ;;  %v4819_v51 = vrot.slane %v4581_v57, %v929_v61 }
 0x1ac   : > { %1102 = vmatpush1.bf16.msra.mxu0 %v3079_v7  ;;  %1175 = vmatpush1.bf16.msra.mxu1 %v3081_v42 }
 0x1ad   : > { %1103 = vmatprep.subr.bf16.mxu0 %v3084_v8  ;;  %1176 = vmatprep.subr.bf16.mxu1 %v3086_v9 }
 0x1b0   : > { %1104 = vmatpush1.bf16.msra.mxu0 %v3083_v10  ;;  %1177 = vmatpush1.bf16.msra.mxu1 %v3085_v11 }
 0x1b1   : > { %1105 = vmatprep.subr.bf16.mxu0 %v3088_v12  ;;  %1178 = vmatprep.subr.bf16.mxu1 %v3090_v13 }
 0x1b4   : > { %1106 = vmatpush1.bf16.msra.mxu0 %v3087_v14  ;;  %1179 = vmatpush1.bf16.msra.mxu1 %v3089_v15 }
 0x1b5   : > { %1107 = vmatprep.subr.bf16.mxu0 %v3092_v16  ;;  %1180 = vmatprep.subr.bf16.mxu1 %v3094_v17 }
 0x1b8   : > { %1108 = vmatpush1.bf16.msra.mxu0 %v3091_v18  ;;  %1181 = vmatpush1.bf16.msra.mxu1 %v3093_v19 }
 0x1b9   : > { %1109 = vmatprep.subr.bf16.mxu0 %v3096_v20  ;;  %1182 = vmatprep.subr.bf16.mxu1 %v3098_v21 }
 0x1bc   : > { %1110 = vmatpush1.bf16.msra.mxu0 %v3095_v22  ;;  %1183 = vmatpush1.bf16.msra.mxu1 %v3097_v23 }
 0x1bf   : > { %1128 = vmatmul.mubr.bf16.vlgmr.msra.gmra.mrb[0].mxu0 %v910_v25  ;;  %1201 = vmatmul.mubr.bf16.vlgmr.msra.gmra.mrb[0].mxu1 %v910_v25 }
 0x1c0   : > { %1137 = vmatprep.mubr.bf16.mxu0 %v4058_v2  ;;  %1210 = vmatprep.mubr.bf16.mxu1 %v4058_v2 }
 0x1c7   : > { %1138 = vmatmul.mubr.bf16.gmra.mrb[4].mxu0 %v911_v49  ;;  %1211 = vmatmul.mubr.bf16.gmra.mrb[4].mxu1 %v911_v49 }
 0x1c8   : > { %1147 = vmatprep.mubr.bf16.mxu0 %v4058_v2  ;;  %1220 = vmatprep.mubr.bf16.mxu1 %v4058_v2 }
 0x1cf   : > { %1148 = vmatmul.mubr.bf16.gmra.mrb[8].mxu0 %v912_v30  ;;  %1221 = vmatmul.mubr.bf16.gmra.mrb[8].mxu1 %v912_v30 }
 0x1d0   : > { %1157 = vmatprep.mubr.bf16.mxu0 %v4058_v2  ;;  %1230 = vmatprep.mubr.bf16.mxu1 %v4058_v2 }
 0x1d7   : > { %1158 = vmatmul.mubr.bf16.gmra.mrb[12].mxu0 %v913_v52  ;;  %1231 = vmatmul.mubr.bf16.gmra.mrb[12].mxu1 %v913_v52 }
 0x292   : > { %v1129_v55 = vpop.f32.mrb[0].mxu0  ;;  %v1202_v58 = vpop.f32.mrb[0].mxu1 }
 0x293   : > { %v1130_v59 = vadd.f32 %v1129_v55, %v4810_v50  ;;  %v1203_v60 = vadd.f32 %v1202_v58, %v4813_v48  ;;  %v1131_v0 = vpop.f32.mrb[1].mxu0  ;;  %v1204_v1 = vpop.f32.mrb[1].mxu1 }
 0x294   : > { %v1132_v2 = vadd.f32 %v1131_v0, %v4816_v53  ;;  %v1205_v3 = vadd.f32 %v1204_v1, %v4819_v51  ;;  %v1133_v4 = vpop.f32.mrb[2].mxu0  ;;  %v1206_v5 = vpop.f32.mrb[2].mxu1 }
 0x295   : > { %1241 = vst [vmem:[#allocation2] sm:$0xff] %v1130_v59  ;;  %1243 = vst [vmem:[#allocation2 + $0x10] sm:$0xff] %v1203_v60  ;;  %v1134_v6 = vadd.f32 %v1133_v4, %v4810_v50  ;;  %v1207_v57 = vadd.f32 %v1206_v5, %v4813_v48  ;;  %v1135_v7 = vpop.f32.mrb[3].mxu0  ;;  %v1208_v42 = vpop.f32.mrb[3].mxu1 }
 0x296   : > { %1242 = vst [vmem:[#allocation2 + $0x8] sm:$0xff] %v1132_v2  ;;  %1244 = vst [vmem:[#allocation2 + $0x18] sm:$0xff] %v1205_v3  ;;  %v1136_v8 = vadd.f32 %v1135_v7, %v4816_v53  ;;  %v1209_v9 = vadd.f32 %v1208_v42, %v4819_v51 }
 0x297   : > { %1245 = vst [vmem:[#allocation2 + $0x20] sm:$0xff] %v1134_v6  ;;  %1247 = vst [vmem:[#allocation2 + $0x30] sm:$0xff] %v1207_v57 }
 0x298   : > { %1246 = vst [vmem:[#allocation2 + $0x28] sm:$0xff] %v1136_v8  ;;  %1248 = vst [vmem:[#allocation2 + $0x38] sm:$0xff] %v1209_v9 }
 0x29a   : > { %v1139_v10 = vpop.f32.mrb[4].mxu0  ;;  %v1212_v11 = vpop.f32.mrb[4].mxu1 }
 0x29b   : > { %v1140_v12 = vadd.f32 %v1139_v10, %v4810_v50  ;;  %v1213_v13 = vadd.f32 %v1212_v11, %v4813_v48  ;;  %v1141_v14 = vpop.f32.mrb[5].mxu0  ;;  %v1214_v15 = vpop.f32.mrb[5].mxu1 }
 0x29c   : > { %v1142_v16 = vadd.f32 %v1141_v14, %v4816_v53  ;;  %v1215_v17 = vadd.f32 %v1214_v15, %v4819_v51  ;;  %v1143_v18 = vpop.f32.mrb[6].mxu0  ;;  %v1216_v19 = vpop.f32.mrb[6].mxu1 }
 0x29d   : > { %1249 = vst [vmem:[#allocation2 + $0x40] sm:$0xff] %v1140_v12  ;;  %1251 = vst [vmem:[#allocation2 + $0x50] sm:$0xff] %v1213_v13  ;;  %v1144_v20 = vadd.f32 %v1143_v18, %v4810_v50  ;;  %v1217_v21 = vadd.f32 %v1216_v19, %v4813_v48  ;;  %v1145_v22 = vpop.f32.mrb[7].mxu0  ;;  %v1218_v23 = vpop.f32.mrb[7].mxu1 }
 0x29e   : > { %1250 = vst [vmem:[#allocation2 + $0x48] sm:$0xff] %v1142_v16  ;;  %1252 = vst [vmem:[#allocation2 + $0x58] sm:$0xff] %v1215_v17  ;;  %v1146_v24 = vadd.f32 %v1145_v22, %v4816_v53  ;;  %v1219_v26 = vadd.f32 %v1218_v23, %v4819_v51 }
 0x29f   : > { %1253 = vst [vmem:[#allocation2 + $0x60] sm:$0xff] %v1144_v20  ;;  %1255 = vst [vmem:[#allocation2 + $0x70] sm:$0xff] %v1217_v21 }
 0x2a0   : > { %1254 = vst [vmem:[#allocation2 + $0x68] sm:$0xff] %v1146_v24  ;;  %1256 = vst [vmem:[#allocation2 + $0x78] sm:$0xff] %v1219_v26 }
 0x2a2   : > { %v1149_v25 = vpop.f32.mrb[8].mxu0  ;;  %v1222_v27 = vpop.f32.mrb[8].mxu1 }
 0x2a3   : > { %v1150_v63 = vadd.f32 %v1149_v25, %v4810_v50  ;;  %v1223_v49 = vadd.f32 %v1222_v27, %v4813_v48  ;;  %v1151_v28 = vpop.f32.mrb[9].mxu0  ;;  %v1224_v29 = vpop.f32.mrb[9].mxu1 }
 0x2a4   : > { %v1152_v30 = vadd.f32 %v1151_v28, %v4816_v53  ;;  %v1225_v31 = vadd.f32 %v1224_v29, %v4819_v51  ;;  %v1153_v43 = vpop.f32.mrb[10].mxu0  ;;  %v1226_v52 = vpop.f32.mrb[10].mxu1 }
 0x2a5   : > { %1257 = vst [vmem:[#allocation2 + $0x80] sm:$0xff] %v1150_v63  ;;  %1259 = vst [vmem:[#allocation2 + $0x90] sm:$0xff] %v1223_v49  ;;  %v1154_v47 = vadd.f32 %v1153_v43, %v4810_v50  ;;  %v1227_v62 = vadd.f32 %v1226_v52, %v4813_v48  ;;  %v1155_v56 = vpop.f32.mrb[11].mxu0  ;;  %v1228_v46 = vpop.f32.mrb[11].mxu1 }
 0x2a6   : > { %1258 = vst [vmem:[#allocation2 + $0x88] sm:$0xff] %v1152_v30  ;;  %1260 = vst [vmem:[#allocation2 + $0x98] sm:$0xff] %v1225_v31  ;;  %v1156_v54 = vadd.f32 %v1155_v56, %v4816_v53  ;;  %v1229_v61 = vadd.f32 %v1228_v46, %v4819_v51 }
 0x2a7   : > { %1261 = vst [vmem:[#allocation2 + $0xa0] sm:$0xff] %v1154_v47  ;;  %1263 = vst [vmem:[#allocation2 + $0xb0] sm:$0xff] %v1227_v62 }
 0x2a8   : > { %1262 = vst [vmem:[#allocation2 + $0xa8] sm:$0xff] %v1156_v54  ;;  %1264 = vst [vmem:[#allocation2 + $0xb8] sm:$0xff] %v1229_v61 }
 0x2aa   : > { %v1159_v55 = vpop.f32.mrb[12].mxu0  ;;  %v1232_v58 = vpop.f32.mrb[12].mxu1 }
 0x2ab   : > { %v1160_v59 = vadd.f32 %v1159_v55, %v4810_v50  ;;  %v1233_v60 = vadd.f32 %v1232_v58, %v4813_v48  ;;  %v1161_v0 = vpop.f32.mrb[13].mxu0  ;;  %v1234_v1 = vpop.f32.mrb[13].mxu1 }
 0x2ac   : > { %v1162_v2 = vadd.f32 %v1161_v0, %v4816_v53  ;;  %v1235_v3 = vadd.f32 %v1234_v1, %v4819_v51  ;;  %v1163_v4 = vpop.f32.mrb[14].mxu0  ;;  %v1236_v5 = vpop.f32.mrb[14].mxu1 }
 0x2ad   : > { %1265 = vst [vmem:[#allocation2 + $0xc0] sm:$0xff] %v1160_v59  ;;  %1267 = vst [vmem:[#allocation2 + $0xd0] sm:$0xff] %v1233_v60  ;;  %v1164_v6 = vadd.f32 %v1163_v4, %v4810_v50  ;;  %v1237_v57 = vadd.f32 %v1236_v5, %v4813_v48  ;;  %v1165_v7 = vpop.f32.mrb[15].mxu0  ;;  %v1238_v42 = vpop.f32.mrb[15].mxu1 }
 0x2ae   : > { %1266 = vst [vmem:[#allocation2 + $0xc8] sm:$0xff] %v1162_v2  ;;  %1268 = vst [vmem:[#allocation2 + $0xd8] sm:$0xff] %v1235_v3  ;;  %v1166_v8 = vadd.f32 %v1165_v7, %v4816_v53  ;;  %v1239_v9 = vadd.f32 %v1238_v42, %v4819_v51 }
 0x2af   : > { %1269 = vst [vmem:[#allocation2 + $0xe0] sm:$0xff] %v1164_v6  ;;  %1271 = vst [vmem:[#allocation2 + $0xf0] sm:$0xff] %v1237_v57 }
 0x2b0   : > { %1270 = vst [vmem:[#allocation2 + $0xe8] sm:$0xff] %v1166_v8  ;;  %1272 = vst [vmem:[#allocation2 + $0xf8] sm:$0xff] %v1239_v9 }
 0x2b1 PF: > { %v4855_v10 = vpack.c.bf16 %v4390_v37, %v4378_v33  ;;  %v4859_v50 = vpack.c.bf16 %v4387_v36, %v4375_v32  ;;  %v4863_v48 = vpack.c.bf16 %v4414_v45, %v4402_v41  ;;  %v4868_v53 = vpack.c.bf16 %v4396_v39, %v4384_v35  ;;  %v5491_v33 = vld [vmem:[#allocation19_spill] sm:$0xff]  ;;  %v5492_v36 = vld [vmem:[#allocation21_spill] sm:$0xff]  ;;  %v5499_v13 = vld [vmem:[#allocation22_spill] sm:$0xff]  ;;  %p3102_p10 = scmp.ne.s32.totalorder %s4129_s9, 1 }
 0x2b2   : > { %v4872_v51 = vpack.c.bf16 %v4393_v38, %v4381_v34  ;;  %v4877_v32 = vpack.c.bf16 %v4411_v44, %v4399_v40  ;;  %v4881_v37 = vpack.c.bf16 %v5492_v36, %v5491_v33  ;;  %v5493_v41 = vld [vmem:[#allocation23_spill] sm:$0xff]  ;;  %v5495_v34 = vld [vmem:[#allocation18_spill] sm:$0xff]  ;;  %v5496_v38 = vld [vmem:[#allocation20_spill] sm:$0xff]  ;;  %v4059_v12 = vmov 0.0  }
 0x2b3   : > { %3150 = vmatprep.subr.bf16.mxu0 %v4855_v10  ;;  %v5494_v45 = vld [vmem:[#allocation27_spill] sm:$0xff]  ;;  %3182 = vmatprep.subr.bf16.mxu1 %v4868_v53  ;;  %v4892_v39 = vpack.c.bf16 %v5496_v38, %v5495_v34  ;;  %v5497_v40 = vld [vmem:[#allocation25_spill] sm:$0xff]  ;;  %v5500_v14 = vld [vmem:[#allocation26_spill] sm:$0xff] }
 0x2b4   : > { %3152 = vmatpush1.bf16.msra.mxu0 %v4859_v50  ;;  %v4886_v35 = vpack.c.bf16 %v5494_v45, %v5493_v41  ;;  %3184 = vmatpush1.bf16.msra.mxu1 %v4872_v51  ;;  %v5498_v44 = vld [vmem:[#allocation29_spill] sm:$0xff]  ;;  %v4903_v15 = vpack.c.bf16 %v5500_v14, %v5499_v13  ;;  %v5501_v16 = vld [vmem:[#allocation31_spill] sm:$0xff]  ;;  %v5503_v19 = vld [vmem:[#allocation24_spill] sm:$0xff] }
 0x2b5   : > { %3154 = vmatprep.subr.bf16.mxu0 %v4863_v48  ;;  %3186 = vmatprep.subr.bf16.mxu1 %v4881_v37  ;;  %v4897_v11 = vpack.c.bf16 %v5498_v44, %v5497_v40  ;;  %v5502_v17 = vld [vmem:[#allocation35_spill] sm:$0xff]  ;;  %v5504_v20 = vld [vmem:[#allocation28_spill] sm:$0xff]  ;;  %v5505_v22 = vld [vmem:[#allocation33_spill] sm:$0xff] }
 0x2b6   : > { %1344 = vmatprep.mubr.f32.mxu0 %v4059_v12  ;;  %v4908_v18 = vpack.c.bf16 %v5502_v17, %v5501_v16  ;;  %1415 = vmatprep.mubr.f32.mxu1 %v4059_v12  ;;  %v4914_v21 = vpack.c.bf16 %v5504_v20, %v5503_v19  ;;  %v5506_v23 = vld [vmem:[#allocation37_spill] sm:$0xff]  ;;  %v5507_v26 = vld [vmem:[#allocation30_spill] sm:$0xff]  ;;  %v5509_v63 = vld [vmem:[#allocation39_spill] sm:$0xff] }
 0x2b7   : > { %v4919_v24 = vpack.c.bf16 %v5506_v23, %v5505_v22  ;;  %v5508_v25 = vld [vmem:[#allocation34_spill] sm:$0xff]  ;;  %v5510_v49 = vld [vmem:[#allocation43_spill] sm:$0xff]  ;;  %v5511_v29 = vld [vmem:[#allocation32_spill] sm:$0xff] }
 0x2b8   : > { %3156 = vmatpush1.bf16.msra.mxu0 %v4877_v32  ;;  %3188 = vmatpush1.bf16.msra.mxu1 %v4892_v39  ;;  %v4924_v27 = vpack.c.bf16 %v5508_v25, %v5507_v26  ;;  %v4929_v28 = vpack.c.bf16 %v5510_v49, %v5509_v63  ;;  %v5512_v30 = vld [vmem:[#allocation36_spill] sm:$0xff]  ;;  %v5513_v43 = vld [vmem:[#allocation41_spill] sm:$0xff]  ;;  %v5515_v62 = vld [vmem:[#allocation38_spill] sm:$0xff] }
 0x2b9   : > { %3158 = vmatprep.subr.bf16.mxu0 %v4886_v35  ;;  %3190 = vmatprep.subr.bf16.mxu1 %v4897_v11  ;;  %v4934_v31 = vpack.c.bf16 %v5512_v30, %v5511_v29  ;;  %v5514_v52 = vld [vmem:[#allocation45_spill] sm:$0xff]  ;;  %v5516_v56 = vld [vmem:[#allocation42_spill] sm:$0xff]  ;;  %v5517_v54 = vld [vmem:[#allocation47_spill] sm:$0xff] }
 0x2ba   : > { %v4939_v47 = vpack.c.bf16 %v5514_v52, %v5513_v43  ;;  %v4944_v46 = vpack.c.bf16 %v5516_v56, %v5515_v62  ;;  %v5518_v61 = vld [vmem:[#allocation51_spill] sm:$0xff]  ;;  %v5519_v58 = vld [vmem:[#allocation40_spill] sm:$0xff]  ;;  %v5521_v0 = vld [vmem:[#allocation49_spill] sm:$0xff] }
 0x2bb   : > { %v4949_v55 = vpack.c.bf16 %v5518_v61, %v5517_v54  ;;  %v5520_v59 = vld [vmem:[#allocation44_spill] sm:$0xff]  ;;  %v5522_v1 = vld [vmem:[#allocation53_spill] sm:$0xff]  ;;  %v5523_v3 = vld [vmem:[#allocation46_spill] sm:$0xff] }
 0x2bc   : > { %3160 = vmatpush1.bf16.msra.mxu0 %v4903_v15  ;;  %3192 = vmatpush1.bf16.msra.mxu1 %v4914_v21  ;;  %v4954_v60 = vpack.c.bf16 %v5520_v59, %v5519_v58  ;;  %v4959_v2 = vpack.c.bf16 %v5522_v1, %v5521_v0  ;;  %v5524_v4 = vld [vmem:[#allocation50_spill] sm:$0xff]  ;;  %v5525_v6 = vld [vmem:[#allocation55_spill] sm:$0xff]  ;;  %v5527_v42 = vld [vmem:[#allocation48_spill] sm:$0xff] }
 0x2bd   : > { %3162 = vmatprep.subr.bf16.mxu0 %v4908_v18  ;;  %3194 = vmatprep.subr.bf16.mxu1 %v4919_v24  ;;  %v4964_v5 = vpack.c.bf16 %v5524_v4, %v5523_v3  ;;  %v5526_v57 = vld [vmem:[#allocation59_spill] sm:$0xff]  ;;  %v5528_v8 = vld [vmem:[#allocation52_spill] sm:$0xff]  ;;  %v5529_v33 = vld [vmem:[#allocation57_spill] sm:$0xff] }
 0x2be   : > { %v4969_v7 = vpack.c.bf16 %v5526_v57, %v5525_v6  ;;  %v4974_v9 = vpack.c.bf16 %v5528_v8, %v5527_v42  ;;  %v5530_v36 = vld [vmem:[#allocation61_spill] sm:$0xff]  ;;  %v5531_v45 = vld [vmem:[#allocation54_spill] sm:$0xff]  ;;  %v5533_v40 = vld [vmem:[#allocation63_spill] sm:$0xff] }
 0x2bf   : > { %v4979_v41 = vpack.c.bf16 %v5530_v36, %v5529_v33  ;;  %v5532_v34 = vld [vmem:[#allocation58_spill] sm:$0xff]  ;;  %v5534_v44 = vld [vmem:[#allocation67_spill] sm:$0xff]  ;;  %v5535_v14 = vld [vmem:[#allocation56_spill] sm:$0xff] }
 0x2c0   : > { %3164 = vmatpush1.bf16.msra.mxu0 %v4924_v27  ;;  %3196 = vmatpush1.bf16.msra.mxu1 %v4934_v31  ;;  %v4984_v38 = vpack.c.bf16 %v5532_v34, %v5531_v45  ;;  %v4989_v13 = vpack.c.bf16 %v5534_v44, %v5533_v40  ;;  %v5536_v16 = vld [vmem:[#allocation60_spill] sm:$0xff]  ;;  %v5537_v19 = vld [vmem:[#allocation65_spill] sm:$0xff]  ;;  %v5539_v23 = vld [vmem:[#allocation62_spill] sm:$0xff] }
 0x2c1   : > { %3166 = vmatprep.subr.bf16.mxu0 %v4929_v28  ;;  %3198 = vmatprep.subr.bf16.mxu1 %v4939_v47  ;;  %v4994_v17 = vpack.c.bf16 %v5536_v16, %v5535_v14  ;;  %v5538_v20 = vld [vmem:[#allocation69_spill] sm:$0xff]  ;;  %v5540_v26 = vld [vmem:[#allocation66_spill] sm:$0xff]  ;;  %v5541_v63 = vld [vmem:[#allocation64_spill] sm:$0xff] }
 0x2c2   : > { %v4999_v22 = vpack.c.bf16 %v5538_v20, %v5537_v19  ;;  %v5004_v25 = vpack.c.bf16 %v5540_v26, %v5539_v23  ;;  %v5542_v49 = vld [vmem:[#allocation68_spill] sm:$0xff]  ;;  %v5543_v30 = vld [vmem:[#allocation70_spill] sm:$0xff]  ;;  %v1277_v52 = vld [vmem:[#allocation2 + $0x8] sm:$0xff] }
 0x2c3   : > { %v5010_v29 = vpack.c.bf16 %v5542_v49, %v5541_v63  ;;  %v1276_v43 = vld [vmem:[#allocation2] sm:$0xff]  ;;  %v1278_v3 = vld [vmem:[#allocation2 + $0x10] sm:$0xff]  ;;  %v1279_v6 = vld [vmem:[#allocation2 + $0x18] sm:$0xff] }
 0x2c4   : > { %3168 = vmatpush1.bf16.msra.mxu0 %v4944_v46  ;;  %3200 = vmatpush1.bf16.msra.mxu1 %v4954_v60  ;;  %v5544_v20 = vld [vmem:[#allocation71_spill] sm:$0xff] }
 0x2c5   : > { %3170 = vmatprep.subr.bf16.mxu0 %v4949_v55  ;;  %3202 = vmatprep.subr.bf16.mxu1 %v4959_v2 }
 0x2c8   : > { %3172 = vmatpush1.bf16.msra.mxu0 %v4964_v5  ;;  %3204 = vmatpush1.bf16.msra.mxu1 %v4974_v9 }
 0x2c9   : > { %3174 = vmatprep.subr.bf16.mxu0 %v4969_v7  ;;  %3206 = vmatprep.subr.bf16.mxu1 %v4979_v41 }
 0x2cc   : > { %3176 = vmatpush1.bf16.msra.mxu0 %v4984_v38  ;;  %3208 = vmatpush1.bf16.msra.mxu1 %v4994_v17 }
 0x2cd   : > { %3178 = vmatprep.subr.bf16.mxu0 %v4989_v13  ;;  %3210 = vmatprep.subr.bf16.mxu1 %v4999_v22 }
 0x2d0   : > { %3180 = vmatpush1.bf16.msra.mxu0 %v5004_v25  ;;  %3212 = vmatpush1.bf16.msra.mxu1 %v5010_v29 }
 0x2d3   : > { %1345 = vmatmul.mubr.f32.vlgmr.msra.gmra.mrb[0].mxu0 %v5543_v30  ;;  %1416 = vmatmul.mubr.f32.vlgmr.msra.gmra.mrb[0].mxu1 %v5543_v30 }
 0x3a6   : > { %v1346_v62 = vpop.f32.mrb[0].mxu0  ;;  %v1417_v58 = vpop.f32.mrb[0].mxu1 }
 0x3a7   : > { %v1422_v56 = vadd.f32 %v1346_v62, %v1276_v43  ;;  %v1348_v54 = vpop.f32.mrb[1].mxu0  ;;  %v1419_v0 = vpop.f32.mrb[1].mxu1  ;;  %v1424_v4 = vadd.f32 %v1417_v58, %v1278_v3 }
 0x3a8   : > { %v1423_v61 = vadd.f32 %v1348_v54, %v1277_v52  ;;  %v1425_v42 = vadd.f32 %v1419_v0, %v1279_v6 }
 0x3a9   : > { %v3099_v59 = vmul.f32 -1.442695, %v1422_v56  ;;  %v3101_v57 = vmul.f32 -1.442695, %v1424_v4 }
 0x3aa   : > { %v3100_v1 = vmul.f32 -1.442695, %v1423_v61 }
 0x3ab   : > { %3733 = vpow2.f32 %v3099_v59 }
 0x3ac   : > { %3735 = vpow2.f32 %v3100_v1 }
 0x3ad   : > { %3737 = vpow2.f32 %v3101_v57 }
 0x3ae   : > { %3739 = vtanh.f32 %v1425_v42 }
 0x3b5   : > { %v3734_v8 = vpop.eup %3733 }
 0x3b6   : > { %v3736_v33 = vpop.eup %3735  ;;  %v1435_v36 = vadd.f32 1.0, %v3734_v8 }
 0x3b7   : > { %v1436_v45 = vadd.f32 1.0, %v3736_v33  ;;  %v3738_v34 = vpop.eup %3737 }
 0x3b8   : > { %3741 = vrcp.f32 %v1435_v36  ;;  %v3740_v40 = vpop.eup %3739  ;;  %v1437_v14 = vadd.f32 1.0, %v3738_v34 }
 0x3b9   : > { %3743 = vrcp.f32 %v1436_v45 }
 0x3ba   : > { %3745 = vrcp.f32 %v1437_v14 }
 0x3c2   : > { %v3742_v44 = vpop.eup %3741 }
 0x3c3   : > { %v3744_v16 = vpop.eup %3743  ;;  %v1446_v19 = vmul.f32 %v3742_v44, %v3740_v40 }
 0x3c4   : > { %v1445_v23 = vmul.f32 %v3744_v16, %v5544_v20  ;;  %v3746_v63 = vpop.eup %3745 }
 0x3c6   : > { %v5018_v26 = vadd.f32 %v1446_v19, %v1445_v23 }
 0x3c8   : > { %3747 = vtanh.f32 %v5018_v26 }
 0x3cd   : > { %1453 = sbr.rel (%p3102_p10) target bundleno = 982 (0x3d6), region = 64 }
 0x3d2   : > { %v3748_v49 = vpop.eup %3747 }
 0x3d3   : > { %v1449_v30 = vmul.f32 %v3748_v49, %v3746_v63 }
 0x3d5   : > { %1455 = vst [vmem:[#allocation9] sm:$0xff] %v1449_v30 }
 0x3d6 PF: > { %p3103_p5 = scmp.ge.s32.totalorder %s4129_s9, 1 }
 0x3d7   : > { %1460 = vst [vmem:[#allocation3] sm:$0xff] (!%p3103_p5), %v1449_v30 }
 0x3d8   : > { %1458 = sbr.rel (%p3103_p5) target bundleno = 991 (0x3df), region = 68 }
 0x3df PF: > { %3214 = vmatprep.subr.bf16.mxu0 %v4855_v10  ;;  %3246 = vmatprep.subr.bf16.mxu1 %v4868_v53  ;;  %v1464_v43 = vld [vmem:[#allocation2 + $0x20] sm:$0xff]  ;;  %v1465_v52 = vld [vmem:[#allocation2 + $0x28] sm:$0xff]  ;;  %v1466_v3 = vld [vmem:[#allocation2 + $0x30] sm:$0xff] }
 0x3e0   : > { %3216 = vmatpush1.bf16.msra.mxu0 %v4859_v50  ;;  %3248 = vmatpush1.bf16.msra.mxu1 %v4872_v51  ;;  %v1467_v6 = vld [vmem:[#allocation2 + $0x38] sm:$0xff] }
 0x3e1   : > { %3218 = vmatprep.subr.bf16.mxu0 %v4863_v48  ;;  %3250 = vmatprep.subr.bf16.mxu1 %v4881_v37 }
 0x3e2   : > { %1532 = vmatprep.mubr.f32.mxu0 %v4059_v12  ;;  %1603 = vmatprep.mubr.f32.mxu1 %v4059_v12 }
 0x3e4   : > { %3220 = vmatpush1.bf16.msra.mxu0 %v4877_v32  ;;  %3252 = vmatpush1.bf16.msra.mxu1 %v4892_v39 }
 0x3e5   : > { %3222 = vmatprep.subr.bf16.mxu0 %v4886_v35  ;;  %3254 = vmatprep.subr.bf16.mxu1 %v4897_v11 }
 0x3e8   : > { %3224 = vmatpush1.bf16.msra.mxu0 %v4903_v15  ;;  %3256 = vmatpush1.bf16.msra.mxu1 %v4914_v21 }
 0x3e9   : > { %3226 = vmatprep.subr.bf16.mxu0 %v4908_v18  ;;  %3258 = vmatprep.subr.bf16.mxu1 %v4919_v24 }
 0x3ec   : > { %3228 = vmatpush1.bf16.msra.mxu0 %v4924_v27  ;;  %3260 = vmatpush1.bf16.msra.mxu1 %v4934_v31 }
 0x3ed   : > { %3230 = vmatprep.subr.bf16.mxu0 %v4929_v28  ;;  %3262 = vmatprep.subr.bf16.mxu1 %v4939_v47 }
 0x3f0   : > { %3232 = vmatpush1.bf16.msra.mxu0 %v4944_v46  ;;  %3264 = vmatpush1.bf16.msra.mxu1 %v4954_v60 }
 0x3f1   : > { %3234 = vmatprep.subr.bf16.mxu0 %v4949_v55  ;;  %3266 = vmatprep.subr.bf16.mxu1 %v4959_v2 }
 0x3f4   : > { %3236 = vmatpush1.bf16.msra.mxu0 %v4964_v5  ;;  %3268 = vmatpush1.bf16.msra.mxu1 %v4974_v9 }
 0x3f5   : > { %3238 = vmatprep.subr.bf16.mxu0 %v4969_v7  ;;  %3270 = vmatprep.subr.bf16.mxu1 %v4979_v41 }
 0x3f8   : > { %3240 = vmatpush1.bf16.msra.mxu0 %v4984_v38  ;;  %3272 = vmatpush1.bf16.msra.mxu1 %v4994_v17 }
 0x3f9   : > { %3242 = vmatprep.subr.bf16.mxu0 %v4989_v13  ;;  %3274 = vmatprep.subr.bf16.mxu1 %v4999_v22 }
 0x3fc   : > { %3244 = vmatpush1.bf16.msra.mxu0 %v5004_v25  ;;  %3276 = vmatpush1.bf16.msra.mxu1 %v5010_v29 }
 0x3ff   : > { %1533 = vmatmul.mubr.f32.vlgmr.msra.gmra.mrb[2].mxu0 %v1449_v30  ;;  %1604 = vmatmul.mubr.f32.vlgmr.msra.gmra.mrb[2].mxu1 %v1449_v30 }
 0x4d2   : > { %v1534_v62 = vpop.f32.mrb[2].mxu0  ;;  %v1605_v56 = vpop.f32.mrb[2].mxu1 }
 0x4d3   : > { %v1610_v54 = vadd.f32 %v1534_v62, %v1464_v43  ;;  %v1536_v61 = vpop.f32.mrb[3].mxu0  ;;  %v1607_v58 = vpop.f32.mrb[3].mxu1  ;;  %v1612_v4 = vadd.f32 %v1605_v56, %v1466_v3 }
 0x4d4   : > { %v1611_v59 = vadd.f32 %v1536_v61, %v1465_v52  ;;  %v1613_v42 = vadd.f32 %v1607_v58, %v1467_v6 }
 0x4d5   : > { %v3104_v0 = vmul.f32 -1.442695, %v1610_v54  ;;  %v3106_v57 = vmul.f32 -1.442695, %v1612_v4 }
 0x4d6   : > { %v3105_v1 = vmul.f32 -1.442695, %v1611_v59 }
 0x4d7   : > { %3749 = vpow2.f32 %v3104_v0 }
 0x4d8   : > { %3751 = vpow2.f32 %v3105_v1 }
 0x4d9   : > { %3753 = vpow2.f32 %v3106_v57 }
 0x4da   : > { %3755 = vtanh.f32 %v1613_v42 }
 0x4e1   : > { %v3750_v8 = vpop.eup %3749 }
 0x4e2   : > { %v3752_v33 = vpop.eup %3751  ;;  %v1623_v36 = vadd.f32 1.0, %v3750_v8 }
 0x4e3   : > { %v1624_v45 = vadd.f32 1.0, %v3752_v33  ;;  %v3754_v34 = vpop.eup %3753 }
 0x4e4   : > { %3757 = vrcp.f32 %v1623_v36  ;;  %v3756_v40 = vpop.eup %3755  ;;  %v1625_v14 = vadd.f32 1.0, %v3754_v34 }
 0x4e5   : > { %3759 = vrcp.f32 %v1624_v45 }
 0x4e6   : > { %3761 = vrcp.f32 %v1625_v14 }
 0x4ee   : > { %v3758_v44 = vpop.eup %3757 }
 0x4ef   : > { %v3760_v16 = vpop.eup %3759  ;;  %v1634_v19 = vmul.f32 %v3758_v44, %v3756_v40 }
 0x4f0   : > { %v1633_v20 = vmul.f32 %v3760_v16, %v5018_v26  ;;  %v3762_v63 = vpop.eup %3761 }
 0x4f2   : > { %v5062_v23 = vadd.f32 %v1634_v19, %v1633_v20 }
 0x4f4   : > { %3763 = vtanh.f32 %v5062_v23 }
 0x4f9   : > { %1641 = sbr.rel (%p3102_p10) target bundleno = 1282 (0x502), region = 72 }
 0x4fe   : > { %v3764_v49 = vpop.eup %3763 }
 0x4ff   : > { %v1637_v30 = vmul.f32 %v3764_v49, %v3762_v63 }
 0x501   : > { %1643 = vst [vmem:[#allocation9 + $0x8] sm:$0xff] %v1637_v30 }
 0x502 PF: > { %1646 = sbr.rel (%p3103_p5) target bundleno = 1289 (0x509), region = 76  ;;  %1648 = vst [vmem:[#allocation3 + $0x8] sm:$0xff] (!%p3103_p5), %v1637_v30 }
 0x509 PF: > { %3278 = vmatprep.subr.bf16.mxu0 %v4855_v10  ;;  %3310 = vmatprep.subr.bf16.mxu1 %v4868_v53  ;;  %v1652_v26 = vld [vmem:[#allocation2 + $0x40] sm:$0xff]  ;;  %v1653_v43 = vld [vmem:[#allocation2 + $0x48] sm:$0xff]  ;;  %v1654_v1 = vld [vmem:[#allocation2 + $0x50] sm:$0xff] }
 0x50a   : > { %3280 = vmatpush1.bf16.msra.mxu0 %v4859_v50  ;;  %3312 = vmatpush1.bf16.msra.mxu1 %v4872_v51  ;;  %v1655_v4 = vld [vmem:[#allocation2 + $0x58] sm:$0xff] }
 0x50b   : > { %3282 = vmatprep.subr.bf16.mxu0 %v4863_v48  ;;  %3314 = vmatprep.subr.bf16.mxu1 %v4881_v37 }
 0x50c   : > { %1720 = vmatprep.mubr.f32.mxu0 %v4059_v12  ;;  %1791 = vmatprep.mubr.f32.mxu1 %v4059_v12 }
 0x50e   : > { %3284 = vmatpush1.bf16.msra.mxu0 %v4877_v32  ;;  %3316 = vmatpush1.bf16.msra.mxu1 %v4892_v39 }
 0x50f   : > { %3286 = vmatprep.subr.bf16.mxu0 %v4886_v35  ;;  %3318 = vmatprep.subr.bf16.mxu1 %v4897_v11 }
 0x512   : > { %3288 = vmatpush1.bf16.msra.mxu0 %v4903_v15  ;;  %3320 = vmatpush1.bf16.msra.mxu1 %v4914_v21 }
 0x513   : > { %3290 = vmatprep.subr.bf16.mxu0 %v4908_v18  ;;  %3322 = vmatprep.subr.bf16.mxu1 %v4919_v24 }
 0x516   : > { %3292 = vmatpush1.bf16.msra.mxu0 %v4924_v27  ;;  %3324 = vmatpush1.bf16.msra.mxu1 %v4934_v31 }
 0x517   : > { %3294 = vmatprep.subr.bf16.mxu0 %v4929_v28  ;;  %3326 = vmatprep.subr.bf16.mxu1 %v4939_v47 }
 0x51a   : > { %3296 = vmatpush1.bf16.msra.mxu0 %v4944_v46  ;;  %3328 = vmatpush1.bf16.msra.mxu1 %v4954_v60 }
 0x51b   : > { %3298 = vmatprep.subr.bf16.mxu0 %v4949_v55  ;;  %3330 = vmatprep.subr.bf16.mxu1 %v4959_v2 }
 0x51e   : > { %3300 = vmatpush1.bf16.msra.mxu0 %v4964_v5  ;;  %3332 = vmatpush1.bf16.msra.mxu1 %v4974_v9 }
 0x51f   : > { %3302 = vmatprep.subr.bf16.mxu0 %v4969_v7  ;;  %3334 = vmatprep.subr.bf16.mxu1 %v4979_v41 }
 0x522   : > { %3304 = vmatpush1.bf16.msra.mxu0 %v4984_v38  ;;  %3336 = vmatpush1.bf16.msra.mxu1 %v4994_v17 }
 0x523   : > { %3306 = vmatprep.subr.bf16.mxu0 %v4989_v13  ;;  %3338 = vmatprep.subr.bf16.mxu1 %v4999_v22 }
 0x526   : > { %3308 = vmatpush1.bf16.msra.mxu0 %v5004_v25  ;;  %3340 = vmatpush1.bf16.msra.mxu1 %v5010_v29 }
 0x529   : > { %1721 = vmatmul.mubr.f32.vlgmr.msra.gmra.mrb[4].mxu0 %v1637_v30  ;;  %1792 = vmatmul.mubr.f32.vlgmr.msra.gmra.mrb[4].mxu1 %v1637_v30 }
 0x5fc   : > { %v1722_v52 = vpop.f32.mrb[4].mxu0  ;;  %v1793_v62 = vpop.f32.mrb[4].mxu1 }
 0x5fd   : > { %v1798_v56 = vadd.f32 %v1722_v52, %v1652_v26  ;;  %v1724_v54 = vpop.f32.mrb[5].mxu0  ;;  %v1795_v61 = vpop.f32.mrb[5].mxu1  ;;  %v1800_v3 = vadd.f32 %v1793_v62, %v1654_v1 }
 0x5fe   : > { %v1799_v58 = vadd.f32 %v1724_v54, %v1653_v43  ;;  %v1801_v57 = vadd.f32 %v1795_v61, %v1655_v4 }
 0x5ff   : > { %v3109_v59 = vmul.f32 -1.442695, %v1798_v56  ;;  %v3111_v6 = vmul.f32 -1.442695, %v1800_v3 }
 0x600   : > { %v3110_v0 = vmul.f32 -1.442695, %v1799_v58 }
 0x601   : > { %3765 = vpow2.f32 %v3109_v59 }
 0x602   : > { %3767 = vpow2.f32 %v3110_v0 }
 0x603   : > { %3769 = vpow2.f32 %v3111_v6 }
 0x604   : > { %3771 = vtanh.f32 %v1801_v57 }
 0x60b   : > { %v3766_v42 = vpop.eup %3765 }
 0x60c   : > { %v3768_v8 = vpop.eup %3767  ;;  %v1811_v33 = vadd.f32 1.0, %v3766_v42 }
 0x60d   : > { %v1812_v36 = vadd.f32 1.0, %v3768_v8  ;;  %v3770_v45 = vpop.eup %3769 }
 0x60e   : > { %3773 = vrcp.f32 %v1811_v33  ;;  %v3772_v34 = vpop.eup %3771  ;;  %v1813_v44 = vadd.f32 1.0, %v3770_v45 }
 0x60f   : > { %3775 = vrcp.f32 %v1812_v36 }
 0x610   : > { %3777 = vrcp.f32 %v1813_v44 }
 0x618   : > { %v3774_v40 = vpop.eup %3773 }
 0x619   : > { %v3776_v14 = vpop.eup %3775  ;;  %v1822_v16 = vmul.f32 %v3774_v40, %v3772_v34 }
 0x61a   : > { %v1821_v19 = vmul.f32 %v3776_v14, %v5062_v23  ;;  %v3778_v63 = vpop.eup %3777 }
 0x61c   : > { %v5104_v20 = vadd.f32 %v1822_v16, %v1821_v19 }
 0x61e   : > { %3779 = vtanh.f32 %v5104_v20 }
 0x623   : > { %1829 = sbr.rel (%p3102_p10) target bundleno = 1580 (0x62c), region = 80 }
 0x628   : > { %v3780_v49 = vpop.eup %3779 }
 0x629   : > { %v1825_v30 = vmul.f32 %v3780_v49, %v3778_v63 }
 0x62b   : > { %1831 = vst [vmem:[#allocation9 + $0x10] sm:$0xff] %v1825_v30 }
 0x62c PF: > { %1834 = sbr.rel (%p3103_p5) target bundleno = 1587 (0x633), region = 84  ;;  %1836 = vst [vmem:[#allocation3 + $0x10] sm:$0xff] (!%p3103_p5), %v1825_v30 }
 0x633 PF: > { %3342 = vmatprep.subr.bf16.mxu0 %v4855_v10  ;;  %3374 = vmatprep.subr.bf16.mxu1 %v4868_v53  ;;  %v1840_v23 = vld [vmem:[#allocation2 + $0x60] sm:$0xff]  ;;  %v1841_v26 = vld [vmem:[#allocation2 + $0x68] sm:$0xff]  ;;  %v1842_v0 = vld [vmem:[#allocation2 + $0x70] sm:$0xff] }
 0x634   : > { %3344 = vmatpush1.bf16.msra.mxu0 %v4859_v50  ;;  %3376 = vmatpush1.bf16.msra.mxu1 %v4872_v51  ;;  %v1843_v3 = vld [vmem:[#allocation2 + $0x78] sm:$0xff] }
 0x635   : > { %3346 = vmatprep.subr.bf16.mxu0 %v4863_v48  ;;  %3378 = vmatprep.subr.bf16.mxu1 %v4881_v37 }
 0x636   : > { %1908 = vmatprep.mubr.f32.mxu0 %v4059_v12  ;;  %1979 = vmatprep.mubr.f32.mxu1 %v4059_v12 }
 0x638   : > { %3348 = vmatpush1.bf16.msra.mxu0 %v4877_v32  ;;  %3380 = vmatpush1.bf16.msra.mxu1 %v4892_v39 }
 0x639   : > { %3350 = vmatprep.subr.bf16.mxu0 %v4886_v35  ;;  %3382 = vmatprep.subr.bf16.mxu1 %v4897_v11 }
 0x63c   : > { %3352 = vmatpush1.bf16.msra.mxu0 %v4903_v15  ;;  %3384 = vmatpush1.bf16.msra.mxu1 %v4914_v21 }
 0x63d   : > { %3354 = vmatprep.subr.bf16.mxu0 %v4908_v18  ;;  %3386 = vmatprep.subr.bf16.mxu1 %v4919_v24 }
 0x640   : > { %3356 = vmatpush1.bf16.msra.mxu0 %v4924_v27  ;;  %3388 = vmatpush1.bf16.msra.mxu1 %v4934_v31 }
 0x641   : > { %3358 = vmatprep.subr.bf16.mxu0 %v4929_v28  ;;  %3390 = vmatprep.subr.bf16.mxu1 %v4939_v47 }
 0x644   : > { %3360 = vmatpush1.bf16.msra.mxu0 %v4944_v46  ;;  %3392 = vmatpush1.bf16.msra.mxu1 %v4954_v60 }
 0x645   : > { %3362 = vmatprep.subr.bf16.mxu0 %v4949_v55  ;;  %3394 = vmatprep.subr.bf16.mxu1 %v4959_v2 }
 0x648   : > { %3364 = vmatpush1.bf16.msra.mxu0 %v4964_v5  ;;  %3396 = vmatpush1.bf16.msra.mxu1 %v4974_v9 }
 0x649   : > { %3366 = vmatprep.subr.bf16.mxu0 %v4969_v7  ;;  %3398 = vmatprep.subr.bf16.mxu1 %v4979_v41 }
 0x64c   : > { %3368 = vmatpush1.bf16.msra.mxu0 %v4984_v38  ;;  %3400 = vmatpush1.bf16.msra.mxu1 %v4994_v17 }
 0x64d   : > { %3370 = vmatprep.subr.bf16.mxu0 %v4989_v13  ;;  %3402 = vmatprep.subr.bf16.mxu1 %v4999_v22 }
 0x650   : > { %3372 = vmatpush1.bf16.msra.mxu0 %v5004_v25  ;;  %3404 = vmatpush1.bf16.msra.mxu1 %v5010_v29 }
 0x653   : > { %1909 = vmatmul.mubr.f32.vlgmr.msra.gmra.mrb[6].mxu0 %v1825_v30  ;;  %1980 = vmatmul.mubr.f32.vlgmr.msra.gmra.mrb[6].mxu1 %v1825_v30 }
 0x726   : > { %v1910_v43 = vpop.f32.mrb[6].mxu0  ;;  %v1981_v52 = vpop.f32.mrb[6].mxu1 }
 0x727   : > { %v1986_v62 = vadd.f32 %v1910_v43, %v1840_v23  ;;  %v1912_v56 = vpop.f32.mrb[7].mxu0  ;;  %v1983_v54 = vpop.f32.mrb[7].mxu1  ;;  %v1988_v1 = vadd.f32 %v1981_v52, %v1842_v0 }
 0x728   : > { %v1987_v61 = vadd.f32 %v1912_v56, %v1841_v26  ;;  %v1989_v6 = vadd.f32 %v1983_v54, %v1843_v3 }
 0x729   : > { %v3114_v58 = vmul.f32 -1.442695, %v1986_v62  ;;  %v3116_v4 = vmul.f32 -1.442695, %v1988_v1 }
 0x72a   : > { %v3115_v59 = vmul.f32 -1.442695, %v1987_v61 }
 0x72b   : > { %3781 = vpow2.f32 %v3114_v58 }
 0x72c   : > { %3783 = vpow2.f32 %v3115_v59 }
 0x72d   : > { %3785 = vpow2.f32 %v3116_v4 }
 0x72e   : > { %3787 = vtanh.f32 %v1989_v6 }
 0x735   : > { %v3782_v57 = vpop.eup %3781 }
 0x736   : > { %v3784_v42 = vpop.eup %3783  ;;  %v1999_v8 = vadd.f32 1.0, %v3782_v57 }
 0x737   : > { %v2000_v33 = vadd.f32 1.0, %v3784_v42  ;;  %v3786_v36 = vpop.eup %3785 }
 0x738   : > { %3789 = vrcp.f32 %v1999_v8  ;;  %v3788_v45 = vpop.eup %3787  ;;  %v2001_v40 = vadd.f32 1.0, %v3786_v36 }
 0x739   : > { %3791 = vrcp.f32 %v2000_v33 }
 0x73a   : > { %3793 = vrcp.f32 %v2001_v40 }
 0x742   : > { %v3790_v34 = vpop.eup %3789 }
 0x743   : > { %v3792_v44 = vpop.eup %3791  ;;  %v2010_v14 = vmul.f32 %v3790_v34, %v3788_v45 }
 0x744   : > { %v2009_v16 = vmul.f32 %v3792_v44, %v5104_v20  ;;  %v3794_v63 = vpop.eup %3793 }
 0x746   : > { %v5146_v19 = vadd.f32 %v2010_v14, %v2009_v16 }
 0x748   : > { %3795 = vtanh.f32 %v5146_v19 }
 0x74d   : > { %2017 = sbr.rel (%p3102_p10) target bundleno = 1878 (0x756), region = 88 }
 0x752   : > { %v3796_v49 = vpop.eup %3795 }
 0x753   : > { %v2013_v30 = vmul.f32 %v3796_v49, %v3794_v63 }
 0x755   : > { %2019 = vst [vmem:[#allocation9 + $0x18] sm:$0xff] %v2013_v30 }
 0x756 PF: > { %2022 = sbr.rel (%p3103_p5) target bundleno = 1885 (0x75d), region = 92  ;;  %2024 = vst [vmem:[#allocation3 + $0x18] sm:$0xff] (!%p3103_p5), %v2013_v30 }
 0x75d PF: > { %3406 = vmatprep.subr.bf16.mxu0 %v4855_v10  ;;  %3438 = vmatprep.subr.bf16.mxu1 %v4868_v53  ;;  %v2028_v20 = vld [vmem:[#allocation2 + $0x80] sm:$0xff]  ;;  %v2029_v23 = vld [vmem:[#allocation2 + $0x88] sm:$0xff]  ;;  %v2030_v59 = vld [vmem:[#allocation2 + $0x90] sm:$0xff] }
 0x75e   : > { %3408 = vmatpush1.bf16.msra.mxu0 %v4859_v50  ;;  %3440 = vmatpush1.bf16.msra.mxu1 %v4872_v51  ;;  %v2031_v1 = vld [vmem:[#allocation2 + $0x98] sm:$0xff] }
 0x75f   : > { %3410 = vmatprep.subr.bf16.mxu0 %v4863_v48  ;;  %3442 = vmatprep.subr.bf16.mxu1 %v4881_v37 }
 0x760   : > { %2096 = vmatprep.mubr.f32.mxu0 %v4059_v12  ;;  %2167 = vmatprep.mubr.f32.mxu1 %v4059_v12 }
 0x762   : > { %3412 = vmatpush1.bf16.msra.mxu0 %v4877_v32  ;;  %3444 = vmatpush1.bf16.msra.mxu1 %v4892_v39 }
 0x763   : > { %3414 = vmatprep.subr.bf16.mxu0 %v4886_v35  ;;  %3446 = vmatprep.subr.bf16.mxu1 %v4897_v11 }
 0x766   : > { %3416 = vmatpush1.bf16.msra.mxu0 %v4903_v15  ;;  %3448 = vmatpush1.bf16.msra.mxu1 %v4914_v21 }
 0x767   : > { %3418 = vmatprep.subr.bf16.mxu0 %v4908_v18  ;;  %3450 = vmatprep.subr.bf16.mxu1 %v4919_v24 }
 0x76a   : > { %3420 = vmatpush1.bf16.msra.mxu0 %v4924_v27  ;;  %3452 = vmatpush1.bf16.msra.mxu1 %v4934_v31 }
 0x76b   : > { %3422 = vmatprep.subr.bf16.mxu0 %v4929_v28  ;;  %3454 = vmatprep.subr.bf16.mxu1 %v4939_v47 }
 0x76e   : > { %3424 = vmatpush1.bf16.msra.mxu0 %v4944_v46  ;;  %3456 = vmatpush1.bf16.msra.mxu1 %v4954_v60 }
 0x76f   : > { %3426 = vmatprep.subr.bf16.mxu0 %v4949_v55  ;;  %3458 = vmatprep.subr.bf16.mxu1 %v4959_v2 }
 0x772   : > { %3428 = vmatpush1.bf16.msra.mxu0 %v4964_v5  ;;  %3460 = vmatpush1.bf16.msra.mxu1 %v4974_v9 }
 0x773   : > { %3430 = vmatprep.subr.bf16.mxu0 %v4969_v7  ;;  %3462 = vmatprep.subr.bf16.mxu1 %v4979_v41 }
 0x776   : > { %3432 = vmatpush1.bf16.msra.mxu0 %v4984_v38  ;;  %3464 = vmatpush1.bf16.msra.mxu1 %v4994_v17 }
 0x777   : > { %3434 = vmatprep.subr.bf16.mxu0 %v4989_v13  ;;  %3466 = vmatprep.subr.bf16.mxu1 %v4999_v22 }
 0x77a   : > { %3436 = vmatpush1.bf16.msra.mxu0 %v5004_v25  ;;  %3468 = vmatpush1.bf16.msra.mxu1 %v5010_v29 }
 0x77d   : > { %2097 = vmatmul.mubr.f32.vlgmr.msra.gmra.mrb[8].mxu0 %v2013_v30  ;;  %2168 = vmatmul.mubr.f32.vlgmr.msra.gmra.mrb[8].mxu1 %v2013_v30 }
 0x850   : > { %v2098_v26 = vpop.f32.mrb[8].mxu0  ;;  %v2169_v43 = vpop.f32.mrb[8].mxu1 }
 0x851   : > { %v2174_v52 = vadd.f32 %v2098_v26, %v2028_v20  ;;  %v2100_v62 = vpop.f32.mrb[9].mxu0  ;;  %v2171_v56 = vpop.f32.mrb[9].mxu1  ;;  %v2176_v0 = vadd.f32 %v2169_v43, %v2030_v59 }
 0x852   : > { %v2175_v54 = vadd.f32 %v2100_v62, %v2029_v23  ;;  %v2177_v4 = vadd.f32 %v2171_v56, %v2031_v1 }
 0x853   : > { %v3119_v61 = vmul.f32 -1.442695, %v2174_v52  ;;  %v3121_v3 = vmul.f32 -1.442695, %v2176_v0 }
 0x854   : > { %v3120_v58 = vmul.f32 -1.442695, %v2175_v54 }
 0x855   : > { %3797 = vpow2.f32 %v3119_v61 }
 0x856   : > { %3799 = vpow2.f32 %v3120_v58 }
 0x857   : > { %3801 = vpow2.f32 %v3121_v3 }
 0x858   : > { %3803 = vtanh.f32 %v2177_v4 }
 0x85f   : > { %v3798_v6 = vpop.eup %3797 }
 0x860   : > { %v3800_v57 = vpop.eup %3799  ;;  %v2187_v42 = vadd.f32 1.0, %v3798_v6 }
 0x861   : > { %v2188_v8 = vadd.f32 1.0, %v3800_v57  ;;  %v3802_v33 = vpop.eup %3801 }
 0x862   : > { %3805 = vrcp.f32 %v2187_v42  ;;  %v3804_v36 = vpop.eup %3803  ;;  %v2189_v34 = vadd.f32 1.0, %v3802_v33 }
 0x863   : > { %3807 = vrcp.f32 %v2188_v8 }
 0x864   : > { %3809 = vrcp.f32 %v2189_v34 }
 0x86c   : > { %v3806_v45 = vpop.eup %3805 }
 0x86d   : > { %v3808_v40 = vpop.eup %3807  ;;  %v2198_v44 = vmul.f32 %v3806_v45, %v3804_v36 }
 0x86e   : > { %v2197_v14 = vmul.f32 %v3808_v40, %v5146_v19  ;;  %v3810_v63 = vpop.eup %3809 }
 0x870   : > { %v5188_v16 = vadd.f32 %v2198_v44, %v2197_v14 }
 0x872   : > { %3811 = vtanh.f32 %v5188_v16 }
 0x877   : > { %2205 = sbr.rel (%p3102_p10) target bundleno = 2176 (0x880), region = 96 }
 0x87c   : > { %v3812_v49 = vpop.eup %3811 }
 0x87d   : > { %v2201_v30 = vmul.f32 %v3812_v49, %v3810_v63 }
 0x87f   : > { %2207 = vst [vmem:[#allocation9 + $0x20] sm:$0xff] %v2201_v30 }
 0x880 PF: > { %2210 = sbr.rel (%p3103_p5) target bundleno = 2183 (0x887), region = 100  ;;  %2212 = vst [vmem:[#allocation3 + $0x20] sm:$0xff] (!%p3103_p5), %v2201_v30 }
 0x887 PF: > { %3470 = vmatprep.subr.bf16.mxu0 %v4855_v10  ;;  %3502 = vmatprep.subr.bf16.mxu1 %v4868_v53  ;;  %v2216_v19 = vld [vmem:[#allocation2 + $0xa0] sm:$0xff]  ;;  %v2217_v20 = vld [vmem:[#allocation2 + $0xa8] sm:$0xff]  ;;  %v2218_v58 = vld [vmem:[#allocation2 + $0xb0] sm:$0xff] }
 0x888   : > { %3472 = vmatpush1.bf16.msra.mxu0 %v4859_v50  ;;  %3504 = vmatpush1.bf16.msra.mxu1 %v4872_v51  ;;  %v2219_v0 = vld [vmem:[#allocation2 + $0xb8] sm:$0xff] }
 0x889   : > { %3474 = vmatprep.subr.bf16.mxu0 %v4863_v48  ;;  %3506 = vmatprep.subr.bf16.mxu1 %v4881_v37 }
 0x88a   : > { %2284 = vmatprep.mubr.f32.mxu0 %v4059_v12  ;;  %2355 = vmatprep.mubr.f32.mxu1 %v4059_v12 }
 0x88c   : > { %3476 = vmatpush1.bf16.msra.mxu0 %v4877_v32  ;;  %3508 = vmatpush1.bf16.msra.mxu1 %v4892_v39 }
 0x88d   : > { %3478 = vmatprep.subr.bf16.mxu0 %v4886_v35  ;;  %3510 = vmatprep.subr.bf16.mxu1 %v4897_v11 }
 0x890   : > { %3480 = vmatpush1.bf16.msra.mxu0 %v4903_v15  ;;  %3512 = vmatpush1.bf16.msra.mxu1 %v4914_v21 }
 0x891   : > { %3482 = vmatprep.subr.bf16.mxu0 %v4908_v18  ;;  %3514 = vmatprep.subr.bf16.mxu1 %v4919_v24 }
 0x894   : > { %3484 = vmatpush1.bf16.msra.mxu0 %v4924_v27  ;;  %3516 = vmatpush1.bf16.msra.mxu1 %v4934_v31 }
 0x895   : > { %3486 = vmatprep.subr.bf16.mxu0 %v4929_v28  ;;  %3518 = vmatprep.subr.bf16.mxu1 %v4939_v47 }
 0x898   : > { %3488 = vmatpush1.bf16.msra.mxu0 %v4944_v46  ;;  %3520 = vmatpush1.bf16.msra.mxu1 %v4954_v60 }
 0x899   : > { %3490 = vmatprep.subr.bf16.mxu0 %v4949_v55  ;;  %3522 = vmatprep.subr.bf16.mxu1 %v4959_v2 }
 0x89c   : > { %3492 = vmatpush1.bf16.msra.mxu0 %v4964_v5  ;;  %3524 = vmatpush1.bf16.msra.mxu1 %v4974_v9 }
 0x89d   : > { %3494 = vmatprep.subr.bf16.mxu0 %v4969_v7  ;;  %3526 = vmatprep.subr.bf16.mxu1 %v4979_v41 }
 0x8a0   : > { %3496 = vmatpush1.bf16.msra.mxu0 %v4984_v38  ;;  %3528 = vmatpush1.bf16.msra.mxu1 %v4994_v17 }
 0x8a1   : > { %3498 = vmatprep.subr.bf16.mxu0 %v4989_v13  ;;  %3530 = vmatprep.subr.bf16.mxu1 %v4999_v22 }
 0x8a4   : > { %3500 = vmatpush1.bf16.msra.mxu0 %v5004_v25  ;;  %3532 = vmatpush1.bf16.msra.mxu1 %v5010_v29 }
 0x8a7   : > { %2285 = vmatmul.mubr.f32.vlgmr.msra.gmra.mrb[10].mxu0 %v2201_v30  ;;  %2356 = vmatmul.mubr.f32.vlgmr.msra.gmra.mrb[10].mxu1 %v2201_v30 }
 0x97a   : > { %v2286_v23 = vpop.f32.mrb[10].mxu0  ;;  %v2357_v26 = vpop.f32.mrb[10].mxu1 }
 0x97b   : > { %v2362_v43 = vadd.f32 %v2286_v23, %v2216_v19  ;;  %v2288_v52 = vpop.f32.mrb[11].mxu0  ;;  %v2359_v62 = vpop.f32.mrb[11].mxu1  ;;  %v2364_v59 = vadd.f32 %v2357_v26, %v2218_v58 }
 0x97c   : > { %v2363_v56 = vadd.f32 %v2288_v52, %v2217_v20  ;;  %v2365_v3 = vadd.f32 %v2359_v62, %v2219_v0 }
 0x97d   : > { %v3124_v54 = vmul.f32 -1.442695, %v2362_v43  ;;  %v3126_v1 = vmul.f32 -1.442695, %v2364_v59 }
 0x97e   : > { %v3125_v61 = vmul.f32 -1.442695, %v2363_v56 }
 0x97f   : > { %3813 = vpow2.f32 %v3124_v54 }
 0x980   : > { %3815 = vpow2.f32 %v3125_v61 }
 0x981   : > { %3817 = vpow2.f32 %v3126_v1 }
 0x982   : > { %3819 = vtanh.f32 %v2365_v3 }
 0x989   : > { %v3814_v4 = vpop.eup %3813 }
 0x98a   : > { %v3816_v6 = vpop.eup %3815  ;;  %v2375_v57 = vadd.f32 1.0, %v3814_v4 }
 0x98b   : > { %v2376_v42 = vadd.f32 1.0, %v3816_v6  ;;  %v3818_v8 = vpop.eup %3817 }
 0x98c   : > { %3821 = vrcp.f32 %v2375_v57  ;;  %v3820_v33 = vpop.eup %3819  ;;  %v2377_v45 = vadd.f32 1.0, %v3818_v8 }
 0x98d   : > { %3823 = vrcp.f32 %v2376_v42 }
 0x98e   : > { %3825 = vrcp.f32 %v2377_v45 }
 0x996   : > { %v3822_v36 = vpop.eup %3821 }
 0x997   : > { %v3824_v34 = vpop.eup %3823  ;;  %v2386_v40 = vmul.f32 %v3822_v36, %v3820_v33 }
 0x998   : > { %v2385_v44 = vmul.f32 %v3824_v34, %v5188_v16  ;;  %v3826_v63 = vpop.eup %3825 }
 0x99a   : > { %v5230_v14 = vadd.f32 %v2386_v40, %v2385_v44 }
 0x99c   : > { %3827 = vtanh.f32 %v5230_v14 }
 0x9a1   : > { %2393 = sbr.rel (%p3102_p10) target bundleno = 2474 (0x9aa), region = 104 }
 0x9a6   : > { %v3828_v49 = vpop.eup %3827 }
 0x9a7   : > { %v2389_v30 = vmul.f32 %v3828_v49, %v3826_v63 }
 0x9a9   : > { %2395 = vst [vmem:[#allocation9 + $0x28] sm:$0xff] %v2389_v30 }
 0x9aa PF: > { %2398 = sbr.rel (%p3103_p5) target bundleno = 2481 (0x9b1), region = 108  ;;  %2400 = vst [vmem:[#allocation3 + $0x28] sm:$0xff] (!%p3103_p5), %v2389_v30 }
 0x9b1 PF: > { %3534 = vmatprep.subr.bf16.mxu0 %v4855_v10  ;;  %3566 = vmatprep.subr.bf16.mxu1 %v4868_v53  ;;  %v2404_v16 = vld [vmem:[#allocation2 + $0xc0] sm:$0xff]  ;;  %v2405_v19 = vld [vmem:[#allocation2 + $0xc8] sm:$0xff]  ;;  %v2406_v61 = vld [vmem:[#allocation2 + $0xd0] sm:$0xff] }
 0x9b2   : > { %3536 = vmatpush1.bf16.msra.mxu0 %v4859_v50  ;;  %3568 = vmatpush1.bf16.msra.mxu1 %v4872_v51  ;;  %v2407_v59 = vld [vmem:[#allocation2 + $0xd8] sm:$0xff] }
 0x9b3   : > { %3538 = vmatprep.subr.bf16.mxu0 %v4863_v48  ;;  %3570 = vmatprep.subr.bf16.mxu1 %v4881_v37 }
 0x9b4   : > { %2472 = vmatprep.mubr.f32.mxu0 %v4059_v12  ;;  %2543 = vmatprep.mubr.f32.mxu1 %v4059_v12 }
 0x9b6   : > { %3540 = vmatpush1.bf16.msra.mxu0 %v4877_v32  ;;  %3572 = vmatpush1.bf16.msra.mxu1 %v4892_v39 }
 0x9b7   : > { %3542 = vmatprep.subr.bf16.mxu0 %v4886_v35  ;;  %3574 = vmatprep.subr.bf16.mxu1 %v4897_v11 }
 0x9ba   : > { %3544 = vmatpush1.bf16.msra.mxu0 %v4903_v15  ;;  %3576 = vmatpush1.bf16.msra.mxu1 %v4914_v21 }
 0x9bb   : > { %3546 = vmatprep.subr.bf16.mxu0 %v4908_v18  ;;  %3578 = vmatprep.subr.bf16.mxu1 %v4919_v24 }
 0x9be   : > { %3548 = vmatpush1.bf16.msra.mxu0 %v4924_v27  ;;  %3580 = vmatpush1.bf16.msra.mxu1 %v4934_v31 }
 0x9bf   : > { %3550 = vmatprep.subr.bf16.mxu0 %v4929_v28  ;;  %3582 = vmatprep.subr.bf16.mxu1 %v4939_v47 }
 0x9c2   : > { %3552 = vmatpush1.bf16.msra.mxu0 %v4944_v46  ;;  %3584 = vmatpush1.bf16.msra.mxu1 %v4954_v60 }
 0x9c3   : > { %3554 = vmatprep.subr.bf16.mxu0 %v4949_v55  ;;  %3586 = vmatprep.subr.bf16.mxu1 %v4959_v2 }
 0x9c6   : > { %3556 = vmatpush1.bf16.msra.mxu0 %v4964_v5  ;;  %3588 = vmatpush1.bf16.msra.mxu1 %v4974_v9 }
 0x9c7   : > { %3558 = vmatprep.subr.bf16.mxu0 %v4969_v7  ;;  %3590 = vmatprep.subr.bf16.mxu1 %v4979_v41 }
 0x9ca   : > { %3560 = vmatpush1.bf16.msra.mxu0 %v4984_v38  ;;  %3592 = vmatpush1.bf16.msra.mxu1 %v4994_v17 }
 0x9cb   : > { %3562 = vmatprep.subr.bf16.mxu0 %v4989_v13  ;;  %3594 = vmatprep.subr.bf16.mxu1 %v4999_v22 }
 0x9ce   : > { %3564 = vmatpush1.bf16.msra.mxu0 %v5004_v25  ;;  %3596 = vmatpush1.bf16.msra.mxu1 %v5010_v29 }
 0x9d1   : > { %2473 = vmatmul.mubr.f32.vlgmr.msra.gmra.mrb[12].mxu0 %v2389_v30  ;;  %2544 = vmatmul.mubr.f32.vlgmr.msra.gmra.mrb[12].mxu1 %v2389_v30 }
 0xaa4   : > { %v2474_v20 = vpop.f32.mrb[12].mxu0  ;;  %v2545_v23 = vpop.f32.mrb[12].mxu1 }
 0xaa5   : > { %v2550_v26 = vadd.f32 %v2474_v20, %v2404_v16  ;;  %v2476_v43 = vpop.f32.mrb[13].mxu0  ;;  %v2547_v52 = vpop.f32.mrb[13].mxu1  ;;  %v2552_v58 = vadd.f32 %v2545_v23, %v2406_v61 }
 0xaa6   : > { %v2551_v62 = vadd.f32 %v2476_v43, %v2405_v19  ;;  %v2553_v1 = vadd.f32 %v2547_v52, %v2407_v59 }
 0xaa7   : > { %v3129_v56 = vmul.f32 -1.442695, %v2550_v26  ;;  %v3131_v0 = vmul.f32 -1.442695, %v2552_v58 }
 0xaa8   : > { %v3130_v54 = vmul.f32 -1.442695, %v2551_v62 }
 0xaa9   : > { %3829 = vpow2.f32 %v3129_v56 }
 0xaaa   : > { %3831 = vpow2.f32 %v3130_v54 }
 0xaab   : > { %3833 = vpow2.f32 %v3131_v0 }
 0xaac   : > { %3835 = vtanh.f32 %v2553_v1 }
 0xab3   : > { %v3830_v3 = vpop.eup %3829 }
 0xab4   : > { %v3832_v4 = vpop.eup %3831  ;;  %v2563_v6 = vadd.f32 1.0, %v3830_v3 }
 0xab5   : > { %v2564_v57 = vadd.f32 1.0, %v3832_v4  ;;  %v3834_v42 = vpop.eup %3833 }
 0xab6   : > { %3837 = vrcp.f32 %v2563_v6  ;;  %v3836_v8 = vpop.eup %3835  ;;  %v2565_v36 = vadd.f32 1.0, %v3834_v42 }
 0xab7   : > { %3839 = vrcp.f32 %v2564_v57 }
 0xab8   : > { %3841 = vrcp.f32 %v2565_v36 }
 0xac0   : > { %v3838_v33 = vpop.eup %3837 }
 0xac1   : > { %v3840_v45 = vpop.eup %3839  ;;  %v2574_v34 = vmul.f32 %v3838_v33, %v3836_v8 }
 0xac2   : > { %v2573_v40 = vmul.f32 %v3840_v45, %v5230_v14  ;;  %v3842_v63 = vpop.eup %3841 }
 0xac4   : > { %v5272_v44 = vadd.f32 %v2574_v34, %v2573_v40 }
 0xac6   : > { %3843 = vtanh.f32 %v5272_v44 }
 0xacb   : > { %2581 = sbr.rel (%p3102_p10) target bundleno = 2772 (0xad4), region = 112 }
 0xad0   : > { %v3844_v49 = vpop.eup %3843 }
 0xad1   : > { %v2577_v30 = vmul.f32 %v3844_v49, %v3842_v63 }
 0xad3   : > { %2583 = vst [vmem:[#allocation9 + $0x30] sm:$0xff] %v2577_v30 }
 0xad4 PF: > { %2586 = sbr.rel (%p3103_p5) target bundleno = 2779 (0xadb), region = 116  ;;  %2588 = vst [vmem:[#allocation3 + $0x30] sm:$0xff] (!%p3103_p5), %v2577_v30 }
 0xadb PF: > { %3598 = vmatprep.subr.bf16.mxu0 %v4855_v10  ;;  %3630 = vmatprep.subr.bf16.mxu1 %v4868_v53  ;;  %v2592_v10 = vld [vmem:[#allocation2 + $0xe0] sm:$0xff] }
 0xadc   : > { %3600 = vmatpush1.bf16.msra.mxu0 %v4859_v50  ;;  %3632 = vmatpush1.bf16.msra.mxu1 %v4872_v51  ;;  %v2593_v50 = vld [vmem:[#allocation2 + $0xe8] sm:$0xff] }
 0xadd   : > { %3602 = vmatprep.subr.bf16.mxu0 %v4863_v48  ;;  %3634 = vmatprep.subr.bf16.mxu1 %v4881_v37 }
 0xade   : > { %2660 = vmatprep.mubr.f32.mxu0 %v4059_v12  ;;  %2731 = vmatprep.mubr.f32.mxu1 %v4059_v12  ;;  %v2594_v12 = vld [vmem:[#allocation2 + $0xf0] sm:$0xff] }
 0xae0   : > { %3604 = vmatpush1.bf16.msra.mxu0 %v4877_v32  ;;  %3636 = vmatpush1.bf16.msra.mxu1 %v4892_v39 }
 0xae1   : > { %3606 = vmatprep.subr.bf16.mxu0 %v4886_v35  ;;  %3638 = vmatprep.subr.bf16.mxu1 %v4897_v11 }
 0xae4   : > { %3608 = vmatpush1.bf16.msra.mxu0 %v4903_v15  ;;  %3640 = vmatpush1.bf16.msra.mxu1 %v4914_v21 }
 0xae5   : > { %3610 = vmatprep.subr.bf16.mxu0 %v4908_v18  ;;  %3642 = vmatprep.subr.bf16.mxu1 %v4919_v24  ;;  %v2595_v18 = vld [vmem:[#allocation2 + $0xf8] sm:$0xff] }
 0xae8   : > { %3612 = vmatpush1.bf16.msra.mxu0 %v4924_v27  ;;  %3644 = vmatpush1.bf16.msra.mxu1 %v4934_v31 }
 0xae9   : > { %3614 = vmatprep.subr.bf16.mxu0 %v4929_v28  ;;  %3646 = vmatprep.subr.bf16.mxu1 %v4939_v47 }
 0xaec   : > { %3616 = vmatpush1.bf16.msra.mxu0 %v4944_v46  ;;  %3648 = vmatpush1.bf16.msra.mxu1 %v4954_v60 }
 0xaed   : > { %3618 = vmatprep.subr.bf16.mxu0 %v4949_v55  ;;  %3650 = vmatprep.subr.bf16.mxu1 %v4959_v2 }
 0xaf0   : > { %3620 = vmatpush1.bf16.msra.mxu0 %v4964_v5  ;;  %3652 = vmatpush1.bf16.msra.mxu1 %v4974_v9 }
 0xaf1   : > { %3622 = vmatprep.subr.bf16.mxu0 %v4969_v7  ;;  %3654 = vmatprep.subr.bf16.mxu1 %v4979_v41 }
 0xaf4   : > { %3624 = vmatpush1.bf16.msra.mxu0 %v4984_v38  ;;  %3656 = vmatpush1.bf16.msra.mxu1 %v4994_v17 }
 0xaf5   : > { %3626 = vmatprep.subr.bf16.mxu0 %v4989_v13  ;;  %3658 = vmatprep.subr.bf16.mxu1 %v4999_v22 }
 0xaf8   : > { %3628 = vmatpush1.bf16.msra.mxu0 %v5004_v25  ;;  %3660 = vmatpush1.bf16.msra.mxu1 %v5010_v29 }
 0xafb   : > { %2661 = vmatmul.mubr.f32.vlgmr.msra.gmra.mrb[14].mxu0 %v2577_v30  ;;  %2732 = vmatmul.mubr.f32.vlgmr.msra.gmra.mrb[14].mxu1 %v2577_v30 }
 0xbce   : > { %v2662_v48 = vpop.f32.mrb[14].mxu0  ;;  %v2733_v53 = vpop.f32.mrb[14].mxu1 }
 0xbcf   : > { %v2738_v51 = vadd.f32 %v2662_v48, %v2592_v10  ;;  %v2664_v32 = vpop.f32.mrb[15].mxu0  ;;  %v2735_v37 = vpop.f32.mrb[15].mxu1  ;;  %v2740_v15 = vadd.f32 %v2733_v53, %v2594_v12 }
 0xbd0   : > { %v2739_v35 = vadd.f32 %v2664_v32, %v2593_v50  ;;  %v2741_v24 = vadd.f32 %v2735_v37, %v2595_v18 }
 0xbd1   : > { %v3134_v39 = vmul.f32 -1.442695, %v2738_v51  ;;  %v3136_v21 = vmul.f32 -1.442695, %v2740_v15 }
 0xbd2   : > { %v3135_v11 = vmul.f32 -1.442695, %v2739_v35 }
 0xbd3   : > { %3845 = vpow2.f32 %v3134_v39 }
 0xbd4   : > { %3847 = vpow2.f32 %v3135_v11 }
 0xbd5   : > { %3849 = vpow2.f32 %v3136_v21 }
 0xbd6   : > { %3851 = vtanh.f32 %v2741_v24 }
 0xbdd   : > { %v3846_v27 = vpop.eup %3845 }
 0xbde   : > { %v3848_v28 = vpop.eup %3847  ;;  %v2751_v31 = vadd.f32 1.0, %v3846_v27 }
 0xbdf   : > { %v2752_v47 = vadd.f32 1.0, %v3848_v28  ;;  %v3850_v46 = vpop.eup %3849 }
 0xbe0   : > { %3853 = vrcp.f32 %v2751_v31  ;;  %v3852_v55 = vpop.eup %3851  ;;  %v2753_v2 = vadd.f32 1.0, %v3850_v46 }
 0xbe1   : > { %3855 = vrcp.f32 %v2752_v47 }
 0xbe2   : > { %3857 = vrcp.f32 %v2753_v2 }
 0xbea   : > { %v3854_v60 = vpop.eup %3853 }
 0xbeb   : > { %v3856_v5 = vpop.eup %3855  ;;  %v2762_v7 = vmul.f32 %v3854_v60, %v3852_v55 }
 0xbec   : > { %v2761_v9 = vmul.f32 %v3856_v5, %v5272_v44  ;;  %v3858_v38 = vpop.eup %3857 }
 0xbee   : > { %v2763_v41 = vadd.f32 %v2762_v7, %v2761_v9 }
 0xbf0   : > { %3859 = vtanh.f32 %v2763_v41 }
 0xbf5   : > { %2769 = sbr.rel (%p3102_p10) target bundleno = 3070 (0xbfe), region = 120 }
 0xbfa   : > { %v3860_v13 = vpop.eup %3859 }
 0xbfb   : > { %v2765_v17 = vmul.f32 %v3860_v13, %v3858_v38 }
 0xbfd   : > { %2771 = vst [vmem:[#allocation9 + $0x38] sm:$0xff] %v2765_v17 }
 0xbfe PF: > { %2774 = sbr.rel (%p3103_p5) target bundleno = 3077 (0xc05), region = 124  ;;  %2776 = vst [vmem:[#allocation3 + $0x38] sm:$0xff] (!%p3103_p5), %v2765_v17 }
 0xc05 PF: > { %2777 = vst [vmem:[%s4589_s19] sm:$0xff] %v2765_v17  ;;  %2778 = vst [vmem:[%s4593_s16] sm:$0xff] %v2763_v41  ;;  %s2779_s25 = sand.u32 1, %s4129_s9   ;;  %s3142_s22 = sshll.u32 %s4129_s9, 7 }
 0xc06   : > { %s5325_s21 = scalar_lea.hbm %s5420_s7, %s3142_s22  ;;  %s2811_s12 = sshll.u32 %s4589_s19, 4  ;;  %s2812_s12 = int_to_ptr.vmem [resolvable:$true] %s2811_s12 }
 0xc07   : > { %s5331_s3 = scalar_lea.hbm %s5421_s8, %s3142_s22  ;;  %s5333_s10 = scalar_lea.sflag [#allocation11], %s2779_s25 }
 0xc08   : > { %s3921_s23 = scalar_lea.vmem %s2812_s12, 128  ;;  %p5545_p7 = scmp.ne.s32.totalorder %s5431_s17, 0 }
 0xc09   : > { %p3922_p8 = scmp.ne.s32.totalorder %s2812_s12, %s3921_s23  ;;  %s4060_s14 = smov [#allocation10]  }
 0xc0a   : > { %s3925_s15 = sshll.u32 %s4060_s14, 4  ;;  %s3926_s15 = int_to_ptr.vmem [resolvable:$false] %s3925_s15 }
 0xc0b   : > { %p3923_p9 = pnand %p3922_p8, %p5545_p7  ;;  %s3927_s27 = scalar_lea.vmem %s3926_s15, 256 }
 0xc0c   : > { %p3928_p3 = scmp.lt.s32.totalorder %s2812_s12, %s3926_s15  ;;  %p3929_p0 = scmp.lt.s32.totalorder %s3927_s27, %s3921_s23 }
 0xc0d   : > { %p3924_p12 = pneg %p3923_p9 }
 0xc0e   : > { %p3930_p2 = por %p3929_p0, %p3928_p3 }
 0xc10   : > { %p3931_p4 = pnand %p3930_p2, %p3924_p12 }
 0xc12   : > { %3934 = shalt.err (!%p3931_p4)
}
 0xc13   : > { %s3935_s19 = scalar_lea.hbm %s5325_s21, 128  ;;  %s3939_s24 = scalar_lea.hbm %s5420_s7, 256 }
 0xc14   : > { %p3936_p6 = scmp.ne.s32.totalorder %s5325_s21, %s3935_s19  ;;  %p3940_p11 = scmp.lt.u32.totalorder %s5325_s21, %s5420_s7 }
 0xc15   : > { %p3941_p10 = scmp.lt.u32.totalorder %s3939_s24, %s3935_s19  ;;  %p3943_p8 = scmp.lt.u32.totalorder %s3935_s19, %s5325_s21 }
 0xc16   : > { %p3937_p13 = pnand %p3936_p6, %p5545_p7 }
 0xc17   : > { %p3942_p5 = por %p3941_p10, %p3940_p11 }
 0xc18   : > { %p3938_p1 = pneg %p3937_p13 }
 0xc19   : > { %p3944_p9 = por %p3943_p8, %p3942_p5 }
 0xc1b   : > { %p3945_p12 = pnand %p3944_p9, %p3938_p1 }
 0xc1d   : > { %3948 = shalt.err (!%p3945_p12)
}
 0xc1e   : > { %3667 = dma.vmem_to_hbm [thread:$0]  (%p5545_p7), %s2812_s12, 128, %s5325_s21, %s5333_s10  }
 0xc1f   : > { %s4061_s13 = smov [#allocation9]   ;;  %p5546_p0 = scmp.eq.s32.totalorder %s4129_s9, 1 }
 0xc20   : > { %s2795_s23 = sshll.u32 %s4061_s13, 4  ;;  %s2796_s23 = int_to_ptr.vmem [resolvable:$true] %s2795_s23 }
 0xc21   : > { %s3949_s14 = scalar_lea.vmem %s2796_s23, 1024  ;;  %p3956_p6 = scmp.lt.s32.totalorder %s2796_s23, %s2796_s23 }
 0xc22   : > { %p3950_p3 = scmp.ne.s32.totalorder %s2796_s23, %s3949_s14  ;;  %p3957_p13 = scmp.lt.s32.totalorder %s3949_s14, %s3949_s14 }
 0xc24   : > { %p3951_p2 = pnand %p3950_p3, %p5546_p0  ;;  %p3958_p11 = por %p3957_p13, %p3956_p6 }
 0xc26   : > { %p3952_p4 = pneg %p3951_p2 }
 0xc28   : > { %p3959_p10 = pnand %p3958_p11, %p3952_p4 }
 0xc2a   : > { %3962 = shalt.err (!%p3959_p10)
}
 0xc2b   : > { %s3963_s19 = scalar_lea.hbm %s5419_s6, 1024  ;;  %p5547_p5 = pmov %p5546_p0 }
 0xc2c   : > { %p3964_p1 = scmp.ne.s32.totalorder %s5419_s6, %s3963_s19  ;;  %p3969_p12 = scmp.lt.u32.totalorder %s3963_s19, %s5419_s6 }
 0xc2e   : > { %p3965_p8 = pnand %p3964_p1, %p5547_p5 }
 0xc30   : > { %p3966_p9 = pneg %p3965_p8 }
 0xc32   : > { %p3971_p3 = pnand %p3969_p12, %p3966_p9 }
 0xc34   : > { %3974 = shalt.err (!%p3971_p3)
}
 0xc35   : > { %s4062_s24 = smov 128   ;;  %s4063_s20 = smov 8  }
 0xc36   : > { %3666 = dma.vmem_to_hbm [thread:$0]  (%p5546_p0), %s2796_s23, 1024, %s5419_s6, [#allocation6], %s4062_s24, %s4062_s24, %s4063_s20  }
 0xc37   : > { %s2824_s14 = sshll.u32 %s4593_s16, 4  ;;  %s4064_s27 = smov [#allocation12]   ;;  %s2825_s14 = int_to_ptr.vmem [resolvable:$true] %s2824_s14 }
 0xc38   : > { %s3975_s15 = scalar_lea.vmem %s2825_s14, 128  ;;  %s3979_s19 = sshll.u32 %s4064_s27, 4  ;;  %s3980_s19 = int_to_ptr.vmem [resolvable:$false] %s3979_s19 }
 0xc39   : > { %p3976_p2 = scmp.ne.s32.totalorder %s2825_s14, %s3975_s15  ;;  %s3981_s25 = scalar_lea.vmem %s3980_s19, 256 }
 0xc3a   : > { %p3982_p13 = scmp.lt.s32.totalorder %s2825_s14, %s3980_s19  ;;  %p3983_p11 = scmp.lt.s32.totalorder %s3981_s25, %s3975_s15 }
 0xc3b   : > { %p3977_p4 = pnand %p3976_p2, %p5545_p7 }
 0xc3c   : > { %p3984_p10 = por %p3983_p11, %p3982_p13 }
 0xc3d   : > { %p3978_p6 = pneg %p3977_p4 }
 0xc3f   : > { %p3985_p1 = pnand %p3984_p10, %p3978_p6 }
 0xc41   : > { %3988 = shalt.err (!%p3985_p1)
}
 0xc42   : > { %s3989_s16 = scalar_lea.hbm %s5331_s3, 128  ;;  %s3993_s12 = scalar_lea.hbm %s5421_s8, 256 }
 0xc43   : > { %p3990_p5 = scmp.ne.s32.totalorder %s5331_s3, %s3989_s16  ;;  %p3994_p12 = scmp.lt.u32.totalorder %s5331_s3, %s5421_s8 }
 0xc44   : > { %p3995_p3 = scmp.lt.u32.totalorder %s3993_s12, %s3989_s16  ;;  %p3997_p2 = scmp.lt.u32.totalorder %s3989_s16, %s5331_s3 }
 0xc45   : > { %p3991_p8 = pnand %p3990_p5, %p5545_p7 }
 0xc46   : > { %p3996_p0 = por %p3995_p3, %p3994_p12 }
 0xc47   : > { %p3992_p9 = pneg %p3991_p8 }
 0xc48   : > { %p3998_p4 = por %p3997_p2, %p3996_p0 }
 0xc4a   : > { %p3999_p6 = pnand %p3998_p4, %p3992_p9 }
 0xc4c   : > { %4002 = shalt.err (!%p3999_p6)
}
 0xc4d   : > { %3668 = dma.vmem_to_hbm [thread:$0]  (%p5545_p7), %s2825_s14, 128, %s5331_s3, %s5333_s10  }
 0xc4e   : > { %p5548_p13 = scmp.eq.s32.totalorder %s4129_s9, 1 }
 0xc50   : > { %4028 = dma.done.wait (%p5548_p13), [#allocation6], 1024   ;;  %p5549_p11 = pmov %p5548_p13 }
 0xc52   : > { %4030 = vsyncadd (%p5549_p11), [#allocation6], 4294966272 }
 0xc53 PF: > { %s5550_s20 = sadd.s32 4294967294, %s4049_s30   ;;  %p5551_p10 = scmp.ne.s32.totalorder %s5432_s18, 0 }
 0xc54   : > { %s2840_s26 = sand.u32 1, %s5550_s20   ;;  %p5552_p1 = scmp.ge.s32.totalorder %s4049_s30, 2 }
 0xc55   : > { %s2841_s13 = scalar_lea.sflag [#allocation11], %s2840_s26 }
 0xc56   : > { %p3681_p5 = pnand %p5552_p1, %p5551_p10 }
 0xc58   : > { %4032 = dma.done.wait (!%p3681_p5), %s2841_s13, 256  }
 0xc59   : > { %4034 = vsyncadd (!%p3681_p5), %s2841_s13, 4294967040  ;;  %s5553_s17 = sld [smem:[#allocation17_spill]]  ;;  %p26_p7 = scmp.ge.s32.totalorder %s4133_s11, 4  }
 0xc5a   : > { %s5554_s27 = smov %s4041_s28  ;;  %s5555_s28 = smov %s4045_s29 }
 0xc5b   : > { %s5557_s30 = smov %s4133_s11  ;;  %28 = sbr.rel (!%p26_p7) target bundleno = 10 (0xa), region = 231 }
 0xc5f   : > { %s5556_s29 = smov %s5553_s17 }
 0xc62   :  { %2855 = vsyncpa [#allocation5], 1 }
 0xc63   :  { %2857 = vsyncpa [#allocation5 + $0x1], 1 }
 0xc64   :  { %2858 = vsyncpa [#allocation8], 1 }
 0xc65   :  { %2860 = vsyncpa [#allocation8 + $0x1], 1 }
 0xc66   :  { %2861 = vsyncpa [#allocation6], 1 }
 0xc67   :  { %2863 = vsyncpa [#allocation6 + $0x1], 1 }
 0xc68   :  { %2864 = vsyncpa [#allocation11], 1 }
 0xc69   :  { %2866 = vsyncpa [#allocation11 + $0x1], 1 }

</bundles_post_ra>
